<compile_context>
chip_gen: v7x
topology: tpu7x:2x2x1
jax: 0.10.0
libtpu: 0.0.40
codegen_flags: <defaults>
</compile_context>

<pallas_src>
import functools
import numpy as np
import jax
import jax.numpy as jnp
from jax.experimental import pallas as pl
from jax.experimental.pallas import tpu as pltpu


def _round_up(x, m):
    return ((x + m - 1) // m) * m


# ---------------------------------------------------------------------------
# Pallas kernel: tiled (pre-activation -> bf16 matmul -> f32 acc -> bias -> post-activation)
# ---------------------------------------------------------------------------
def _gemm_kernel(a_ref, w_ref, b_ref, o_ref, acc_ref, *, pre_act, post_act):
    k = pl.program_id(2)

    @pl.when(k == 0)
    def _():
        acc_ref[...] = jnp.zeros_like(acc_ref)

    a = a_ref[...]                       # bf16 tile
    if pre_act == "leaky":               # LeakyReLU(0.2) applied to conv input
        a = jnp.where(a > 0, a, a * 0.2)
    elif pre_act == "relu":              # ReLU applied to conv input
        a = jnp.maximum(a, 0.0)
    acc_ref[...] += jnp.dot(a, w_ref[...], preferred_element_type=jnp.float32)

    @pl.when(k == pl.num_programs(2) - 1)
    def _():
        y = acc_ref[...] + b_ref[...]    # f32 epilogue
        if post_act == "tanh":           # outermost Tanh
            y = jnp.tanh(y)
        o_ref[...] = y.astype(o_ref.dtype)


def gemm_bias_act(A, Wm, b, pre_act=None, post_act=None):
    """A: (M, K), Wm: (K, Cout) bf16, b: (Cout,) f32 -> (M, Cout) f32."""
    M, K = A.shape
    Cout = Wm.shape[1]

    TM = min(512, _round_up(M, 16))          # big M-tiles for large-spatial layers
    TN = min(512, _round_up(Cout, 128))      # lane-dense output (>=128)
    TK = min(512, _round_up(K, 128))

    Mp, Kp, Np = _round_up(M, TM), _round_up(K, TK), _round_up(Cout, TN)

    A_p = jnp.pad(A.astype(jnp.bfloat16), ((0, Mp - M), (0, Kp - K)))
    W_p = jnp.pad(Wm.astype(jnp.bfloat16), ((0, Kp - K), (0, Np - Cout)))
    b_p = jnp.pad(b.astype(jnp.float32), (0, Np - Cout)).reshape(1, Np)

    grid = (Mp // TM, Np // TN, Kp // TK)
    kernel = functools.partial(_gemm_kernel, pre_act=pre_act, post_act=post_act)

    cost = pl.CostEstimate(
        flops=2 * Mp * Kp * Np,
        transcendentals=Mp * Np if post_act == "tanh" else 0,
        bytes_accessed=Mp * Kp * 2 * (Np // TN) + Kp * Np * 2 * (Mp // TM) + Mp * Np * 4,
    )

    out = pl.pallas_call(
        kernel,
        out_shape=jax.ShapeDtypeStruct((Mp, Np), jnp.float32),
        grid=grid,
        in_specs=[
            pl.BlockSpec((TM, TK), lambda i, j, k: (i, k)),
            pl.BlockSpec((TK, TN), lambda i, j, k: (k, j)),
            pl.BlockSpec((1, TN), lambda i, j, k: (0, j)),
        ],
        out_specs=pl.BlockSpec((TM, TN), lambda i, j, k: (i, j)),
        scratch_shapes=[pltpu.VMEM((TM, TN), jnp.float32)],
        compiler_params=pltpu.CompilerParams(
            dimension_semantics=("parallel", "parallel", "arbitrary"),
            vmem_limit_bytes=48 * 1024 * 1024,
        ),
        cost_estimate=cost,
    )(A_p, W_p, b_p)
    return out[:M, :Cout]


# ---------------------------------------------------------------------------
# Conv2d(k=4, s=2, p=1) as im2col GEMM (NHWC)
# ---------------------------------------------------------------------------
def conv_down_nhwc(x, Wm, b, pre_act=None):
    """x: (N,H,W,Cin), Wm: (16*Cin, Cout) prepared bf16, b: (Cout,)."""
    N, H, W, Cin = x.shape
    Ho, Wo = H // 2, W // 2
    Cout = Wm.shape[1]
    xp = jnp.pad(x, ((0, 0), (1, 1), (1, 1), (0, 0)))
    cols = []
    for ky in range(4):
        for kx in range(4):
            cols.append(xp[:, ky:ky + 2 * Ho:2, kx:kx + 2 * Wo:2, :])
    A = jnp.stack(cols, axis=3).reshape(N * Ho * Wo, 16 * Cin)   # cols ordered (ky,kx,ci)
    y = gemm_bias_act(A, Wm, b, pre_act=pre_act)
    return y.reshape(N, Ho, Wo, Cout)


# ---------------------------------------------------------------------------
# ConvTranspose2d(k=4, s=2, p=1) as 4 phase sub-GEMMs (no structural zeros)
#   out[2q+ry, 2p+rx] = sum over 2x2 taps of x[q+dy, p+dx] * w[ky, kx]
# ---------------------------------------------------------------------------
_PHASE_TAPS = {0: ((1, 0), (3, -1)),   # output phase 0: (kernel tap, input offset)
               1: ((0, 1), (2, 0))}    # output phase 1


def conv_up_nhwc(x, up_mats, b, pre_act="relu", post_act=None):
    """x: (N,H,W,Cin), up_mats[(ry,rx)]: (4*Cin, Cout) prepared bf16, b: (Cout,)."""
    N, H, W, Cin = x.shape
    Cout = b.shape[0]
    xp = jnp.pad(x, ((0, 0), (1, 1), (1, 1), (0, 0)))
    phase = {}
    for ry in (0, 1):
        dys = [t[1] for t in _PHASE_TAPS[ry]]
        for rx in (0, 1):
            dxs = [t[1] for t in _PHASE_TAPS[rx]]
            cols = []
            for dy in dys:
                for dx in dxs:
                    cols.append(xp[:, 1 + dy:1 + dy + H, 1 + dx:1 + dx + W, :])
            A = jnp.stack(cols, axis=3).reshape(N * H * W, 4 * Cin)  # (ty,tx,ci) order
            y = gemm_bias_act(A, up_mats[(ry, rx)], b, pre_act=pre_act, post_act=post_act)
            phase[(ry, rx)] = y.reshape(N, H, W, Cout)
    row0 = jnp.stack([phase[(0, 0)], phase[(0, 1)]], axis=3)   # (N,H,W,2,C)
    row1 = jnp.stack([phase[(1, 0)], phase[(1, 1)]], axis=3)
    return jnp.stack([row0, row1], axis=2).reshape(N, 2 * H, 2 * W, Cout)


# ---------------------------------------------------------------------------
# Parameter construction mirroring UnetGenerator.__init__ (deterministic init),
# with GEMM-ready (hoisted) weight matrices.
# ---------------------------------------------------------------------------
def _init_conv(key, cout, cin, k=4):
    wk, bk = jax.random.split(key)
    bound = 1.0 / np.sqrt(cin * k * k)
    w = jax.random.uniform(wk, (cout, cin, k, k), jnp.float32, -bound, bound)
    b = jax.random.uniform(bk, (cout,), jnp.float32, -bound, bound)
    return w, b


def _init_convT(key, cin, cout, k=4):
    wk, bk = jax.random.split(key)
    bound = 1.0 / np.sqrt(cin * k * k)
    w = jax.random.uniform(wk, (cin, cout, k, k), jnp.float32, -bound, bound)
    b = jax.random.uniform(bk, (cout,), jnp.float32, -bound, bound)
    return w, b


def _prep_down_w(w):
    # (Cout, Cin, 4, 4) -> (16*Cin, Cout), rows ordered (ky, kx, ci); bf16 for MXU.
    cout, cin = w.shape[0], w.shape[1]
    return w.transpose(2, 3, 1, 0).reshape(16 * cin, cout).astype(jnp.bfloat16)


def _prep_up_w(w):
    # (Cin, Cout, 4, 4) -> per-phase (4*Cin, Cout), rows ordered (ty, tx, ci); bf16.
    cin, cout = w.shape[0], w.shape[1]
    mats = {}
    for ry in (0, 1):
        kys = [t[0] for t in _PHASE_TAPS[ry]]
        for rx in (0, 1):
            kxs = [t[0] for t in _PHASE_TAPS[rx]]
            wsel = w[:, :, kys, :][:, :, :, kxs]            # (Cin, Cout, 2, 2)
            mats[(ry, rx)] = (wsel.transpose(2, 3, 0, 1)
                              .reshape(4 * cin, cout).astype(jnp.bfloat16))
    return mats


def build_block(key, outer_nc, inner_nc, input_nc=None, submodule=None,
                outermost=False, innermost=False):
    if input_nc is None:
        input_nc = outer_nc
    kd, ku = jax.random.split(key)
    dw, db = _init_conv(kd, inner_nc, input_nc)
    up_in = inner_nc if innermost else inner_nc * 2
    uw, ub = _init_convT(ku, up_in, outer_nc)
    return dict(down_Wm=_prep_down_w(dw), down_b=db,
                up_Wm=_prep_up_w(uw), up_b=ub,
                sub=submodule, outermost=outermost, innermost=innermost)


def build_unet(key, input_nc, output_nc, num_downs, ngf):
    keys = jax.random.split(key, num_downs)
    blk = build_block(keys[0], ngf * 8, ngf * 8, innermost=True)
    idx = 1
    for _ in range(num_downs - 5):
        blk = build_block(keys[idx], ngf * 8, ngf * 8, submodule=blk)
        idx += 1
    # TODO(synk): use_dropout=True branch (nn.Dropout(0.5)) not implemented (inference-mode forward).
    blk = build_block(keys[idx], ngf * 4, ngf * 8, submodule=blk); idx += 1
    blk = build_block(keys[idx], ngf * 2, ngf * 4, submodule=blk); idx += 1
    blk = build_block(keys[idx], ngf, ngf * 2, submodule=blk); idx += 1
    blk = build_block(keys[idx], output_nc, ngf, input_nc=input_nc,
                      submodule=blk, outermost=True)
    return blk


# ---------------------------------------------------------------------------
# Forward pass (mirrors UnetSkipConnectionBlock.forward recursion), NHWC internally
# ---------------------------------------------------------------------------
def unet_block_forward(p, x):
    if p["outermost"]:
        d = conv_down_nhwc(x, p["down_Wm"], p["down_b"], pre_act=None)      # downconv
        s = unet_block_forward(p["sub"], d)                                 # submodule
        return conv_up_nhwc(s, p["up_Wm"], p["up_b"],                       # ReLU, upconv, Tanh
                            pre_act="relu", post_act="tanh")
    elif p["innermost"]:
        d = conv_down_nhwc(x, p["down_Wm"], p["down_b"], pre_act="leaky")   # LeakyReLU, downconv
        u = conv_up_nhwc(d, p["up_Wm"], p["up_b"], pre_act="relu")          # ReLU, upconv
        return jnp.concatenate([x, u], axis=-1)                             # skip cat (channels)
    else:
        d = conv_down_nhwc(x, p["down_Wm"], p["down_b"], pre_act="leaky")
        s = unet_block_forward(p["sub"], d)
        u = conv_up_nhwc(s, p["up_Wm"], p["up_b"], pre_act="relu")
        return jnp.concatenate([x, u], axis=-1)


def unet_generator_forward(params, x_nchw):
    x = jnp.transpose(x_nchw, (0, 2, 3, 1))      # single NCHW -> NHWC at the boundary
    y = unet_block_forward(params, x)
    return jnp.transpose(y, (0, 3, 1, 2))        # back to NCHW to match PyTorch


# ---------------------------------------------------------------------------
if __name__ == "__main__":
    # Small shapes: num_downs=5 requires spatial >= 32 (bottleneck 1x1).
    N, input_nc, output_nc, ngf, num_downs, H = 2, 2, 2, 8, 5, 32

    key = jax.random.PRNGKey(0)
    pkey, xkey = jax.random.split(key)
    params = build_unet(pkey, input_nc, output_nc, num_downs, ngf)
    x = jax.random.normal(xkey, (N, input_nc, H, H), jnp.float32)

    fwd = jax.jit(lambda inp: unet_generator_forward(params, inp))
    out = fwd(x)
    out = jax.block_until_ready(out)

    assert out.shape == (N, output_nc, H, H), out.shape
    assert bool(jnp.all(jnp.isfinite(out)))
    assert bool(jnp.all(jnp.abs(out) <= 1.0 + 1e-6))  # Tanh range
    print("KERNEL_OK")
</pallas_src>

<mosaic_0001>
module attributes {stable_mosaic.version = 11 : i64} {
  func.func @_gemm_kernel(%arg0: i32, %arg1: i32, %arg2: i32, %arg3: memref<512x128xbf16, #tpu.memory_space<vmem>>, %arg4: memref<128x128xbf16, #tpu.memory_space<vmem>>, %arg5: memref<1x128xf32, #tpu.memory_space<vmem>>, %arg6: memref<512x128xf32, #tpu.memory_space<vmem>>, %arg7: memref<512x128xf32, #tpu.memory_space<vmem>>) attributes {dimension_semantics = [#tpu.dimension_semantics<parallel>, #tpu.dimension_semantics<parallel>, #tpu.dimension_semantics<arbitrary>], iteration_bounds = array<i64: 1, 1, 1>, scalar_prefetch = 0 : i64, scratch_operands = 1 : i64, tpu.core_type = #tpu.core_type<tc>, window_params = [{transform_indices = @transform_0, window_bounds = array<i64: 512, 128>}, {transform_indices = @transform_1, window_bounds = array<i64: 128, 128>}, {transform_indices = @transform_2, window_bounds = array<i64: 1, 128>}, {transform_indices = @transform_3, window_bounds = array<i64: 512, 128>}]} {
    %c0_i32 = arith.constant 0 : i32
    %0 = arith.cmpi eq, %arg2, %c0_i32 : i32
    %1 = arith.extui %0 : i1 to i32
    %c0_i32_0 = arith.constant 0 : i32
    %2 = arith.cmpi ne, %1, %c0_i32_0 : i32
    scf.if %2 {
      %cst_10 = arith.constant 0.000000e+00 : f32
      %12 = vector.broadcast %cst_10 : f32 to vector<512x128xf32>
      %c0_11 = arith.constant 0 : index
      %c0_12 = arith.constant 0 : index
      %13 = vector.load %arg7[%c0_11, %c0_12] : memref<512x128xf32, #tpu.memory_space<vmem>>, vector<512x128xf32>
      tpu.vector_store %arg7[%c0_11, %c0_12], %12 {strides = array<i32>} : memref<512x128xf32, #tpu.memory_space<vmem>>, vector<512x128xf32>,
    } else {
    }
    %c0 = arith.constant 0 : index
    %c0_1 = arith.constant 0 : index
    %3 = vector.load %arg3[%c0, %c0_1] : memref<512x128xbf16, #tpu.memory_space<vmem>>, vector<512x128xbf16>
    %c0_2 = arith.constant 0 : index
    %c0_3 = arith.constant 0 : index
    %4 = vector.load %arg7[%c0_2, %c0_3] : memref<512x128xf32, #tpu.memory_space<vmem>>, vector<512x128xf32>
    %c0_4 = arith.constant 0 : index
    %c0_5 = arith.constant 0 : index
    %5 = vector.load %arg4[%c0_4, %c0_5] : memref<128x128xbf16, #tpu.memory_space<vmem>>, vector<128x128xbf16>
    %cst = arith.constant dense<0.000000e+00> : vector<512x128xf32>
    %6 = tpu.matmul %3, %5, %cst {dimension_numbers = #tpu.dot_dimension_numbers<[1], [0], [0], [1], [0, 0, 1, 1], [], []>} : vector<512x128xbf16>, vector<128x128xbf16>, vector<512x128xf32> -> vector<512x128xf32>
    %7 = arith.addf %4, %6 : vector<512x128xf32>
    %c0_6 = arith.constant 0 : index
    %c0_7 = arith.constant 0 : index
    %8 = vector.load %arg7[%c0_6, %c0_7] : memref<512x128xf32, #tpu.memory_space<vmem>>, vector<512x128xf32>
    tpu.vector_store %arg7[%c0_6, %c0_7], %7 {strides = array<i32>} : memref<512x128xf32, #tpu.memory_space<vmem>>, vector<512x128xf32>,
    %c0_i32_8 = arith.constant 0 : i32
    %9 = arith.cmpi eq, %arg2, %c0_i32_8 : i32
    %10 = arith.extui %9 : i1 to i32
    %c0_i32_9 = arith.constant 0 : i32
    %11 = arith.cmpi ne, %10, %c0_i32_9 : i32
    scf.if %11 {
      %c0_10 = arith.constant 0 : index
      %c0_11 = arith.constant 0 : index
      %12 = vector.load %arg7[%c0_10, %c0_11] : memref<512x128xf32, #tpu.memory_space<vmem>>, vector<512x128xf32>
      %c0_12 = arith.constant 0 : index
      %c0_13 = arith.constant 0 : index
      %13 = vector.load %arg5[%c0_12, %c0_13] : memref<1x128xf32, #tpu.memory_space<vmem>>, vector<1x128xf32>
      %14 = vector.broadcast %13 : vector<1x128xf32> to vector<512x128xf32>
      %15 = arith.addf %12, %14 : vector<512x128xf32>
      %c0_14 = arith.constant 0 : index
      %c0_15 = arith.constant 0 : index
      %16 = vector.load %arg6[%c0_14, %c0_15] : memref<512x128xf32, #tpu.memory_space<vmem>>, vector<512x128xf32>
      tpu.vector_store %arg6[%c0_14, %c0_15], %15 {strides = array<i32>} : memref<512x128xf32, #tpu.memory_space<vmem>>, vector<512x128xf32>,
    } else {
    }
    return
  }
  func.func @transform_0(%arg0: i32, %arg1: i32, %arg2: i32) -> (i32, i32) {
    %c0_i32 = arith.constant 0 : i32
    return %arg0, %arg2 : i32, i32
  }
  func.func @transform_1(%arg0: i32, %arg1: i32, %arg2: i32) -> (i32, i32) {
    %c0_i32 = arith.constant 0 : i32
    return %arg2, %arg1 : i32, i32
  }
  func.func @transform_2(%arg0: i32, %arg1: i32, %arg2: i32) -> (i32, i32) {
    %c0_i32 = arith.constant 0 : i32
    %c0_i32_0 = arith.constant 0 : i32
    return %c0_i32, %arg1 : i32, i32
  }
  func.func @transform_3(%arg0: i32, %arg1: i32, %arg2: i32) -> (i32, i32) {
    %c0_i32 = arith.constant 0 : i32
    return %arg0, %arg1 : i32, i32
  }
}

module attributes {stable_mosaic.version = 11 : i64} {
  func.func @_gemm_kernel(%arg0: i32, %arg1: i32, %arg2: i32, %arg3: memref<128x128xbf16, #tpu.memory_space<vmem>>, %arg4: memref<128x128xbf16, #tpu.memory_space<vmem>>, %arg5: memref<1x128xf32, #tpu.memory_space<vmem>>, %arg6: memref<128x128xf32, #tpu.memory_space<vmem>>, %arg7: memref<128x128xf32, #tpu.memory_space<vmem>>) attributes {dimension_semantics = [#tpu.dimension_semantics<parallel>, #tpu.dimension_semantics<parallel>, #tpu.dimension_semantics<arbitrary>], iteration_bounds = array<i64: 1, 1, 1>, scalar_prefetch = 0 : i64, scratch_operands = 1 : i64, tpu.core_type = #tpu.core_type<tc>, window_params = [{transform_indices = @transform_0, window_bounds = array<i64: 128, 128>}, {transform_indices = @transform_1, window_bounds = array<i64: 128, 128>}, {transform_indices = @transform_2, window_bounds = array<i64: 1, 128>}, {transform_indices = @transform_3, window_bounds = array<i64: 128, 128>}]} {
    %c0_i32 = arith.constant 0 : i32
    %0 = arith.cmpi eq, %arg2, %c0_i32 : i32
    %1 = arith.extui %0 : i1 to i32
    %c0_i32_0 = arith.constant 0 : i32
    %2 = arith.cmpi ne, %1, %c0_i32_0 : i32
    scf.if %2 {
      %cst_12 = arith.constant 0.000000e+00 : f32
      %17 = vector.broadcast %cst_12 : f32 to vector<128x128xf32>
      %c0_13 = arith.constant 0 : index
      %c0_14 = arith.constant 0 : index
      %18 = vector.load %arg7[%c0_13, %c0_14] : memref<128x128xf32, #tpu.memory_space<vmem>>, vector<128x128xf32>
      tpu.vector_store %arg7[%c0_13, %c0_14], %17 {strides = array<i32>} : memref<128x128xf32, #tpu.memory_space<vmem>>, vector<128x128xf32>,
    } else {
    }
    %c0 = arith.constant 0 : index
    %c0_1 = arith.constant 0 : index
    %3 = vector.load %arg3[%c0, %c0_1] : memref<128x128xbf16, #tpu.memory_space<vmem>>, vector<128x128xbf16>
    %cst = arith.constant 0.000000e+00 : bf16
    %4 = vector.broadcast %cst : bf16 to vector<128x128xbf16>
    %5 = arith.cmpf ogt, %3, %4 : vector<128x128xbf16>
    %cst_2 = arith.constant 2.001950e-01 : bf16
    %6 = vector.broadcast %cst_2 : bf16 to vector<128x128xbf16>
    %7 = arith.mulf %3, %6 : vector<128x128xbf16>
    %8 = arith.select %5, %3, %7 : vector<128x128xi1>, vector<128x128xbf16>
    %c0_3 = arith.constant 0 : index
    %c0_4 = arith.constant 0 : index
    %9 = vector.load %arg7[%c0_3, %c0_4] : memref<128x128xf32, #tpu.memory_space<vmem>>, vector<128x128xf32>
    %c0_5 = arith.constant 0 : index
    %c0_6 = arith.constant 0 : index
    %10 = vector.load %arg4[%c0_5, %c0_6] : memref<128x128xbf16, #tpu.memory_space<vmem>>, vector<128x128xbf16>
    %cst_7 = arith.constant dense<0.000000e+00> : vector<128x128xf32>
    %11 = tpu.matmul %8, %10, %cst_7 {dimension_numbers = #tpu.dot_dimension_numbers<[1], [0], [0], [1], [0, 0, 1, 1], [], []>} : vector<128x128xbf16>, vector<128x128xbf16>, vector<128x128xf32> -> vector<128x128xf32>
    %12 = arith.addf %9, %11 : vector<128x128xf32>
    %c0_8 = arith.constant 0 : index
    %c0_9 = arith.constant 0 : index
    %13 = vector.load %arg7[%c0_8, %c0_9] : memref<128x128xf32, #tpu.memory_space<vmem>>, vector<128x128xf32>
    tpu.vector_store %arg7[%c0_8, %c0_9], %12 {strides = array<i32>} : memref<128x128xf32, #tpu.memory_space<vmem>>, vector<128x128xf32>,
    %c0_i32_10 = arith.constant 0 : i32
    %14 = arith.cmpi eq, %arg2, %c0_i32_10 : i32
    %15 = arith.extui %14 : i1 to i32
    %c0_i32_11 = arith.constant 0 : i32
    %16 = arith.cmpi ne, %15, %c0_i32_11 : i32
    scf.if %16 {
      %c0_12 = arith.constant 0 : index
      %c0_13 = arith.constant 0 : index
      %17 = vector.load %arg7[%c0_12, %c0_13] : memref<128x128xf32, #tpu.memory_space<vmem>>, vector<128x128xf32>
      %c0_14 = arith.constant 0 : index
      %c0_15 = arith.constant 0 : index
      %18 = vector.load %arg5[%c0_14, %c0_15] : memref<1x128xf32, #tpu.memory_space<vmem>>, vector<1x128xf32>
      %19 = vector.broadcast %18 : vector<1x128xf32> to vector<128x128xf32>
      %20 = arith.addf %17, %19 : vector<128x128xf32>
      %c0_16 = arith.constant 0 : index
      %c0_17 = arith.constant 0 : index
      %21 = vector.load %arg6[%c0_16, %c0_17] : memref<128x128xf32, #tpu.memory_space<vmem>>, vector<128x128xf32>
      tpu.vector_store %arg6[%c0_16, %c0_17], %20 {strides = array<i32>} : memref<128x128xf32, #tpu.memory_space<vmem>>, vector<128x128xf32>,
    } else {
    }
    return
  }
  func.func @transform_0(%arg0: i32, %arg1: i32, %arg2: i32) -> (i32, i32) {
    %c0_i32 = arith.constant 0 : i32
    return %arg0, %arg2 : i32, i32
  }
  func.func @transform_1(%arg0: i32, %arg1: i32, %arg2: i32) -> (i32, i32) {
    %c0_i32 = arith.constant 0 : i32
    return %arg2, %arg1 : i32, i32
  }
  func.func @transform_2(%arg0: i32, %arg1: i32, %arg2: i32) -> (i32, i32) {
    %c0_i32 = arith.constant 0 : i32
    %c0_i32_0 = arith.constant 0 : i32
    return %c0_i32, %arg1 : i32, i32
  }
  func.func @transform_3(%arg0: i32, %arg1: i32, %arg2: i32) -> (i32, i32) {
    %c0_i32 = arith.constant 0 : i32
    return %arg0, %arg1 : i32, i32
  }
}

module attributes {stable_mosaic.version = 11 : i64} {
  func.func @_gemm_kernel(%arg0: i32, %arg1: i32, %arg2: i32, %arg3: memref<32x256xbf16, #tpu.memory_space<vmem>>, %arg4: memref<256x128xbf16, #tpu.memory_space<vmem>>, %arg5: memref<1x128xf32, #tpu.memory_space<vmem>>, %arg6: memref<32x128xf32, #tpu.memory_space<vmem>>, %arg7: memref<32x128xf32, #tpu.memory_space<vmem>>) attributes {dimension_semantics = [#tpu.dimension_semantics<parallel>, #tpu.dimension_semantics<parallel>, #tpu.dimension_semantics<arbitrary>], iteration_bounds = array<i64: 1, 1, 1>, scalar_prefetch = 0 : i64, scratch_operands = 1 : i64, tpu.core_type = #tpu.core_type<tc>, window_params = [{transform_indices = @transform_0, window_bounds = array<i64: 32, 256>}, {transform_indices = @transform_1, window_bounds = array<i64: 256, 128>}, {transform_indices = @transform_2, window_bounds = array<i64: 1, 128>}, {transform_indices = @transform_3, window_bounds = array<i64: 32, 128>}]} {
    %c0_i32 = arith.constant 0 : i32
    %0 = arith.cmpi eq, %arg2, %c0_i32 : i32
    %1 = arith.extui %0 : i1 to i32
    %c0_i32_0 = arith.constant 0 : i32
    %2 = arith.cmpi ne, %1, %c0_i32_0 : i32
    scf.if %2 {
      %cst_12 = arith.constant 0.000000e+00 : f32
      %17 = vector.broadcast %cst_12 : f32 to vector<32x128xf32>
      %c0_13 = arith.constant 0 : index
      %c0_14 = arith.constant 0 : index
      %18 = vector.load %arg7[%c0_13, %c0_14] : memref<32x128xf32, #tpu.memory_space<vmem>>, vector<32x128xf32>
      tpu.vector_store %arg7[%c0_13, %c0_14], %17 {strides = array<i32>} : memref<32x128xf32, #tpu.memory_space<vmem>>, vector<32x128xf32>,
    } else {
    }
    %c0 = arith.constant 0 : index
    %c0_1 = arith.constant 0 : index
    %3 = vector.load %arg3[%c0, %c0_1] : memref<32x256xbf16, #tpu.memory_space<vmem>>, vector<32x256xbf16>
    %cst = arith.constant 0.000000e+00 : bf16
    %4 = vector.broadcast %cst : bf16 to vector<32x256xbf16>
    %5 = arith.cmpf ogt, %3, %4 : vector<32x256xbf16>
    %cst_2 = arith.constant 2.001950e-01 : bf16
    %6 = vector.broadcast %cst_2 : bf16 to vector<32x256xbf16>
    %7 = arith.mulf %3, %6 : vector<32x256xbf16>
    %8 = arith.select %5, %3, %7 : vector<32x256xi1>, vector<32x256xbf16>
    %c0_3 = arith.constant 0 : index
    %c0_4 = arith.constant 0 : index
    %9 = vector.load %arg7[%c0_3, %c0_4] : memref<32x128xf32, #tpu.memory_space<vmem>>, vector<32x128xf32>
    %c0_5 = arith.constant 0 : index
    %c0_6 = arith.constant 0 : index
    %10 = vector.load %arg4[%c0_5, %c0_6] : memref<256x128xbf16, #tpu.memory_space<vmem>>, vector<256x128xbf16>
    %cst_7 = arith.constant dense<0.000000e+00> : vector<32x128xf32>
    %11 = tpu.matmul %8, %10, %cst_7 {dimension_numbers = #tpu.dot_dimension_numbers<[1], [0], [0], [1], [0, 0, 1, 1], [], []>} : vector<32x256xbf16>, vector<256x128xbf16>, vector<32x128xf32> -> vector<32x128xf32>
    %12 = arith.addf %9, %11 : vector<32x128xf32>
    %c0_8 = arith.constant 0 : index
    %c0_9 = arith.constant 0 : index
    %13 = vector.load %arg7[%c0_8, %c0_9] : memref<32x128xf32, #tpu.memory_space<vmem>>, vector<32x128xf32>
    tpu.vector_store %arg7[%c0_8, %c0_9], %12 {strides = array<i32>} : memref<32x128xf32, #tpu.memory_space<vmem>>, vector<32x128xf32>,
    %c0_i32_10 = arith.constant 0 : i32
    %14 = arith.cmpi eq, %arg2, %c0_i32_10 : i32
    %15 = arith.extui %14 : i1 to i32
    %c0_i32_11 = arith.constant 0 : i32
    %16 = arith.cmpi ne, %15, %c0_i32_11 : i32
    scf.if %16 {
      %c0_12 = arith.constant 0 : index
      %c0_13 = arith.constant 0 : index
      %17 = vector.load %arg7[%c0_12, %c0_13] : memref<32x128xf32, #tpu.memory_space<vmem>>, vector<32x128xf32>
      %c0_14 = arith.constant 0 : index
      %c0_15 = arith.constant 0 : index
      %18 = vector.load %arg5[%c0_14, %c0_15] : memref<1x128xf32, #tpu.memory_space<vmem>>, vector<1x128xf32>
      %19 = vector.broadcast %18 : vector<1x128xf32> to vector<32x128xf32>
      %20 = arith.addf %17, %19 : vector<32x128xf32>
      %c0_16 = arith.constant 0 : index
      %c0_17 = arith.constant 0 : index
      %21 = vector.load %arg6[%c0_16, %c0_17] : memref<32x128xf32, #tpu.memory_space<vmem>>, vector<32x128xf32>
      tpu.vector_store %arg6[%c0_16, %c0_17], %20 {strides = array<i32>} : memref<32x128xf32, #tpu.memory_space<vmem>>, vector<32x128xf32>,
    } else {
    }
    return
  }
  func.func @transform_0(%arg0: i32, %arg1: i32, %arg2: i32) -> (i32, i32) {
    %c0_i32 = arith.constant 0 : i32
    return %arg0, %arg2 : i32, i32
  }
  func.func @transform_1(%arg0: i32, %arg1: i32, %arg2: i32) -> (i32, i32) {
    %c0_i32 = arith.constant 0 : i32
    return %arg2, %arg1 : i32, i32
  }
  func.func @transform_2(%arg0: i32, %arg1: i32, %arg2: i32) -> (i32, i32) {
    %c0_i32 = arith.constant 0 : i32
    %c0_i32_0 = arith.constant 0 : i32
    return %c0_i32, %arg1 : i32, i32
  }
  func.func @transform_3(%arg0: i32, %arg1: i32, %arg2: i32) -> (i32, i32) {
    %c0_i32 = arith.constant 0 : i32
    return %arg0, %arg1 : i32, i32
  }
}

module attributes {stable_mosaic.version = 11 : i64} {
  func.func @_gemm_kernel(%arg0: i32, %arg1: i32, %arg2: i32, %arg3: memref<16x512xbf16, #tpu.memory_space<vmem>>, %arg4: memref<512x128xbf16, #tpu.memory_space<vmem>>, %arg5: memref<1x128xf32, #tpu.memory_space<vmem>>, %arg6: memref<16x128xf32, #tpu.memory_space<vmem>>, %arg7: memref<16x128xf32, #tpu.memory_space<vmem>>) attributes {dimension_semantics = [#tpu.dimension_semantics<parallel>, #tpu.dimension_semantics<parallel>, #tpu.dimension_semantics<arbitrary>], iteration_bounds = array<i64: 1, 1, 1>, scalar_prefetch = 0 : i64, scratch_operands = 1 : i64, tpu.core_type = #tpu.core_type<tc>, window_params = [{transform_indices = @transform_0, window_bounds = array<i64: 16, 512>}, {transform_indices = @transform_1, window_bounds = array<i64: 512, 128>}, {transform_indices = @transform_2, window_bounds = array<i64: 1, 128>}, {transform_indices = @transform_3, window_bounds = array<i64: 16, 128>}]} {
    %c0_i32 = arith.constant 0 : i32
    %0 = arith.cmpi eq, %arg2, %c0_i32 : i32
    %1 = arith.extui %0 : i1 to i32
    %c0_i32_0 = arith.constant 0 : i32
    %2 = arith.cmpi ne, %1, %c0_i32_0 : i32
    scf.if %2 {
      %cst_12 = arith.constant 0.000000e+00 : f32
      %17 = vector.broadcast %cst_12 : f32 to vector<16x128xf32>
      %c0_13 = arith.constant 0 : index
      %c0_14 = arith.constant 0 : index
      %18 = vector.load %arg7[%c0_13, %c0_14] : memref<16x128xf32, #tpu.memory_space<vmem>>, vector<16x128xf32>
      tpu.vector_store %arg7[%c0_13, %c0_14], %17 {strides = array<i32>} : memref<16x128xf32, #tpu.memory_space<vmem>>, vector<16x128xf32>,
    } else {
    }
    %c0 = arith.constant 0 : index
    %c0_1 = arith.constant 0 : index
    %3 = vector.load %arg3[%c0, %c0_1] : memref<16x512xbf16, #tpu.memory_space<vmem>>, vector<16x512xbf16>
    %cst = arith.constant 0.000000e+00 : bf16
    %4 = vector.broadcast %cst : bf16 to vector<16x512xbf16>
    %5 = arith.cmpf ogt, %3, %4 : vector<16x512xbf16>
    %cst_2 = arith.constant 2.001950e-01 : bf16
    %6 = vector.broadcast %cst_2 : bf16 to vector<16x512xbf16>
    %7 = arith.mulf %3, %6 : vector<16x512xbf16>
    %8 = arith.select %5, %3, %7 : vector<16x512xi1>, vector<16x512xbf16>
    %c0_3 = arith.constant 0 : index
    %c0_4 = arith.constant 0 : index
    %9 = vector.load %arg7[%c0_3, %c0_4] : memref<16x128xf32, #tpu.memory_space<vmem>>, vector<16x128xf32>
    %c0_5 = arith.constant 0 : index
    %c0_6 = arith.constant 0 : index
    %10 = vector.load %arg4[%c0_5, %c0_6] : memref<512x128xbf16, #tpu.memory_space<vmem>>, vector<512x128xbf16>
    %cst_7 = arith.constant dense<0.000000e+00> : vector<16x128xf32>
    %11 = tpu.matmul %8, %10, %cst_7 {dimension_numbers = #tpu.dot_dimension_numbers<[1], [0], [0], [1], [0, 0, 1, 1], [], []>} : vector<16x512xbf16>, vector<512x128xbf16>, vector<16x128xf32> -> vector<16x128xf32>
    %12 = arith.addf %9, %11 : vector<16x128xf32>
    %c0_8 = arith.constant 0 : index
    %c0_9 = arith.constant 0 : index
    %13 = vector.load %arg7[%c0_8, %c0_9] : memref<16x128xf32, #tpu.memory_space<vmem>>, vector<16x128xf32>
    tpu.vector_store %arg7[%c0_8, %c0_9], %12 {strides = array<i32>} : memref<16x128xf32, #tpu.memory_space<vmem>>, vector<16x128xf32>,
    %c0_i32_10 = arith.constant 0 : i32
    %14 = arith.cmpi eq, %arg2, %c0_i32_10 : i32
    %15 = arith.extui %14 : i1 to i32
    %c0_i32_11 = arith.constant 0 : i32
    %16 = arith.cmpi ne, %15, %c0_i32_11 : i32
    scf.if %16 {
      %c0_12 = arith.constant 0 : index
      %c0_13 = arith.constant 0 : index
      %17 = vector.load %arg7[%c0_12, %c0_13] : memref<16x128xf32, #tpu.memory_space<vmem>>, vector<16x128xf32>
      %c0_14 = arith.constant 0 : index
      %c0_15 = arith.constant 0 : index
      %18 = vector.load %arg5[%c0_14, %c0_15] : memref<1x128xf32, #tpu.memory_space<vmem>>, vector<1x128xf32>
      %19 = vector.broadcast %18 : vector<1x128xf32> to vector<16x128xf32>
      %20 = arith.addf %17, %19 : vector<16x128xf32>
      %c0_16 = arith.constant 0 : index
      %c0_17 = arith.constant 0 : index
      %21 = vector.load %arg6[%c0_16, %c0_17] : memref<16x128xf32, #tpu.memory_space<vmem>>, vector<16x128xf32>
      tpu.vector_store %arg6[%c0_16, %c0_17], %20 {strides = array<i32>} : memref<16x128xf32, #tpu.memory_space<vmem>>, vector<16x128xf32>,
    } else {
    }
    return
  }
  func.func @transform_0(%arg0: i32, %arg1: i32, %arg2: i32) -> (i32, i32) {
    %c0_i32 = arith.constant 0 : i32
    return %arg0, %arg2 : i32, i32
  }
  func.func @transform_1(%arg0: i32, %arg1: i32, %arg2: i32) -> (i32, i32) {
    %c0_i32 = arith.constant 0 : i32
    return %arg2, %arg1 : i32, i32
  }
  func.func @transform_2(%arg0: i32, %arg1: i32, %arg2: i32) -> (i32, i32) {
    %c0_i32 = arith.constant 0 : i32
    %c0_i32_0 = arith.constant 0 : i32
    return %c0_i32, %arg1 : i32, i32
  }
  func.func @transform_3(%arg0: i32, %arg1: i32, %arg2: i32) -> (i32, i32) {
    %c0_i32 = arith.constant 0 : i32
    return %arg0, %arg1 : i32, i32
  }
}

module attributes {stable_mosaic.version = 11 : i64} {
  func.func @_gemm_kernel(%arg0: i32, %arg1: i32, %arg2: i32, %arg3: memref<16x512xbf16, #tpu.memory_space<vmem>>, %arg4: memref<512x128xbf16, #tpu.memory_space<vmem>>, %arg5: memref<1x128xf32, #tpu.memory_space<vmem>>, %arg6: memref<16x128xf32, #tpu.memory_space<vmem>>, %arg7: memref<16x128xf32, #tpu.memory_space<vmem>>) attributes {dimension_semantics = [#tpu.dimension_semantics<parallel>, #tpu.dimension_semantics<parallel>, #tpu.dimension_semantics<arbitrary>], iteration_bounds = array<i64: 1, 1, 2>, scalar_prefetch = 0 : i64, scratch_operands = 1 : i64, tpu.core_type = #tpu.core_type<tc>, window_params = [{transform_indices = @transform_0, window_bounds = array<i64: 16, 512>}, {transform_indices = @transform_1, window_bounds = array<i64: 512, 128>}, {transform_indices = @transform_2, window_bounds = array<i64: 1, 128>}, {transform_indices = @transform_3, window_bounds = array<i64: 16, 128>}]} {
    %c0_i32 = arith.constant 0 : i32
    %0 = arith.cmpi eq, %arg2, %c0_i32 : i32
    %1 = arith.extui %0 : i1 to i32
    %c0_i32_0 = arith.constant 0 : i32
    %2 = arith.cmpi ne, %1, %c0_i32_0 : i32
    scf.if %2 {
      %cst_11 = arith.constant 0.000000e+00 : f32
      %17 = vector.broadcast %cst_11 : f32 to vector<16x128xf32>
      %c0_12 = arith.constant 0 : index
      %c0_13 = arith.constant 0 : index
      %18 = vector.load %arg7[%c0_12, %c0_13] : memref<16x128xf32, #tpu.memory_space<vmem>>, vector<16x128xf32>
      tpu.vector_store %arg7[%c0_12, %c0_13], %17 {strides = array<i32>} : memref<16x128xf32, #tpu.memory_space<vmem>>, vector<16x128xf32>,
    } else {
    }
    %c0 = arith.constant 0 : index
    %c0_1 = arith.constant 0 : index
    %3 = vector.load %arg3[%c0, %c0_1] : memref<16x512xbf16, #tpu.memory_space<vmem>>, vector<16x512xbf16>
    %cst = arith.constant 0.000000e+00 : bf16
    %4 = vector.broadcast %cst : bf16 to vector<16x512xbf16>
    %5 = arith.cmpf ogt, %3, %4 : vector<16x512xbf16>
    %cst_2 = arith.constant 2.001950e-01 : bf16
    %6 = vector.broadcast %cst_2 : bf16 to vector<16x512xbf16>
    %7 = arith.mulf %3, %6 : vector<16x512xbf16>
    %8 = arith.select %5, %3, %7 : vector<16x512xi1>, vector<16x512xbf16>
    %c0_3 = arith.constant 0 : index
    %c0_4 = arith.constant 0 : index
    %9 = vector.load %arg7[%c0_3, %c0_4] : memref<16x128xf32, #tpu.memory_space<vmem>>, vector<16x128xf32>
    %c0_5 = arith.constant 0 : index
    %c0_6 = arith.constant 0 : index
    %10 = vector.load %arg4[%c0_5, %c0_6] : memref<512x128xbf16, #tpu.memory_space<vmem>>, vector<512x128xbf16>
    %cst_7 = arith.constant dense<0.000000e+00> : vector<16x128xf32>
    %11 = tpu.matmul %8, %10, %cst_7 {dimension_numbers = #tpu.dot_dimension_numbers<[1], [0], [0], [1], [0, 0, 1, 1], [], []>} : vector<16x512xbf16>, vector<512x128xbf16>, vector<16x128xf32> -> vector<16x128xf32>
    %12 = arith.addf %9, %11 : vector<16x128xf32>
    %c0_8 = arith.constant 0 : index
    %c0_9 = arith.constant 0 : index
    %13 = vector.load %arg7[%c0_8, %c0_9] : memref<16x128xf32, #tpu.memory_space<vmem>>, vector<16x128xf32>
    tpu.vector_store %arg7[%c0_8, %c0_9], %12 {strides = array<i32>} : memref<16x128xf32, #tpu.memory_space<vmem>>, vector<16x128xf32>,
    %c1_i32 = arith.constant 1 : i32
    %14 = arith.cmpi eq, %arg2, %c1_i32 : i32
    %15 = arith.extui %14 : i1 to i32
    %c0_i32_10 = arith.constant 0 : i32
    %16 = arith.cmpi ne, %15, %c0_i32_10 : i32
    scf.if %16 {
      %c0_11 = arith.constant 0 : index
      %c0_12 = arith.constant 0 : index
      %17 = vector.load %arg7[%c0_11, %c0_12] : memref<16x128xf32, #tpu.memory_space<vmem>>, vector<16x128xf32>
      %c0_13 = arith.constant 0 : index
      %c0_14 = arith.constant 0 : index
      %18 = vector.load %arg5[%c0_13, %c0_14] : memref<1x128xf32, #tpu.memory_space<vmem>>, vector<1x128xf32>
      %19 = vector.broadcast %18 : vector<1x128xf32> to vector<16x128xf32>
      %20 = arith.addf %17, %19 : vector<16x128xf32>
      %c0_15 = arith.constant 0 : index
      %c0_16 = arith.constant 0 : index
      %21 = vector.load %arg6[%c0_15, %c0_16] : memref<16x128xf32, #tpu.memory_space<vmem>>, vector<16x128xf32>
      tpu.vector_store %arg6[%c0_15, %c0_16], %20 {strides = array<i32>} : memref<16x128xf32, #tpu.memory_space<vmem>>, vector<16x128xf32>,
    } else {
    }
    return
  }
  func.func @transform_0(%arg0: i32, %arg1: i32, %arg2: i32) -> (i32, i32) {
    %c0_i32 = arith.constant 0 : i32
    return %arg0, %arg2 : i32, i32
  }
  func.func @transform_1(%arg0: i32, %arg1: i32, %arg2: i32) -> (i32, i32) {
    %c0_i32 = arith.constant 0 : i32
    return %arg2, %arg1 : i32, i32
  }
  func.func @transform_2(%arg0: i32, %arg1: i32, %arg2: i32) -> (i32, i32) {
    %c0_i32 = arith.constant 0 : i32
    %c0_i32_0 = arith.constant 0 : i32
    return %c0_i32, %arg1 : i32, i32
  }
  func.func @transform_3(%arg0: i32, %arg1: i32, %arg2: i32) -> (i32, i32) {
    %c0_i32 = arith.constant 0 : i32
    return %arg0, %arg1 : i32, i32
  }
}

module attributes {stable_mosaic.version = 11 : i64} {
  func.func @_gemm_kernel(%arg0: i32, %arg1: i32, %arg2: i32, %arg3: memref<16x256xbf16, #tpu.memory_space<vmem>>, %arg4: memref<256x128xbf16, #tpu.memory_space<vmem>>, %arg5: memref<1x128xf32, #tpu.memory_space<vmem>>, %arg6: memref<16x128xf32, #tpu.memory_space<vmem>>, %arg7: memref<16x128xf32, #tpu.memory_space<vmem>>) attributes {dimension_semantics = [#tpu.dimension_semantics<parallel>, #tpu.dimension_semantics<parallel>, #tpu.dimension_semantics<arbitrary>], iteration_bounds = array<i64: 1, 1, 1>, scalar_prefetch = 0 : i64, scratch_operands = 1 : i64, tpu.core_type = #tpu.core_type<tc>, window_params = [{transform_indices = @transform_0, window_bounds = array<i64: 16, 256>}, {transform_indices = @transform_1, window_bounds = array<i64: 256, 128>}, {transform_indices = @transform_2, window_bounds = array<i64: 1, 128>}, {transform_indices = @transform_3, window_bounds = array<i64: 16, 128>}]} {
    %c0_i32 = arith.constant 0 : i32
    %0 = arith.cmpi eq, %arg2, %c0_i32 : i32
    %1 = arith.extui %0 : i1 to i32
    %c0_i32_0 = arith.constant 0 : i32
    %2 = arith.cmpi ne, %1, %c0_i32_0 : i32
    scf.if %2 {
      %cst_11 = arith.constant 0.000000e+00 : f32
      %14 = vector.broadcast %cst_11 : f32 to vector<16x128xf32>
      %c0_12 = arith.constant 0 : index
      %c0_13 = arith.constant 0 : index
      %15 = vector.load %arg7[%c0_12, %c0_13] : memref<16x128xf32, #tpu.memory_space<vmem>>, vector<16x128xf32>
      tpu.vector_store %arg7[%c0_12, %c0_13], %14 {strides = array<i32>} : memref<16x128xf32, #tpu.memory_space<vmem>>, vector<16x128xf32>,
    } else {
    }
    %c0 = arith.constant 0 : index
    %c0_1 = arith.constant 0 : index
    %3 = vector.load %arg3[%c0, %c0_1] : memref<16x256xbf16, #tpu.memory_space<vmem>>, vector<16x256xbf16>
    %cst = arith.constant 0.000000e+00 : bf16
    %4 = vector.broadcast %cst : bf16 to vector<16x256xbf16>
    %5 = arith.maximumf %3, %4 : vector<16x256xbf16>
    %c0_2 = arith.constant 0 : index
    %c0_3 = arith.constant 0 : index
    %6 = vector.load %arg7[%c0_2, %c0_3] : memref<16x128xf32, #tpu.memory_space<vmem>>, vector<16x128xf32>
    %c0_4 = arith.constant 0 : index
    %c0_5 = arith.constant 0 : index
    %7 = vector.load %arg4[%c0_4, %c0_5] : memref<256x128xbf16, #tpu.memory_space<vmem>>, vector<256x128xbf16>
    %cst_6 = arith.constant dense<0.000000e+00> : vector<16x128xf32>
    %8 = tpu.matmul %5, %7, %cst_6 {dimension_numbers = #tpu.dot_dimension_numbers<[1], [0], [0], [1], [0, 0, 1, 1], [], []>} : vector<16x256xbf16>, vector<256x128xbf16>, vector<16x128xf32> -> vector<16x128xf32>
    %9 = arith.addf %6, %8 : vector<16x128xf32>
    %c0_7 = arith.constant 0 : index
    %c0_8 = arith.constant 0 : index
    %10 = vector.load %arg7[%c0_7, %c0_8] : memref<16x128xf32, #tpu.memory_space<vmem>>, vector<16x128xf32>
    tpu.vector_store %arg7[%c0_7, %c0_8], %9 {strides = array<i32>} : memref<16x128xf32, #tpu.memory_space<vmem>>, vector<16x128xf32>,
    %c0_i32_9 = arith.constant 0 : i32
    %11 = arith.cmpi eq, %arg2, %c0_i32_9 : i32
    %12 = arith.extui %11 : i1 to i32
    %c0_i32_10 = arith.constant 0 : i32
    %13 = arith.cmpi ne, %12, %c0_i32_10 : i32
    scf.if %13 {
      %c0_11 = arith.constant 0 : index
      %c0_12 = arith.constant 0 : index
      %14 = vector.load %arg7[%c0_11, %c0_12] : memref<16x128xf32, #tpu.memory_space<vmem>>, vector<16x128xf32>
      %c0_13 = arith.constant 0 : index
      %c0_14 = arith.constant 0 : index
      %15 = vector.load %arg5[%c0_13, %c0_14] : memref<1x128xf32, #tpu.memory_space<vmem>>, vector<1x128xf32>
      %16 = vector.broadcast %15 : vector<1x128xf32> to vector<16x128xf32>
      %17 = arith.addf %14, %16 : vector<16x128xf32>
      %c0_15 = arith.constant 0 : index
      %c0_16 = arith.constant 0 : index
      %18 = vector.load %arg6[%c0_15, %c0_16] : memref<16x128xf32, #tpu.memory_space<vmem>>, vector<16x128xf32>
      tpu.vector_store %arg6[%c0_15, %c0_16], %17 {strides = array<i32>} : memref<16x128xf32, #tpu.memory_space<vmem>>, vector<16x128xf32>,
    } else {
    }
    return
  }
  func.func @transform_0(%arg0: i32, %arg1: i32, %arg2: i32) -> (i32, i32) {
    %c0_i32 = arith.constant 0 : i32
    return %arg0, %arg2 : i32, i32
  }
  func.func @transform_1(%arg0: i32, %arg1: i32, %arg2: i32) -> (i32, i32) {
    %c0_i32 = arith.constant 0 : i32
    return %arg2, %arg1 : i32, i32
  }
  func.func @transform_2(%arg0: i32, %arg1: i32, %arg2: i32) -> (i32, i32) {
    %c0_i32 = arith.constant 0 : i32
    %c0_i32_0 = arith.constant 0 : i32
    return %c0_i32, %arg1 : i32, i32
  }
  func.func @transform_3(%arg0: i32, %arg1: i32, %arg2: i32) -> (i32, i32) {
    %c0_i32 = arith.constant 0 : i32
    return %arg0, %arg1 : i32, i32
  }
}

module attributes {stable_mosaic.version = 11 : i64} {
  func.func @_gemm_kernel(%arg0: i32, %arg1: i32, %arg2: i32, %arg3: memref<16x512xbf16, #tpu.memory_space<vmem>>, %arg4: memref<512x128xbf16, #tpu.memory_space<vmem>>, %arg5: memref<1x128xf32, #tpu.memory_space<vmem>>, %arg6: memref<16x128xf32, #tpu.memory_space<vmem>>, %arg7: memref<16x128xf32, #tpu.memory_space<vmem>>) attributes {dimension_semantics = [#tpu.dimension_semantics<parallel>, #tpu.dimension_semantics<parallel>, #tpu.dimension_semantics<arbitrary>], iteration_bounds = array<i64: 1, 1, 1>, scalar_prefetch = 0 : i64, scratch_operands = 1 : i64, tpu.core_type = #tpu.core_type<tc>, window_params = [{transform_indices = @transform_0, window_bounds = array<i64: 16, 512>}, {transform_indices = @transform_1, window_bounds = array<i64: 512, 128>}, {transform_indices = @transform_2, window_bounds = array<i64: 1, 128>}, {transform_indices = @transform_3, window_bounds = array<i64: 16, 128>}]} {
    %c0_i32 = arith.constant 0 : i32
    %0 = arith.cmpi eq, %arg2, %c0_i32 : i32
    %1 = arith.extui %0 : i1 to i32
    %c0_i32_0 = arith.constant 0 : i32
    %2 = arith.cmpi ne, %1, %c0_i32_0 : i32
    scf.if %2 {
      %cst_11 = arith.constant 0.000000e+00 : f32
      %14 = vector.broadcast %cst_11 : f32 to vector<16x128xf32>
      %c0_12 = arith.constant 0 : index
      %c0_13 = arith.constant 0 : index
      %15 = vector.load %arg7[%c0_12, %c0_13] : memref<16x128xf32, #tpu.memory_space<vmem>>, vector<16x128xf32>
      tpu.vector_store %arg7[%c0_12, %c0_13], %14 {strides = array<i32>} : memref<16x128xf32, #tpu.memory_space<vmem>>, vector<16x128xf32>,
    } else {
    }
    %c0 = arith.constant 0 : index
    %c0_1 = arith.constant 0 : index
    %3 = vector.load %arg3[%c0, %c0_1] : memref<16x512xbf16, #tpu.memory_space<vmem>>, vector<16x512xbf16>
    %cst = arith.constant 0.000000e+00 : bf16
    %4 = vector.broadcast %cst : bf16 to vector<16x512xbf16>
    %5 = arith.maximumf %3, %4 : vector<16x512xbf16>
    %c0_2 = arith.constant 0 : index
    %c0_3 = arith.constant 0 : index
    %6 = vector.load %arg7[%c0_2, %c0_3] : memref<16x128xf32, #tpu.memory_space<vmem>>, vector<16x128xf32>
    %c0_4 = arith.constant 0 : index
    %c0_5 = arith.constant 0 : index
    %7 = vector.load %arg4[%c0_4, %c0_5] : memref<512x128xbf16, #tpu.memory_space<vmem>>, vector<512x128xbf16>
    %cst_6 = arith.constant dense<0.000000e+00> : vector<16x128xf32>
    %8 = tpu.matmul %5, %7, %cst_6 {dimension_numbers = #tpu.dot_dimension_numbers<[1], [0], [0], [1], [0, 0, 1, 1], [], []>} : vector<16x512xbf16>, vector<512x128xbf16>, vector<16x128xf32> -> vector<16x128xf32>
    %9 = arith.addf %6, %8 : vector<16x128xf32>
    %c0_7 = arith.constant 0 : index
    %c0_8 = arith.constant 0 : index
    %10 = vector.load %arg7[%c0_7, %c0_8] : memref<16x128xf32, #tpu.memory_space<vmem>>, vector<16x128xf32>
    tpu.vector_store %arg7[%c0_7, %c0_8], %9 {strides = array<i32>} : memref<16x128xf32, #tpu.memory_space<vmem>>, vector<16x128xf32>,
    %c0_i32_9 = arith.constant 0 : i32
    %11 = arith.cmpi eq, %arg2, %c0_i32_9 : i32
    %12 = arith.extui %11 : i1 to i32
    %c0_i32_10 = arith.constant 0 : i32
    %13 = arith.cmpi ne, %12, %c0_i32_10 : i32
    scf.if %13 {
      %c0_11 = arith.constant 0 : index
      %c0_12 = arith.constant 0 : index
      %14 = vector.load %arg7[%c0_11, %c0_12] : memref<16x128xf32, #tpu.memory_space<vmem>>, vector<16x128xf32>
      %c0_13 = arith.constant 0 : index
      %c0_14 = arith.constant 0 : index
      %15 = vector.load %arg5[%c0_13, %c0_14] : memref<1x128xf32, #tpu.memory_space<vmem>>, vector<1x128xf32>
      %16 = vector.broadcast %15 : vector<1x128xf32> to vector<16x128xf32>
      %17 = arith.addf %14, %16 : vector<16x128xf32>
      %c0_15 = arith.constant 0 : index
      %c0_16 = arith.constant 0 : index
      %18 = vector.load %arg6[%c0_15, %c0_16] : memref<16x128xf32, #tpu.memory_space<vmem>>, vector<16x128xf32>
      tpu.vector_store %arg6[%c0_15, %c0_16], %17 {strides = array<i32>} : memref<16x128xf32, #tpu.memory_space<vmem>>, vector<16x128xf32>,
    } else {
    }
    return
  }
  func.func @transform_0(%arg0: i32, %arg1: i32, %arg2: i32) -> (i32, i32) {
    %c0_i32 = arith.constant 0 : i32
    return %arg0, %arg2 : i32, i32
  }
  func.func @transform_1(%arg0: i32, %arg1: i32, %arg2: i32) -> (i32, i32) {
    %c0_i32 = arith.constant 0 : i32
    return %arg2, %arg1 : i32, i32
  }
  func.func @transform_2(%arg0: i32, %arg1: i32, %arg2: i32) -> (i32, i32) {
    %c0_i32 = arith.constant 0 : i32
    %c0_i32_0 = arith.constant 0 : i32
    return %c0_i32, %arg1 : i32, i32
  }
  func.func @transform_3(%arg0: i32, %arg1: i32, %arg2: i32) -> (i32, i32) {
    %c0_i32 = arith.constant 0 : i32
    return %arg0, %arg1 : i32, i32
  }
}

module attributes {stable_mosaic.version = 11 : i64} {
  func.func @_gemm_kernel(%arg0: i32, %arg1: i32, %arg2: i32, %arg3: memref<32x256xbf16, #tpu.memory_space<vmem>>, %arg4: memref<256x128xbf16, #tpu.memory_space<vmem>>, %arg5: memref<1x128xf32, #tpu.memory_space<vmem>>, %arg6: memref<32x128xf32, #tpu.memory_space<vmem>>, %arg7: memref<32x128xf32, #tpu.memory_space<vmem>>) attributes {dimension_semantics = [#tpu.dimension_semantics<parallel>, #tpu.dimension_semantics<parallel>, #tpu.dimension_semantics<arbitrary>], iteration_bounds = array<i64: 1, 1, 1>, scalar_prefetch = 0 : i64, scratch_operands = 1 : i64, tpu.core_type = #tpu.core_type<tc>, window_params = [{transform_indices = @transform_0, window_bounds = array<i64: 32, 256>}, {transform_indices = @transform_1, window_bounds = array<i64: 256, 128>}, {transform_indices = @transform_2, window_bounds = array<i64: 1, 128>}, {transform_indices = @transform_3, window_bounds = array<i64: 32, 128>}]} {
    %c0_i32 = arith.constant 0 : i32
    %0 = arith.cmpi eq, %arg2, %c0_i32 : i32
    %1 = arith.extui %0 : i1 to i32
    %c0_i32_0 = arith.constant 0 : i32
    %2 = arith.cmpi ne, %1, %c0_i32_0 : i32
    scf.if %2 {
      %cst_11 = arith.constant 0.000000e+00 : f32
      %14 = vector.broadcast %cst_11 : f32 to vector<32x128xf32>
      %c0_12 = arith.constant 0 : index
      %c0_13 = arith.constant 0 : index
      %15 = vector.load %arg7[%c0_12, %c0_13] : memref<32x128xf32, #tpu.memory_space<vmem>>, vector<32x128xf32>
      tpu.vector_store %arg7[%c0_12, %c0_13], %14 {strides = array<i32>} : memref<32x128xf32, #tpu.memory_space<vmem>>, vector<32x128xf32>,
    } else {
    }
    %c0 = arith.constant 0 : index
    %c0_1 = arith.constant 0 : index
    %3 = vector.load %arg3[%c0, %c0_1] : memref<32x256xbf16, #tpu.memory_space<vmem>>, vector<32x256xbf16>
    %cst = arith.constant 0.000000e+00 : bf16
    %4 = vector.broadcast %cst : bf16 to vector<32x256xbf16>
    %5 = arith.maximumf %3, %4 : vector<32x256xbf16>
    %c0_2 = arith.constant 0 : index
    %c0_3 = arith.constant 0 : index
    %6 = vector.load %arg7[%c0_2, %c0_3] : memref<32x128xf32, #tpu.memory_space<vmem>>, vector<32x128xf32>
    %c0_4 = arith.constant 0 : index
    %c0_5 = arith.constant 0 : index
    %7 = vector.load %arg4[%c0_4, %c0_5] : memref<256x128xbf16, #tpu.memory_space<vmem>>, vector<256x128xbf16>
    %cst_6 = arith.constant dense<0.000000e+00> : vector<32x128xf32>
    %8 = tpu.matmul %5, %7, %cst_6 {dimension_numbers = #tpu.dot_dimension_numbers<[1], [0], [0], [1], [0, 0, 1, 1], [], []>} : vector<32x256xbf16>, vector<256x128xbf16>, vector<32x128xf32> -> vector<32x128xf32>
    %9 = arith.addf %6, %8 : vector<32x128xf32>
    %c0_7 = arith.constant 0 : index
    %c0_8 = arith.constant 0 : index
    %10 = vector.load %arg7[%c0_7, %c0_8] : memref<32x128xf32, #tpu.memory_space<vmem>>, vector<32x128xf32>
    tpu.vector_store %arg7[%c0_7, %c0_8], %9 {strides = array<i32>} : memref<32x128xf32, #tpu.memory_space<vmem>>, vector<32x128xf32>,
    %c0_i32_9 = arith.constant 0 : i32
    %11 = arith.cmpi eq, %arg2, %c0_i32_9 : i32
    %12 = arith.extui %11 : i1 to i32
    %c0_i32_10 = arith.constant 0 : i32
    %13 = arith.cmpi ne, %12, %c0_i32_10 : i32
    scf.if %13 {
      %c0_11 = arith.constant 0 : index
      %c0_12 = arith.constant 0 : index
      %14 = vector.load %arg7[%c0_11, %c0_12] : memref<32x128xf32, #tpu.memory_space<vmem>>, vector<32x128xf32>
      %c0_13 = arith.constant 0 : index
      %c0_14 = arith.constant 0 : index
      %15 = vector.load %arg5[%c0_13, %c0_14] : memref<1x128xf32, #tpu.memory_space<vmem>>, vector<1x128xf32>
      %16 = vector.broadcast %15 : vector<1x128xf32> to vector<32x128xf32>
      %17 = arith.addf %14, %16 : vector<32x128xf32>
      %c0_15 = arith.constant 0 : index
      %c0_16 = arith.constant 0 : index
      %18 = vector.load %arg6[%c0_15, %c0_16] : memref<32x128xf32, #tpu.memory_space<vmem>>, vector<32x128xf32>
      tpu.vector_store %arg6[%c0_15, %c0_16], %17 {strides = array<i32>} : memref<32x128xf32, #tpu.memory_space<vmem>>, vector<32x128xf32>,
    } else {
    }
    return
  }
  func.func @transform_0(%arg0: i32, %arg1: i32, %arg2: i32) -> (i32, i32) {
    %c0_i32 = arith.constant 0 : i32
    return %arg0, %arg2 : i32, i32
  }
  func.func @transform_1(%arg0: i32, %arg1: i32, %arg2: i32) -> (i32, i32) {
    %c0_i32 = arith.constant 0 : i32
    return %arg2, %arg1 : i32, i32
  }
  func.func @transform_2(%arg0: i32, %arg1: i32, %arg2: i32) -> (i32, i32) {
    %c0_i32 = arith.constant 0 : i32
    %c0_i32_0 = arith.constant 0 : i32
    return %c0_i32, %arg1 : i32, i32
  }
  func.func @transform_3(%arg0: i32, %arg1: i32, %arg2: i32) -> (i32, i32) {
    %c0_i32 = arith.constant 0 : i32
    return %arg0, %arg1 : i32, i32
  }
}

module attributes {stable_mosaic.version = 11 : i64} {
  func.func @_gemm_kernel(%arg0: i32, %arg1: i32, %arg2: i32, %arg3: memref<128x128xbf16, #tpu.memory_space<vmem>>, %arg4: memref<128x128xbf16, #tpu.memory_space<vmem>>, %arg5: memref<1x128xf32, #tpu.memory_space<vmem>>, %arg6: memref<128x128xf32, #tpu.memory_space<vmem>>, %arg7: memref<128x128xf32, #tpu.memory_space<vmem>>) attributes {dimension_semantics = [#tpu.dimension_semantics<parallel>, #tpu.dimension_semantics<parallel>, #tpu.dimension_semantics<arbitrary>], iteration_bounds = array<i64: 1, 1, 1>, scalar_prefetch = 0 : i64, scratch_operands = 1 : i64, tpu.core_type = #tpu.core_type<tc>, window_params = [{transform_indices = @transform_0, window_bounds = array<i64: 128, 128>}, {transform_indices = @transform_1, window_bounds = array<i64: 128, 128>}, {transform_indices = @transform_2, window_bounds = array<i64: 1, 128>}, {transform_indices = @transform_3, window_bounds = array<i64: 128, 128>}]} {
    %c0_i32 = arith.constant 0 : i32
    %0 = arith.cmpi eq, %arg2, %c0_i32 : i32
    %1 = arith.extui %0 : i1 to i32
    %c0_i32_0 = arith.constant 0 : i32
    %2 = arith.cmpi ne, %1, %c0_i32_0 : i32
    scf.if %2 {
      %cst_11 = arith.constant 0.000000e+00 : f32
      %14 = vector.broadcast %cst_11 : f32 to vector<128x128xf32>
      %c0_12 = arith.constant 0 : index
      %c0_13 = arith.constant 0 : index
      %15 = vector.load %arg7[%c0_12, %c0_13] : memref<128x128xf32, #tpu.memory_space<vmem>>, vector<128x128xf32>
      tpu.vector_store %arg7[%c0_12, %c0_13], %14 {strides = array<i32>} : memref<128x128xf32, #tpu.memory_space<vmem>>, vector<128x128xf32>,
    } else {
    }
    %c0 = arith.constant 0 : index
    %c0_1 = arith.constant 0 : index
    %3 = vector.load %arg3[%c0, %c0_1] : memref<128x128xbf16, #tpu.memory_space<vmem>>, vector<128x128xbf16>
    %cst = arith.constant 0.000000e+00 : bf16
    %4 = vector.broadcast %cst : bf16 to vector<128x128xbf16>
    %5 = arith.maximumf %3, %4 : vector<128x128xbf16>
    %c0_2 = arith.constant 0 : index
    %c0_3 = arith.constant 0 : index
    %6 = vector.load %arg7[%c0_2, %c0_3] : memref<128x128xf32, #tpu.memory_space<vmem>>, vector<128x128xf32>
    %c0_4 = arith.constant 0 : index
    %c0_5 = arith.constant 0 : index
    %7 = vector.load %arg4[%c0_4, %c0_5] : memref<128x128xbf16, #tpu.memory_space<vmem>>, vector<128x128xbf16>
    %cst_6 = arith.constant dense<0.000000e+00> : vector<128x128xf32>
    %8 = tpu.matmul %5, %7, %cst_6 {dimension_numbers = #tpu.dot_dimension_numbers<[1], [0], [0], [1], [0, 0, 1, 1], [], []>} : vector<128x128xbf16>, vector<128x128xbf16>, vector<128x128xf32> -> vector<128x128xf32>
    %9 = arith.addf %6, %8 : vector<128x128xf32>
    %c0_7 = arith.constant 0 : index
    %c0_8 = arith.constant 0 : index
    %10 = vector.load %arg7[%c0_7, %c0_8] : memref<128x128xf32, #tpu.memory_space<vmem>>, vector<128x128xf32>
    tpu.vector_store %arg7[%c0_7, %c0_8], %9 {strides = array<i32>} : memref<128x128xf32, #tpu.memory_space<vmem>>, vector<128x128xf32>,
    %c0_i32_9 = arith.constant 0 : i32
    %11 = arith.cmpi eq, %arg2, %c0_i32_9 : i32
    %12 = arith.extui %11 : i1 to i32
    %c0_i32_10 = arith.constant 0 : i32
    %13 = arith.cmpi ne, %12, %c0_i32_10 : i32
    scf.if %13 {
      %c0_11 = arith.constant 0 : index
      %c0_12 = arith.constant 0 : index
      %14 = vector.load %arg7[%c0_11, %c0_12] : memref<128x128xf32, #tpu.memory_space<vmem>>, vector<128x128xf32>
      %c0_13 = arith.constant 0 : index
      %c0_14 = arith.constant 0 : index
      %15 = vector.load %arg5[%c0_13, %c0_14] : memref<1x128xf32, #tpu.memory_space<vmem>>, vector<1x128xf32>
      %16 = vector.broadcast %15 : vector<1x128xf32> to vector<128x128xf32>
      %17 = arith.addf %14, %16 : vector<128x128xf32>
      %c0_15 = arith.constant 0 : index
      %c0_16 = arith.constant 0 : index
      %18 = vector.load %arg6[%c0_15, %c0_16] : memref<128x128xf32, #tpu.memory_space<vmem>>, vector<128x128xf32>
      tpu.vector_store %arg6[%c0_15, %c0_16], %17 {strides = array<i32>} : memref<128x128xf32, #tpu.memory_space<vmem>>, vector<128x128xf32>,
    } else {
    }
    return
  }
  func.func @transform_0(%arg0: i32, %arg1: i32, %arg2: i32) -> (i32, i32) {
    %c0_i32 = arith.constant 0 : i32
    return %arg0, %arg2 : i32, i32
  }
  func.func @transform_1(%arg0: i32, %arg1: i32, %arg2: i32) -> (i32, i32) {
    %c0_i32 = arith.constant 0 : i32
    return %arg2, %arg1 : i32, i32
  }
  func.func @transform_2(%arg0: i32, %arg1: i32, %arg2: i32) -> (i32, i32) {
    %c0_i32 = arith.constant 0 : i32
    %c0_i32_0 = arith.constant 0 : i32
    return %c0_i32, %arg1 : i32, i32
  }
  func.func @transform_3(%arg0: i32, %arg1: i32, %arg2: i32) -> (i32, i32) {
    %c0_i32 = arith.constant 0 : i32
    return %arg0, %arg1 : i32, i32
  }
}

module attributes {stable_mosaic.version = 11 : i64} {
  func.func @_gemm_kernel(%arg0: i32, %arg1: i32, %arg2: i32, %arg3: memref<512x128xbf16, #tpu.memory_space<vmem>>, %arg4: memref<128x128xbf16, #tpu.memory_space<vmem>>, %arg5: memref<1x128xf32, #tpu.memory_space<vmem>>, %arg6: memref<512x128xf32, #tpu.memory_space<vmem>>, %arg7: memref<512x128xf32, #tpu.memory_space<vmem>>) attributes {dimension_semantics = [#tpu.dimension_semantics<parallel>, #tpu.dimension_semantics<parallel>, #tpu.dimension_semantics<arbitrary>], iteration_bounds = array<i64: 1, 1, 1>, scalar_prefetch = 0 : i64, scratch_operands = 1 : i64, tpu.core_type = #tpu.core_type<tc>, window_params = [{transform_indices = @transform_0, window_bounds = array<i64: 512, 128>}, {transform_indices = @transform_1, window_bounds = array<i64: 128, 128>}, {transform_indices = @transform_2, window_bounds = array<i64: 1, 128>}, {transform_indices = @transform_3, window_bounds = array<i64: 512, 128>}]} {
    %c0_i32 = arith.constant 0 : i32
    %0 = arith.cmpi eq, %arg2, %c0_i32 : i32
    %1 = arith.extui %0 : i1 to i32
    %c0_i32_0 = arith.constant 0 : i32
    %2 = arith.cmpi ne, %1, %c0_i32_0 : i32
    scf.if %2 {
      %cst_11 = arith.constant 0.000000e+00 : f32
      %14 = vector.broadcast %cst_11 : f32 to vector<512x128xf32>
      %c0_12 = arith.constant 0 : index
      %c0_13 = arith.constant 0 : index
      %15 = vector.load %arg7[%c0_12, %c0_13] : memref<512x128xf32, #tpu.memory_space<vmem>>, vector<512x128xf32>
      tpu.vector_store %arg7[%c0_12, %c0_13], %14 {strides = array<i32>} : memref<512x128xf32, #tpu.memory_space<vmem>>, vector<512x128xf32>,
    } else {
    }
    %c0 = arith.constant 0 : index
    %c0_1 = arith.constant 0 : index
    %3 = vector.load %arg3[%c0, %c0_1] : memref<512x128xbf16, #tpu.memory_space<vmem>>, vector<512x128xbf16>
    %cst = arith.constant 0.000000e+00 : bf16
    %4 = vector.broadcast %cst : bf16 to vector<512x128xbf16>
    %5 = arith.maximumf %3, %4 : vector<512x128xbf16>
    %c0_2 = arith.constant 0 : index
    %c0_3 = arith.constant 0 : index
    %6 = vector.load %arg7[%c0_2, %c0_3] : memref<512x128xf32, #tpu.memory_space<vmem>>, vector<512x128xf32>
    %c0_4 = arith.constant 0 : index
    %c0_5 = arith.constant 0 : index
    %7 = vector.load %arg4[%c0_4, %c0_5] : memref<128x128xbf16, #tpu.memory_space<vmem>>, vector<128x128xbf16>
    %cst_6 = arith.constant dense<0.000000e+00> : vector<512x128xf32>
    %8 = tpu.matmul %5, %7, %cst_6 {dimension_numbers = #tpu.dot_dimension_numbers<[1], [0], [0], [1], [0, 0, 1, 1], [], []>} : vector<512x128xbf16>, vector<128x128xbf16>, vector<512x128xf32> -> vector<512x128xf32>
    %9 = arith.addf %6, %8 : vector<512x128xf32>
    %c0_7 = arith.constant 0 : index
    %c0_8 = arith.constant 0 : index
    %10 = vector.load %arg7[%c0_7, %c0_8] : memref<512x128xf32, #tpu.memory_space<vmem>>, vector<512x128xf32>
    tpu.vector_store %arg7[%c0_7, %c0_8], %9 {strides = array<i32>} : memref<512x128xf32, #tpu.memory_space<vmem>>, vector<512x128xf32>,
    %c0_i32_9 = arith.constant 0 : i32
    %11 = arith.cmpi eq, %arg2, %c0_i32_9 : i32
    %12 = arith.extui %11 : i1 to i32
    %c0_i32_10 = arith.constant 0 : i32
    %13 = arith.cmpi ne, %12, %c0_i32_10 : i32
    scf.if %13 {
      %c0_11 = arith.constant 0 : index
      %c0_12 = arith.constant 0 : index
      %14 = vector.load %arg7[%c0_11, %c0_12] : memref<512x128xf32, #tpu.memory_space<vmem>>, vector<512x128xf32>
      %c0_13 = arith.constant 0 : index
      %c0_14 = arith.constant 0 : index
      %15 = vector.load %arg5[%c0_13, %c0_14] : memref<1x128xf32, #tpu.memory_space<vmem>>, vector<1x128xf32>
      %16 = vector.broadcast %15 : vector<1x128xf32> to vector<512x128xf32>
      %17 = arith.addf %14, %16 : vector<512x128xf32>
      %18 = math.tanh %17 : vector<512x128xf32>
      %c0_15 = arith.constant 0 : index
      %c0_16 = arith.constant 0 : index
      %19 = vector.load %arg6[%c0_15, %c0_16] : memref<512x128xf32, #tpu.memory_space<vmem>>, vector<512x128xf32>
      tpu.vector_store %arg6[%c0_15, %c0_16], %18 {strides = array<i32>} : memref<512x128xf32, #tpu.memory_space<vmem>>, vector<512x128xf32>,
    } else {
    }
    return
  }
  func.func @transform_0(%arg0: i32, %arg1: i32, %arg2: i32) -> (i32, i32) {
    %c0_i32 = arith.constant 0 : i32
    return %arg0, %arg2 : i32, i32
  }
  func.func @transform_1(%arg0: i32, %arg1: i32, %arg2: i32) -> (i32, i32) {
    %c0_i32 = arith.constant 0 : i32
    return %arg2, %arg1 : i32, i32
  }
  func.func @transform_2(%arg0: i32, %arg1: i32, %arg2: i32) -> (i32, i32) {
    %c0_i32 = arith.constant 0 : i32
    %c0_i32_0 = arith.constant 0 : i32
    return %c0_i32, %arg1 : i32, i32
  }
  func.func @transform_3(%arg0: i32, %arg1: i32, %arg2: i32) -> (i32, i32) {
    %c0_i32 = arith.constant 0 : i32
    return %arg0, %arg1 : i32, i32
  }
}

</mosaic_0001>

<bundles_post_ra>
// kernel: _lambda_.25
= control target key start
LH: loop header
LB: loop body
LE: loop exit
PB: predicated region body
PF: predicated region fallthrough
CT: control target
= control target key end

     0   :  { %s1708_s1 = inlined_call_operand.vmem [shape: bf16[128,128], index: 1, kind: input, shape index: {}]   ;;  %s1709_s0 = inlined_call_operand.vmem [shape: bf16[512,128], index: 0, kind: input, shape index: {}]   ;;  %s1710_s2 = inlined_call_operand.vmem [shape: f32[1,128], index: 2, kind: input, shape index: {}]   ;;  %s1711_s3 = inlined_call_operand.vmem [shape: f32[512,128], index: 3, kind: output, shape index: {}]  }
   0x1   :  { %v1267_v0 = vld [vmem:[%s1708_s1] sm:$0xff]   ;;  %v1268_v1 = vld [vmem:[%s1708_s1 + $0x8] sm:$0xff]   ;;  %v1269_v2 = vld [vmem:[%s1708_s1 + $0x10] sm:$0xff]  }
   0x2   :  { %1171 = vmatprep.subr.bf16.mxu0 %v1267_v0  ;;  %1251 = vmatprep.subr.bf16.mxu1 %v1267_v0  ;;  %v1270_v3 = vld [vmem:[%s1708_s1 + $0x18] sm:$0xff]   ;;  %v1275_v4 = vld [vmem:[%s1709_s0] sm:$0xff]   ;;  %v1272_v7 = vld [vmem:[%s1708_s1 + $0x28] sm:$0xff]  }
   0x3   :  { %1172 = vmatpush3.bf16.msra.mxu0 %v1267_v0  ;;  %1259 = vmatpush3.bf16.msra.mxu1 %v1267_v0  ;;  %v1276_v5 = vld [vmem:[%s1709_s0 + $0x80] sm:$0xff]   ;;  %v1273_v8 = vld [vmem:[%s1708_s1 + $0x30] sm:$0xff]   ;;  %v1274_v9 = vld [vmem:[%s1708_s1 + $0x38] sm:$0xff]  }
   0x4   :  { %1173 = vmatprep.subr.bf16.mxu0 %v1268_v1  ;;  %1252 = vmatprep.subr.bf16.mxu1 %v1268_v1  ;;  %v1271_v6 = vld [vmem:[%s1708_s1 + $0x20] sm:$0xff]   ;;  %v1277_v10 = vld [vmem:[%s1709_s0 + $0x8] sm:$0xff]   ;;  %v1279_v12 = vld [vmem:[%s1709_s0 + $0x10] sm:$0xff]  }
   0x5   :  { %1187 = vmatprep.mubr.bf16.mxu0 %v1275_v4  ;;  %1219 = vmatprep.mubr.bf16.mxu1 %v1276_v5  ;;  %v1278_v11 = vld [vmem:[%s1709_s0 + $0x88] sm:$0xff]   ;;  %v1280_v13 = vld [vmem:[%s1709_s0 + $0x90] sm:$0xff]   ;;  %v1281_v14 = vld [vmem:[%s1709_s0 + $0x18] sm:$0xff]  }
   0x6   :  { %v1282_v15 = vld [vmem:[%s1709_s0 + $0x98] sm:$0xff]   ;;  %v1283_v16 = vld [vmem:[%s1709_s0 + $0x20] sm:$0xff]   ;;  %v1285_v18 = vld [vmem:[%s1709_s0 + $0x28] sm:$0xff]  }
   0x7   :  { %1174 = vmatpush3.bf16.msra.mxu0 %v1268_v1  ;;  %1260 = vmatpush3.bf16.msra.mxu1 %v1268_v1  ;;  %v1284_v17 = vld [vmem:[%s1709_s0 + $0xa0] sm:$0xff]   ;;  %v1286_v19 = vld [vmem:[%s1709_s0 + $0xa8] sm:$0xff]   ;;  %v1287_v20 = vld [vmem:[%s1709_s0 + $0x30] sm:$0xff]  }
   0x8   :  { %1175 = vmatprep.subr.bf16.mxu0 %v1269_v2  ;;  %1253 = vmatprep.subr.bf16.mxu1 %v1269_v2  ;;  %v1288_v21 = vld [vmem:[%s1709_s0 + $0xb0] sm:$0xff]   ;;  %v1289_v22 = vld [vmem:[%s1709_s0 + $0x38] sm:$0xff]   ;;  %v1291_v24 = vld [vmem:[%s1709_s0 + $0x40] sm:$0xff]  }
   0x9   :  { %v1290_v23 = vld [vmem:[%s1709_s0 + $0xb8] sm:$0xff]   ;;  %v1292_v25 = vld [vmem:[%s1709_s0 + $0xc0] sm:$0xff]   ;;  %v1293_v26 = vld [vmem:[%s1709_s0 + $0x48] sm:$0xff]  }
   0xa   :  { %v1294_v27 = vld [vmem:[%s1709_s0 + $0xc8] sm:$0xff]   ;;  %v1295_v28 = vld [vmem:[%s1709_s0 + $0x50] sm:$0xff]   ;;  %v1297_v30 = vld [vmem:[%s1709_s0 + $0x58] sm:$0xff]  }
   0xb   :  { %1176 = vmatpush3.bf16.msra.mxu0 %v1269_v2  ;;  %1261 = vmatpush3.bf16.msra.mxu1 %v1269_v2  ;;  %v1296_v29 = vld [vmem:[%s1709_s0 + $0xd0] sm:$0xff]   ;;  %v1298_v31 = vld [vmem:[%s1709_s0 + $0xd8] sm:$0xff]   ;;  %v1299_v32 = vld [vmem:[%s1709_s0 + $0x60] sm:$0xff]  }
   0xc   :  { %1177 = vmatprep.subr.bf16.mxu0 %v1270_v3  ;;  %1254 = vmatprep.subr.bf16.mxu1 %v1270_v3  ;;  %v1300_v33 = vld [vmem:[%s1709_s0 + $0xe0] sm:$0xff]   ;;  %v1301_v34 = vld [vmem:[%s1709_s0 + $0x68] sm:$0xff]   ;;  %v1303_v36 = vld [vmem:[%s1709_s0 + $0x70] sm:$0xff]  }
   0xd   :  { %v1302_v35 = vld [vmem:[%s1709_s0 + $0xe8] sm:$0xff]   ;;  %v1304_v37 = vld [vmem:[%s1709_s0 + $0xf0] sm:$0xff]   ;;  %v1305_v38 = vld [vmem:[%s1709_s0 + $0x78] sm:$0xff]  }
   0xe   :  { %v1306_v39 = vld [vmem:[%s1709_s0 + $0xf8] sm:$0xff]   ;;  %v1450_v40 = vld [vmem:[%s1710_s2] ss:$0 sm:$0xff] }
   0xf   :  { %1178 = vmatpush3.bf16.msra.mxu0 %v1270_v3  ;;  %1262 = vmatpush3.bf16.msra.mxu1 %v1270_v3 }
  0x10   :  { %1179 = vmatprep.subr.bf16.mxu0 %v1271_v6  ;;  %1255 = vmatprep.subr.bf16.mxu1 %v1271_v6 }
  0x13   :  { %1180 = vmatpush3.bf16.msra.mxu0 %v1271_v6  ;;  %1263 = vmatpush3.bf16.msra.mxu1 %v1271_v6 }
  0x14   :  { %1181 = vmatprep.subr.bf16.mxu0 %v1272_v7  ;;  %1256 = vmatprep.subr.bf16.mxu1 %v1272_v7 }
  0x17   :  { %1182 = vmatpush3.bf16.msra.mxu0 %v1272_v7  ;;  %1264 = vmatpush3.bf16.msra.mxu1 %v1272_v7 }
  0x18   :  { %1183 = vmatprep.subr.bf16.mxu0 %v1273_v8  ;;  %1257 = vmatprep.subr.bf16.mxu1 %v1273_v8 }
  0x1b   :  { %1184 = vmatpush3.bf16.msra.mxu0 %v1273_v8  ;;  %1265 = vmatpush3.bf16.msra.mxu1 %v1273_v8 }
  0x1c   :  { %1185 = vmatprep.subr.bf16.mxu0 %v1274_v9  ;;  %1258 = vmatprep.subr.bf16.mxu1 %v1274_v9 }
  0x1f   :  { %1186 = vmatpush3.bf16.msra.mxu0 %v1274_v9  ;;  %1266 = vmatpush3.bf16.msra.mxu1 %v1274_v9 }
  0x22   :  { %1188 = vmatmul.mubr.bf16.vlgmr.msra.gmra.mrb[0].mxu0 %v1277_v10  ;;  %1220 = vmatmul.mubr.bf16.vlgmr.msra.gmra.mrb[0].mxu1 %v1278_v11 }
  0x23   :  { %1191 = vmatprep.mubr.bf16.mxu0 %v1279_v12  ;;  %1223 = vmatprep.mubr.bf16.mxu1 %v1280_v13 }
  0x2a   :  { %1192 = vmatmul.mubr.bf16.gmra.mrb[4].mxu0 %v1281_v14  ;;  %1224 = vmatmul.mubr.bf16.gmra.mrb[4].mxu1 %v1282_v15 }
  0x2b   :  { %1195 = vmatprep.mubr.bf16.mxu0 %v1283_v16  ;;  %1227 = vmatprep.mubr.bf16.mxu1 %v1284_v17 }
  0x32   :  { %1196 = vmatmul.mubr.bf16.gmra.mrb[8].mxu0 %v1285_v18  ;;  %1228 = vmatmul.mubr.bf16.gmra.mrb[8].mxu1 %v1286_v19 }
  0x33   :  { %1199 = vmatprep.mubr.bf16.mxu0 %v1287_v20  ;;  %1231 = vmatprep.mubr.bf16.mxu1 %v1288_v21 }
  0x3a   :  { %1200 = vmatmul.mubr.bf16.gmra.mrb[12].mxu0 %v1289_v22  ;;  %1232 = vmatmul.mubr.bf16.gmra.mrb[12].mxu1 %v1290_v23 }
  0x3b   :  { %1203 = vmatprep.mubr.bf16.mxu0 %v1291_v24  ;;  %1235 = vmatprep.mubr.bf16.mxu1 %v1292_v25 }
  0x42   :  { %1204 = vmatmul.mubr.bf16.gmra.mrb[16].mxu0 %v1293_v26  ;;  %1236 = vmatmul.mubr.bf16.gmra.mrb[16].mxu1 %v1294_v27 }
  0x43   :  { %1207 = vmatprep.mubr.bf16.mxu0 %v1295_v28  ;;  %1239 = vmatprep.mubr.bf16.mxu1 %v1296_v29 }
  0x4a   :  { %1208 = vmatmul.mubr.bf16.gmra.mrb[20].mxu0 %v1297_v30  ;;  %1240 = vmatmul.mubr.bf16.gmra.mrb[20].mxu1 %v1298_v31 }
  0x4b   :  { %1211 = vmatprep.mubr.bf16.mxu0 %v1299_v32  ;;  %1243 = vmatprep.mubr.bf16.mxu1 %v1300_v33 }
  0x52   :  { %1212 = vmatmul.mubr.bf16.gmra.mrb[24].mxu0 %v1301_v34  ;;  %1244 = vmatmul.mubr.bf16.gmra.mrb[24].mxu1 %v1302_v35 }
  0x53   :  { %1215 = vmatprep.mubr.bf16.mxu0 %v1303_v36  ;;  %1247 = vmatprep.mubr.bf16.mxu1 %v1304_v37 }
  0x5a   :  { %1216 = vmatmul.mubr.bf16.gmra.mrb[28].mxu0 %v1305_v38  ;;  %1248 = vmatmul.mubr.bf16.gmra.mrb[28].mxu1 %v1306_v39 }
  0xf5   :  { %v1189_v41 = vpop.f32.mrb[0].mxu0  ;;  %v1221_v42 = vpop.f32.mrb[0].mxu1 }
  0xf6   :  { %v960_v43 = vadd.f32 %v1189_v41, %v1450_v40  ;;  %v992_v44 = vadd.f32 %v1221_v42, %v1450_v40  ;;  %v501_v45 = vpop.f32.mrb[1].mxu0  ;;  %v629_v46 = vpop.f32.mrb[1].mxu1 }
  0xf7   :  { %v958_v47 = vadd.f32 %v1450_v40, %v501_v45  ;;  %v990_v48 = vadd.f32 %v1450_v40, %v629_v46  ;;  %v1190_v49 = vpop.f32.mrb[2].mxu0  ;;  %v1222_v50 = vpop.f32.mrb[2].mxu1 }
  0xf8   :  { %1024 = vst [vmem:[%s1711_s3 + $0x10] sm:$0xff] %v960_v43  ;;  %1056 = vst [vmem:[%s1711_s3 + $0x110] sm:$0xff] %v992_v44  ;;  %v961_v51 = vadd.f32 %v1190_v49, %v1450_v40  ;;  %v993_v52 = vadd.f32 %v1222_v50, %v1450_v40  ;;  %v504_v53 = vpop.f32.mrb[3].mxu0  ;;  %v632_v54 = vpop.f32.mrb[3].mxu1 }
  0xf9   :  { %1022 = vst [vmem:[%s1711_s3] sm:$0xff] %v958_v47  ;;  %1054 = vst [vmem:[%s1711_s3 + $0x100] sm:$0xff] %v990_v48  ;;  %v959_v55 = vadd.f32 %v1450_v40, %v504_v53  ;;  %v991_v56 = vadd.f32 %v1450_v40, %v632_v54 }
  0xfa   :  { %1025 = vst [vmem:[%s1711_s3 + $0x18] sm:$0xff] %v961_v51  ;;  %1057 = vst [vmem:[%s1711_s3 + $0x118] sm:$0xff] %v993_v52 }
  0xfb   :  { %1023 = vst [vmem:[%s1711_s3 + $0x8] sm:$0xff] %v959_v55  ;;  %1055 = vst [vmem:[%s1711_s3 + $0x108] sm:$0xff] %v991_v56 }
  0xfd   :  { %v1193_v57 = vpop.f32.mrb[4].mxu0  ;;  %v1225_v58 = vpop.f32.mrb[4].mxu1 }
  0xfe   :  { %v964_v59 = vadd.f32 %v1193_v57, %v1450_v40  ;;  %v996_v60 = vadd.f32 %v1225_v58, %v1450_v40  ;;  %v517_v61 = vpop.f32.mrb[5].mxu0  ;;  %v645_v62 = vpop.f32.mrb[5].mxu1 }
  0xff   :  { %v962_v63 = vadd.f32 %v1450_v40, %v517_v61  ;;  %v994_v0 = vadd.f32 %v1450_v40, %v645_v62  ;;  %v1194_v1 = vpop.f32.mrb[6].mxu0  ;;  %v1226_v2 = vpop.f32.mrb[6].mxu1 }
 0x100   :  { %1028 = vst [vmem:[%s1711_s3 + $0x30] sm:$0xff] %v964_v59  ;;  %1060 = vst [vmem:[%s1711_s3 + $0x130] sm:$0xff] %v996_v60  ;;  %v965_v3 = vadd.f32 %v1194_v1, %v1450_v40  ;;  %v997_v4 = vadd.f32 %v1226_v2, %v1450_v40  ;;  %v520_v5 = vpop.f32.mrb[7].mxu0  ;;  %v648_v6 = vpop.f32.mrb[7].mxu1 }
 0x101   :  { %1026 = vst [vmem:[%s1711_s3 + $0x20] sm:$0xff] %v962_v63  ;;  %1058 = vst [vmem:[%s1711_s3 + $0x120] sm:$0xff] %v994_v0  ;;  %v963_v7 = vadd.f32 %v1450_v40, %v520_v5  ;;  %v995_v8 = vadd.f32 %v1450_v40, %v648_v6 }
 0x102   :  { %1029 = vst [vmem:[%s1711_s3 + $0x38] sm:$0xff] %v965_v3  ;;  %1061 = vst [vmem:[%s1711_s3 + $0x138] sm:$0xff] %v997_v4 }
 0x103   :  { %1027 = vst [vmem:[%s1711_s3 + $0x28] sm:$0xff] %v963_v7  ;;  %1059 = vst [vmem:[%s1711_s3 + $0x128] sm:$0xff] %v995_v8 }
 0x105   :  { %v1197_v9 = vpop.f32.mrb[8].mxu0  ;;  %v1229_v10 = vpop.f32.mrb[8].mxu1 }
 0x106   :  { %v968_v11 = vadd.f32 %v1197_v9, %v1450_v40  ;;  %v1000_v12 = vadd.f32 %v1229_v10, %v1450_v40  ;;  %v533_v13 = vpop.f32.mrb[9].mxu0  ;;  %v661_v14 = vpop.f32.mrb[9].mxu1 }
 0x107   :  { %v966_v15 = vadd.f32 %v1450_v40, %v533_v13  ;;  %v998_v16 = vadd.f32 %v1450_v40, %v661_v14  ;;  %v1198_v17 = vpop.f32.mrb[10].mxu0  ;;  %v1230_v18 = vpop.f32.mrb[10].mxu1 }
 0x108   :  { %1032 = vst [vmem:[%s1711_s3 + $0x50] sm:$0xff] %v968_v11  ;;  %1064 = vst [vmem:[%s1711_s3 + $0x150] sm:$0xff] %v1000_v12  ;;  %v969_v19 = vadd.f32 %v1198_v17, %v1450_v40  ;;  %v1001_v20 = vadd.f32 %v1230_v18, %v1450_v40  ;;  %v536_v21 = vpop.f32.mrb[11].mxu0  ;;  %v664_v22 = vpop.f32.mrb[11].mxu1 }
 0x109   :  { %1030 = vst [vmem:[%s1711_s3 + $0x40] sm:$0xff] %v966_v15  ;;  %1062 = vst [vmem:[%s1711_s3 + $0x140] sm:$0xff] %v998_v16  ;;  %v967_v23 = vadd.f32 %v1450_v40, %v536_v21  ;;  %v999_v24 = vadd.f32 %v1450_v40, %v664_v22 }
 0x10a   :  { %1033 = vst [vmem:[%s1711_s3 + $0x58] sm:$0xff] %v969_v19  ;;  %1065 = vst [vmem:[%s1711_s3 + $0x158] sm:$0xff] %v1001_v20 }
 0x10b   :  { %1031 = vst [vmem:[%s1711_s3 + $0x48] sm:$0xff] %v967_v23  ;;  %1063 = vst [vmem:[%s1711_s3 + $0x148] sm:$0xff] %v999_v24 }
 0x10d   :  { %v1201_v25 = vpop.f32.mrb[12].mxu0  ;;  %v1233_v26 = vpop.f32.mrb[12].mxu1 }
 0x10e   :  { %v972_v27 = vadd.f32 %v1201_v25, %v1450_v40  ;;  %v1004_v28 = vadd.f32 %v1233_v26, %v1450_v40  ;;  %v549_v29 = vpop.f32.mrb[13].mxu0  ;;  %v677_v30 = vpop.f32.mrb[13].mxu1 }
 0x10f   :  { %v970_v31 = vadd.f32 %v1450_v40, %v549_v29  ;;  %v1002_v32 = vadd.f32 %v1450_v40, %v677_v30  ;;  %v1202_v33 = vpop.f32.mrb[14].mxu0  ;;  %v1234_v34 = vpop.f32.mrb[14].mxu1 }
 0x110   :  { %1036 = vst [vmem:[%s1711_s3 + $0x70] sm:$0xff] %v972_v27  ;;  %1068 = vst [vmem:[%s1711_s3 + $0x170] sm:$0xff] %v1004_v28  ;;  %v973_v35 = vadd.f32 %v1202_v33, %v1450_v40  ;;  %v1005_v36 = vadd.f32 %v1234_v34, %v1450_v40  ;;  %v552_v37 = vpop.f32.mrb[15].mxu0  ;;  %v680_v38 = vpop.f32.mrb[15].mxu1 }
 0x111   :  { %1034 = vst [vmem:[%s1711_s3 + $0x60] sm:$0xff] %v970_v31  ;;  %1066 = vst [vmem:[%s1711_s3 + $0x160] sm:$0xff] %v1002_v32  ;;  %v971_v39 = vadd.f32 %v1450_v40, %v552_v37  ;;  %v1003_v41 = vadd.f32 %v1450_v40, %v680_v38 }
 0x112   :  { %1037 = vst [vmem:[%s1711_s3 + $0x78] sm:$0xff] %v973_v35  ;;  %1069 = vst [vmem:[%s1711_s3 + $0x178] sm:$0xff] %v1005_v36 }
 0x113   :  { %1035 = vst [vmem:[%s1711_s3 + $0x68] sm:$0xff] %v971_v39  ;;  %1067 = vst [vmem:[%s1711_s3 + $0x168] sm:$0xff] %v1003_v41 }
 0x115   :  { %v1205_v42 = vpop.f32.mrb[16].mxu0  ;;  %v1237_v43 = vpop.f32.mrb[16].mxu1 }
 0x116   :  { %v976_v44 = vadd.f32 %v1205_v42, %v1450_v40  ;;  %v1008_v45 = vadd.f32 %v1237_v43, %v1450_v40  ;;  %v565_v46 = vpop.f32.mrb[17].mxu0  ;;  %v693_v47 = vpop.f32.mrb[17].mxu1 }
 0x117   :  { %v974_v48 = vadd.f32 %v1450_v40, %v565_v46  ;;  %v1006_v49 = vadd.f32 %v1450_v40, %v693_v47  ;;  %v1206_v50 = vpop.f32.mrb[18].mxu0  ;;  %v1238_v51 = vpop.f32.mrb[18].mxu1 }
 0x118   :  { %1040 = vst [vmem:[%s1711_s3 + $0x90] sm:$0xff] %v976_v44  ;;  %1072 = vst [vmem:[%s1711_s3 + $0x190] sm:$0xff] %v1008_v45  ;;  %v977_v52 = vadd.f32 %v1206_v50, %v1450_v40  ;;  %v1009_v53 = vadd.f32 %v1238_v51, %v1450_v40  ;;  %v568_v54 = vpop.f32.mrb[19].mxu0  ;;  %v696_v55 = vpop.f32.mrb[19].mxu1 }
 0x119   :  { %1038 = vst [vmem:[%s1711_s3 + $0x80] sm:$0xff] %v974_v48  ;;  %1070 = vst [vmem:[%s1711_s3 + $0x180] sm:$0xff] %v1006_v49  ;;  %v975_v56 = vadd.f32 %v1450_v40, %v568_v54  ;;  %v1007_v57 = vadd.f32 %v1450_v40, %v696_v55 }
 0x11a   :  { %1041 = vst [vmem:[%s1711_s3 + $0x98] sm:$0xff] %v977_v52  ;;  %1073 = vst [vmem:[%s1711_s3 + $0x198] sm:$0xff] %v1009_v53 }
 0x11b   :  { %1039 = vst [vmem:[%s1711_s3 + $0x88] sm:$0xff] %v975_v56  ;;  %1071 = vst [vmem:[%s1711_s3 + $0x188] sm:$0xff] %v1007_v57 }
 0x11d   :  { %v1209_v58 = vpop.f32.mrb[20].mxu0  ;;  %v1241_v59 = vpop.f32.mrb[20].mxu1 }
 0x11e   :  { %v980_v60 = vadd.f32 %v1209_v58, %v1450_v40  ;;  %v1012_v61 = vadd.f32 %v1241_v59, %v1450_v40  ;;  %v581_v62 = vpop.f32.mrb[21].mxu0  ;;  %v709_v63 = vpop.f32.mrb[21].mxu1 }
 0x11f   :  { %v978_v0 = vadd.f32 %v1450_v40, %v581_v62  ;;  %v1010_v1 = vadd.f32 %v1450_v40, %v709_v63  ;;  %v1210_v2 = vpop.f32.mrb[22].mxu0  ;;  %v1242_v3 = vpop.f32.mrb[22].mxu1 }
 0x120   :  { %1044 = vst [vmem:[%s1711_s3 + $0xb0] sm:$0xff] %v980_v60  ;;  %1076 = vst [vmem:[%s1711_s3 + $0x1b0] sm:$0xff] %v1012_v61  ;;  %v981_v4 = vadd.f32 %v1210_v2, %v1450_v40  ;;  %v1013_v5 = vadd.f32 %v1242_v3, %v1450_v40  ;;  %v584_v6 = vpop.f32.mrb[23].mxu0  ;;  %v712_v7 = vpop.f32.mrb[23].mxu1 }
 0x121   :  { %1042 = vst [vmem:[%s1711_s3 + $0xa0] sm:$0xff] %v978_v0  ;;  %1074 = vst [vmem:[%s1711_s3 + $0x1a0] sm:$0xff] %v1010_v1  ;;  %v979_v8 = vadd.f32 %v1450_v40, %v584_v6  ;;  %v1011_v9 = vadd.f32 %v1450_v40, %v712_v7 }
 0x122   :  { %1045 = vst [vmem:[%s1711_s3 + $0xb8] sm:$0xff] %v981_v4  ;;  %1077 = vst [vmem:[%s1711_s3 + $0x1b8] sm:$0xff] %v1013_v5 }
 0x123   :  { %1043 = vst [vmem:[%s1711_s3 + $0xa8] sm:$0xff] %v979_v8  ;;  %1075 = vst [vmem:[%s1711_s3 + $0x1a8] sm:$0xff] %v1011_v9 }
 0x125   :  { %v1213_v10 = vpop.f32.mrb[24].mxu0  ;;  %v1245_v11 = vpop.f32.mrb[24].mxu1 }
 0x126   :  { %v984_v12 = vadd.f32 %v1213_v10, %v1450_v40  ;;  %v1016_v13 = vadd.f32 %v1245_v11, %v1450_v40  ;;  %v597_v14 = vpop.f32.mrb[25].mxu0  ;;  %v725_v15 = vpop.f32.mrb[25].mxu1 }
 0x127   :  { %v982_v16 = vadd.f32 %v1450_v40, %v597_v14  ;;  %v1014_v17 = vadd.f32 %v1450_v40, %v725_v15  ;;  %v1214_v18 = vpop.f32.mrb[26].mxu0  ;;  %v1246_v19 = vpop.f32.mrb[26].mxu1 }
 0x128   :  { %1048 = vst [vmem:[%s1711_s3 + $0xd0] sm:$0xff] %v984_v12  ;;  %1080 = vst [vmem:[%s1711_s3 + $0x1d0] sm:$0xff] %v1016_v13  ;;  %v985_v20 = vadd.f32 %v1214_v18, %v1450_v40  ;;  %v1017_v21 = vadd.f32 %v1246_v19, %v1450_v40  ;;  %v600_v22 = vpop.f32.mrb[27].mxu0  ;;  %v728_v23 = vpop.f32.mrb[27].mxu1 }
 0x129   :  { %1046 = vst [vmem:[%s1711_s3 + $0xc0] sm:$0xff] %v982_v16  ;;  %1078 = vst [vmem:[%s1711_s3 + $0x1c0] sm:$0xff] %v1014_v17  ;;  %v983_v24 = vadd.f32 %v1450_v40, %v600_v22  ;;  %v1015_v25 = vadd.f32 %v1450_v40, %v728_v23 }
 0x12a   :  { %1049 = vst [vmem:[%s1711_s3 + $0xd8] sm:$0xff] %v985_v20  ;;  %1081 = vst [vmem:[%s1711_s3 + $0x1d8] sm:$0xff] %v1017_v21 }
 0x12b   :  { %1047 = vst [vmem:[%s1711_s3 + $0xc8] sm:$0xff] %v983_v24  ;;  %1079 = vst [vmem:[%s1711_s3 + $0x1c8] sm:$0xff] %v1015_v25 }
 0x12d   :  { %v1217_v26 = vpop.f32.mrb[28].mxu0  ;;  %v1249_v27 = vpop.f32.mrb[28].mxu1 }
 0x12e   :  { %v988_v28 = vadd.f32 %v1217_v26, %v1450_v40  ;;  %v1020_v29 = vadd.f32 %v1249_v27, %v1450_v40  ;;  %v613_v30 = vpop.f32.mrb[29].mxu0  ;;  %v741_v31 = vpop.f32.mrb[29].mxu1 }
 0x12f   :  { %v986_v32 = vadd.f32 %v1450_v40, %v613_v30  ;;  %v1018_v33 = vadd.f32 %v1450_v40, %v741_v31  ;;  %v1218_v34 = vpop.f32.mrb[30].mxu0  ;;  %v1250_v35 = vpop.f32.mrb[30].mxu1 }
 0x130   :  { %1052 = vst [vmem:[%s1711_s3 + $0xf0] sm:$0xff] %v988_v28  ;;  %1084 = vst [vmem:[%s1711_s3 + $0x1f0] sm:$0xff] %v1020_v29  ;;  %v989_v36 = vadd.f32 %v1218_v34, %v1450_v40  ;;  %v1021_v37 = vadd.f32 %v1250_v35, %v1450_v40  ;;  %v616_v38 = vpop.f32.mrb[31].mxu0  ;;  %v744_v39 = vpop.f32.mrb[31].mxu1 }
 0x131   :  { %1050 = vst [vmem:[%s1711_s3 + $0xe0] sm:$0xff] %v986_v32  ;;  %1082 = vst [vmem:[%s1711_s3 + $0x1e0] sm:$0xff] %v1018_v33  ;;  %v987_v41 = vadd.f32 %v1450_v40, %v616_v38  ;;  %v1019_v42 = vadd.f32 %v1450_v40, %v744_v39 }
 0x132   :  { %1053 = vst [vmem:[%s1711_s3 + $0xf8] sm:$0xff] %v989_v36  ;;  %1085 = vst [vmem:[%s1711_s3 + $0x1f8] sm:$0xff] %v1021_v37 }
 0x133   :  { %1051 = vst [vmem:[%s1711_s3 + $0xe8] sm:$0xff] %v987_v41  ;;  %1083 = vst [vmem:[%s1711_s3 + $0x1e8] sm:$0xff] %v1019_v42 }

// kernel: _lambda_.26
= control target key start
LH: loop header
LB: loop body
LE: loop exit
PB: predicated region body
PF: predicated region fallthrough
CT: control target
= control target key end

     0   :  { %s655_s1 = inlined_call_operand.vmem [shape: bf16[128,128], index: 1, kind: input, shape index: {}]   ;;  %s656_s0 = inlined_call_operand.vmem [shape: bf16[128,128], index: 0, kind: input, shape index: {}]   ;;  %s657_s2 = inlined_call_operand.vmem [shape: f32[1,128], index: 2, kind: input, shape index: {}]   ;;  %s658_s3 = inlined_call_operand.vmem [shape: f32[128,128], index: 3, kind: output, shape index: {}]  }
   0x1   :  { %v500_v0 = vld [vmem:[%s655_s1] sm:$0xff]   ;;  %v501_v1 = vld [vmem:[%s655_s1 + $0x8] sm:$0xff]   ;;  %v502_v2 = vld [vmem:[%s655_s1 + $0x10] sm:$0xff]  }
   0x2   :  { %452 = vmatprep.subr.bf16.mxu0 %v500_v0  ;;  %484 = vmatprep.subr.bf16.mxu1 %v500_v0  ;;  %v503_v3 = vld [vmem:[%s655_s1 + $0x18] sm:$0xff]   ;;  %v36_v4 = vld [vmem:[%s656_s0] sm:$0xf]  ;;  %v37_v5 = vld [vmem:[%s656_s0 + $0x4] sm:$0xf] }
   0x3   :  { %453 = vmatpush3.bf16.msra.mxu0 %v500_v0  ;;  %492 = vmatpush3.bf16.msra.mxu1 %v500_v0  ;;  %v44_v6 = vld [vmem:[%s656_s0 + $0x20] sm:$0xf]  ;;  %vm52_vm0 = vcmp.gt.bf16.partialorder %v36_v4, 0  ;;  %vm53_vm1 = vcmp.gt.bf16.partialorder %v37_v5, 0  ;;  %v68_v7 = vmul.bf16 1045249613, %v36_v4 }
   0x4   :  { %454 = vmatprep.subr.bf16.mxu0 %v501_v1  ;;  %485 = vmatprep.subr.bf16.mxu1 %v501_v1  ;;  %v69_v8 = vmul.bf16 1045249613, %v37_v5  ;;  %v45_v9 = vld [vmem:[%s656_s0 + $0x24] sm:$0xf]  ;;  %vm60_vm2 = vcmp.gt.bf16.partialorder %v44_v6, 0  ;;  %v505_v19 = vld [vmem:[%s655_s1 + $0x28] sm:$0xff]  }
   0x5   :  { %v76_v10 = vmul.bf16 1045249613, %v44_v6  ;;  %v84_v11 = vsel %vm52_vm0, %v36_v4, %v68_v7  ;;  %vm61_vm3 = vcmp.gt.bf16.partialorder %v45_v9, 0  ;;  %v77_v13 = vmul.bf16 1045249613, %v45_v9  ;;  %v504_v14 = vld [vmem:[%s655_s1 + $0x20] sm:$0xff]  }
   0x6   :  { %v85_v12 = vsel %vm53_vm1, %v37_v5, %v69_v8  ;;  %v38_v20 = vld [vmem:[%s656_s0 + $0x8] sm:$0xf]  ;;  %v39_v21 = vld [vmem:[%s656_s0 + $0xc] sm:$0xf]  ;;  %v506_v22 = vld [vmem:[%s655_s1 + $0x30] sm:$0xff]  }
   0x7   :  { %455 = vmatpush3.bf16.msra.mxu0 %v501_v1  ;;  %493 = vmatpush3.bf16.msra.mxu1 %v501_v1  ;;  %v419_v15 = vcombine.low %v84_v11, %v85_v12  ;;  %v92_v16 = vsel %vm60_vm2, %v44_v6, %v76_v10  ;;  %v93_v17 = vsel %vm61_vm3, %v45_v9, %v77_v13  ;;  %v46_v23 = vld [vmem:[%s656_s0 + $0x28] sm:$0xf]  ;;  %v47_v24 = vld [vmem:[%s656_s0 + $0x2c] sm:$0xf]  ;;  %v70_v25 = vmul.bf16 1045249613, %v38_v20 }
   0x8   :  { %456 = vmatprep.subr.bf16.mxu0 %v502_v2  ;;  %486 = vmatprep.subr.bf16.mxu1 %v502_v2  ;;  %v423_v18 = vcombine.low %v92_v16, %v93_v17  ;;  %v40_v26 = vld [vmem:[%s656_s0 + $0x10] sm:$0xf]  ;;  %v41_v27 = vld [vmem:[%s656_s0 + $0x14] sm:$0xf]  ;;  %vm54_vm4 = vcmp.gt.bf16.partialorder %v38_v20, 0  ;;  %vm55_vm5 = vcmp.gt.bf16.partialorder %v39_v21, 0 }
   0x9   :  { %468 = vmatprep.mubr.bf16.mxu0 %v419_v15  ;;  %v48_v28 = vld [vmem:[%s656_s0 + $0x30] sm:$0xf]  ;;  %v49_v29 = vld [vmem:[%s656_s0 + $0x34] sm:$0xf]  ;;  %v507_v30 = vld [vmem:[%s655_s1 + $0x38] sm:$0xff]   ;;  %vm62_vm6 = vcmp.gt.bf16.partialorder %v46_v23, 0  ;;  %v86_v38 = vsel %vm54_vm4, %v38_v20, %v70_v25 }
   0xa   :  { %476 = vmatprep.mubr.bf16.mxu1 %v423_v18  ;;  %v71_v31 = vmul.bf16 1045249613, %v39_v21  ;;  %vm63_vm7 = vcmp.gt.bf16.partialorder %v47_v24, 0  ;;  %v78_v32 = vmul.bf16 1045249613, %v46_v23  ;;  %vm56_vm8 = vcmp.gt.bf16.partialorder %v40_v26, 0 }
   0xb   :  { %457 = vmatpush3.bf16.msra.mxu0 %v502_v2  ;;  %494 = vmatpush3.bf16.msra.mxu1 %v502_v2  ;;  %v79_v33 = vmul.bf16 1045249613, %v47_v24  ;;  %v72_v34 = vmul.bf16 1045249613, %v40_v26  ;;  %v73_v35 = vmul.bf16 1045249613, %v41_v27 }
   0xc   :  { %458 = vmatprep.subr.bf16.mxu0 %v503_v3  ;;  %487 = vmatprep.subr.bf16.mxu1 %v503_v3  ;;  %vm57_vm9 = vcmp.gt.bf16.partialorder %v41_v27, 0  ;;  %v80_v36 = vmul.bf16 1045249613, %v48_v28  ;;  %v81_v37 = vmul.bf16 1045249613, %v49_v29  ;;  %vm64_vm10 = vcmp.gt.bf16.partialorder %v48_v28, 0 }
   0xd   :  { %vm65_vm11 = vcmp.gt.bf16.partialorder %v49_v29, 0  ;;  %v87_v39 = vsel %vm55_vm5, %v39_v21, %v71_v31  ;;  %v94_v40 = vsel %vm62_vm6, %v46_v23, %v78_v32  ;;  %v95_v41 = vsel %vm63_vm7, %v47_v24, %v79_v33  ;;  %v42_v44 = vld [vmem:[%s656_s0 + $0x18] sm:$0xf]  ;;  %v43_v47 = vld [vmem:[%s656_s0 + $0x1c] sm:$0xf] }
   0xe   :  { %v88_v42 = vsel %vm56_vm8, %v40_v26, %v72_v34  ;;  %v89_v43 = vsel %vm57_vm9, %v41_v27, %v73_v35  ;;  %v96_v45 = vsel %vm64_vm10, %v48_v28, %v80_v36  ;;  %v97_v46 = vsel %vm65_vm11, %v49_v29, %v81_v37  ;;  %v50_v48 = vld [vmem:[%s656_s0 + $0x38] sm:$0xf]  ;;  %v51_v49 = vld [vmem:[%s656_s0 + $0x3c] sm:$0xf]  ;;  %v435_v0 = vld [vmem:[%s657_s2] ss:$0 sm:$0xff] }
   0xf   :  { %459 = vmatpush3.bf16.msra.mxu0 %v503_v3  ;;  %495 = vmatpush3.bf16.msra.mxu1 %v503_v3  ;;  %v420_v50 = vcombine.low %v86_v38, %v87_v39  ;;  %v424_v51 = vcombine.low %v94_v40, %v95_v41  ;;  %v421_v52 = vcombine.low %v88_v42, %v89_v43  ;;  %vm58_vm12 = vcmp.gt.bf16.partialorder %v42_v44, 0 }
  0x10   :  { %460 = vmatprep.subr.bf16.mxu0 %v504_v14  ;;  %488 = vmatprep.subr.bf16.mxu1 %v504_v14  ;;  %v74_v53 = vmul.bf16 1045249613, %v42_v44  ;;  %v425_v54 = vcombine.low %v96_v45, %v97_v46  ;;  %v75_v55 = vmul.bf16 1045249613, %v43_v47  ;;  %v82_v56 = vmul.bf16 1045249613, %v50_v48 }
  0x11   :  { %v83_v57 = vmul.bf16 1045249613, %v51_v49  ;;  %vm59_vm13 = vcmp.gt.bf16.partialorder %v43_v47, 0  ;;  %vm66_vm14 = vcmp.gt.bf16.partialorder %v50_v48, 0  ;;  %vm67_vm15 = vcmp.gt.bf16.partialorder %v51_v49, 0 }
  0x12   :  { %v90_v58 = vsel %vm58_vm12, %v42_v44, %v74_v53  ;;  %v91_v59 = vsel %vm59_vm13, %v43_v47, %v75_v55  ;;  %v98_v60 = vsel %vm66_vm14, %v50_v48, %v82_v56 }
  0x13   :  { %461 = vmatpush3.bf16.msra.mxu0 %v504_v14  ;;  %496 = vmatpush3.bf16.msra.mxu1 %v504_v14  ;;  %v99_v61 = vsel %vm67_vm15, %v51_v49, %v83_v57  ;;  %v422_v62 = vcombine.low %v90_v58, %v91_v59 }
  0x14   :  { %462 = vmatprep.subr.bf16.mxu0 %v505_v19  ;;  %489 = vmatprep.subr.bf16.mxu1 %v505_v19  ;;  %v426_v63 = vcombine.low %v98_v60, %v99_v61 }
  0x17   :  { %463 = vmatpush3.bf16.msra.mxu0 %v505_v19  ;;  %497 = vmatpush3.bf16.msra.mxu1 %v505_v19 }
  0x18   :  { %464 = vmatprep.subr.bf16.mxu0 %v506_v22  ;;  %490 = vmatprep.subr.bf16.mxu1 %v506_v22 }
  0x1b   :  { %465 = vmatpush3.bf16.msra.mxu0 %v506_v22  ;;  %498 = vmatpush3.bf16.msra.mxu1 %v506_v22 }
  0x1c   :  { %466 = vmatprep.subr.bf16.mxu0 %v507_v30  ;;  %491 = vmatprep.subr.bf16.mxu1 %v507_v30 }
  0x1f   :  { %467 = vmatpush3.bf16.msra.mxu0 %v507_v30  ;;  %499 = vmatpush3.bf16.msra.mxu1 %v507_v30 }
  0x22   :  { %469 = vmatmul.mubr.bf16.vlgmr.msra.gmra.mrb[0].mxu0 %v420_v50  ;;  %477 = vmatmul.mubr.bf16.vlgmr.msra.gmra.mrb[0].mxu1 %v424_v51 }
  0x23   :  { %472 = vmatprep.mubr.bf16.mxu0 %v421_v52  ;;  %480 = vmatprep.mubr.bf16.mxu1 %v425_v54 }
  0x2a   :  { %473 = vmatmul.mubr.bf16.gmra.mrb[4].mxu0 %v422_v62  ;;  %481 = vmatmul.mubr.bf16.gmra.mrb[4].mxu1 %v426_v63 }
  0xf5   :  { %v470_v1 = vpop.f32.mrb[0].mxu0  ;;  %v478_v2 = vpop.f32.mrb[0].mxu1 }
  0xf6   :  { %v385_v3 = vadd.f32 %v470_v1, %v435_v0  ;;  %v393_v4 = vadd.f32 %v478_v2, %v435_v0  ;;  %v262_v5 = vpop.f32.mrb[1].mxu0  ;;  %v294_v6 = vpop.f32.mrb[1].mxu1 }
  0xf7   :  { %v383_v7 = vadd.f32 %v435_v0, %v262_v5  ;;  %v391_v8 = vadd.f32 %v435_v0, %v294_v6  ;;  %v471_v9 = vpop.f32.mrb[2].mxu0  ;;  %v479_v10 = vpop.f32.mrb[2].mxu1 }
  0xf8   :  { %401 = vst [vmem:[%s658_s3 + $0x10] sm:$0xff] %v385_v3  ;;  %409 = vst [vmem:[%s658_s3 + $0x50] sm:$0xff] %v393_v4  ;;  %v386_v11 = vadd.f32 %v471_v9, %v435_v0  ;;  %v394_v12 = vadd.f32 %v479_v10, %v435_v0  ;;  %v265_v13 = vpop.f32.mrb[3].mxu0  ;;  %v297_v14 = vpop.f32.mrb[3].mxu1 }
  0xf9   :  { %399 = vst [vmem:[%s658_s3] sm:$0xff] %v383_v7  ;;  %407 = vst [vmem:[%s658_s3 + $0x40] sm:$0xff] %v391_v8  ;;  %v384_v15 = vadd.f32 %v435_v0, %v265_v13  ;;  %v392_v16 = vadd.f32 %v435_v0, %v297_v14 }
  0xfa   :  { %402 = vst [vmem:[%s658_s3 + $0x18] sm:$0xff] %v386_v11  ;;  %410 = vst [vmem:[%s658_s3 + $0x58] sm:$0xff] %v394_v12 }
  0xfb   :  { %400 = vst [vmem:[%s658_s3 + $0x8] sm:$0xff] %v384_v15  ;;  %408 = vst [vmem:[%s658_s3 + $0x48] sm:$0xff] %v392_v16 }
  0xfd   :  { %v474_v17 = vpop.f32.mrb[4].mxu0  ;;  %v482_v18 = vpop.f32.mrb[4].mxu1 }
  0xfe   :  { %v389_v19 = vadd.f32 %v474_v17, %v435_v0  ;;  %v397_v20 = vadd.f32 %v482_v18, %v435_v0  ;;  %v278_v21 = vpop.f32.mrb[5].mxu0  ;;  %v310_v22 = vpop.f32.mrb[5].mxu1 }
  0xff   :  { %v387_v23 = vadd.f32 %v435_v0, %v278_v21  ;;  %v395_v24 = vadd.f32 %v435_v0, %v310_v22  ;;  %v475_v25 = vpop.f32.mrb[6].mxu0  ;;  %v483_v26 = vpop.f32.mrb[6].mxu1 }
 0x100   :  { %405 = vst [vmem:[%s658_s3 + $0x30] sm:$0xff] %v389_v19  ;;  %413 = vst [vmem:[%s658_s3 + $0x70] sm:$0xff] %v397_v20  ;;  %v390_v27 = vadd.f32 %v475_v25, %v435_v0  ;;  %v398_v28 = vadd.f32 %v483_v26, %v435_v0  ;;  %v281_v29 = vpop.f32.mrb[7].mxu0  ;;  %v313_v30 = vpop.f32.mrb[7].mxu1 }
 0x101   :  { %403 = vst [vmem:[%s658_s3 + $0x20] sm:$0xff] %v387_v23  ;;  %411 = vst [vmem:[%s658_s3 + $0x60] sm:$0xff] %v395_v24  ;;  %v388_v31 = vadd.f32 %v435_v0, %v281_v29  ;;  %v396_v32 = vadd.f32 %v435_v0, %v313_v30 }
 0x102   :  { %406 = vst [vmem:[%s658_s3 + $0x38] sm:$0xff] %v390_v27  ;;  %414 = vst [vmem:[%s658_s3 + $0x78] sm:$0xff] %v398_v28 }
 0x103   :  { %404 = vst [vmem:[%s658_s3 + $0x28] sm:$0xff] %v388_v31  ;;  %412 = vst [vmem:[%s658_s3 + $0x68] sm:$0xff] %v396_v32 }

// kernel: _lambda_.27
= control target key start
LH: loop header
LB: loop body
LE: loop exit
PB: predicated region body
PF: predicated region fallthrough
CT: control target
= control target key end

     0   :  { %s451_s1 = inlined_call_operand.vmem [shape: bf16[256,128], index: 1, kind: input, shape index: {}]   ;;  %s452_s0 = inlined_call_operand.vmem [shape: bf16[32,256], index: 0, kind: input, shape index: {}]   ;;  %s453_s2 = inlined_call_operand.vmem [shape: f32[1,128], index: 2, kind: input, shape index: {}]   ;;  %s454_s3 = inlined_call_operand.vmem [shape: f32[32,128], index: 3, kind: output, shape index: {}]  }
   0x1   :  { %v340_v0 = vld [vmem:[%s451_s1 + $0x40] sm:$0xff]   ;;  %v342_v2 = vld [vmem:[%s451_s1 + $0x48] sm:$0xff]   ;;  %v344_v4 = vld [vmem:[%s451_s1 + $0x50] sm:$0xff]  }
   0x2   :  { %v341_v1 = vld [vmem:[%s451_s1] sm:$0xff]   ;;  %296 = vmatprep.subr.bf16.mxu0 %v340_v0  ;;  %324 = vmatprep.subr.bf16.mxu1 %v340_v0  ;;  %v343_v3 = vld [vmem:[%s451_s1 + $0x8] sm:$0xff]   ;;  %v345_v5 = vld [vmem:[%s451_s1 + $0x10] sm:$0xff]  }
   0x3   :  { %297 = vmatpush3.bf16.msra.mxu0 %v341_v1  ;;  %332 = vmatpush3.bf16.msra.mxu1 %v341_v1  ;;  %v346_v6 = vld [vmem:[%s451_s1 + $0x58] sm:$0xff]   ;;  %v348_v8 = vld [vmem:[%s451_s1 + $0x60] sm:$0xff]   ;;  %v350_v10 = vld [vmem:[%s451_s1 + $0x68] sm:$0xff]  }
   0x4   :  { %298 = vmatprep.subr.bf16.mxu0 %v342_v2  ;;  %325 = vmatprep.subr.bf16.mxu1 %v342_v2  ;;  %v347_v7 = vld [vmem:[%s451_s1 + $0x18] sm:$0xff]   ;;  %v349_v9 = vld [vmem:[%s451_s1 + $0x20] sm:$0xff]   ;;  %v25_v12 = vld [vmem:[%s452_s0 + $0x8] sm:$0xff] }
   0x5   :  { %v24_v11 = vld [vmem:[%s452_s0] sm:$0xff]  ;;  %v26_v13 = vld [vmem:[%s452_s0 + $0x10] sm:$0xff]  ;;  %vm29_vm1 = vcmp.gt.bf16.partialorder %v25_v12, 0  ;;  %v33_v15 = vmul.bf16 1045249613, %v25_v12  ;;  %v27_v16 = vld [vmem:[%s452_s0 + $0x18] sm:$0xff] }
   0x6   :  { %vm28_vm0 = vcmp.gt.bf16.partialorder %v24_v11, 0  ;;  %v32_v14 = vmul.bf16 1045249613, %v24_v11  ;;  %vm30_vm2 = vcmp.gt.bf16.partialorder %v26_v13, 0  ;;  %v34_v17 = vmul.bf16 1045249613, %v26_v13 }
   0x7   :  { %299 = vmatpush3.bf16.msra.mxu0 %v343_v3  ;;  %333 = vmatpush3.bf16.msra.mxu1 %v343_v3  ;;  %v351_v18 = vld [vmem:[%s451_s1 + $0x28] sm:$0xff]   ;;  %v37_v20 = vsel %vm29_vm1, %v25_v12, %v33_v15  ;;  %vm31_vm3 = vcmp.gt.bf16.partialorder %v27_v16, 0  ;;  %v35_v21 = vmul.bf16 1045249613, %v27_v16  ;;  %v352_v22 = vld [vmem:[%s451_s1 + $0x70] sm:$0xff]   ;;  %v354_v28 = vld [vmem:[%s451_s1 + $0x78] sm:$0xff]  }
   0x8   :  { %300 = vmatprep.subr.bf16.mxu0 %v344_v4  ;;  %326 = vmatprep.subr.bf16.mxu1 %v344_v4  ;;  %v36_v19 = vsel %vm28_vm0, %v24_v11, %v32_v14  ;;  %v38_v24 = vsel %vm30_vm2, %v26_v13, %v34_v17  ;;  %v353_v27 = vld [vmem:[%s451_s1 + $0x30] sm:$0xff]   ;;  %v355_v29 = vld [vmem:[%s451_s1 + $0x38] sm:$0xff]   ;;  %v295_v35 = vld [vmem:[%s453_s2] ss:$0 sm:$0xff] }
   0x9   :  { %v276_v23 = vcombine.high %v36_v19, %v37_v20  ;;  %v39_v25 = vsel %vm31_vm3, %v27_v16, %v35_v21  ;;  %v275_v30 = vcombine.low %v36_v19, %v37_v20 }
   0xa   :  { %v278_v26 = vcombine.high %v38_v24, %v39_v25  ;;  %v277_v31 = vcombine.low %v38_v24, %v39_v25 }
   0xb   :  { %301 = vmatpush3.bf16.msra.mxu0 %v345_v5  ;;  %334 = vmatpush3.bf16.msra.mxu1 %v345_v5 }
   0xc   :  { %302 = vmatprep.subr.bf16.mxu0 %v346_v6  ;;  %327 = vmatprep.subr.bf16.mxu1 %v346_v6 }
   0xd   :  { %224 = vmatprep.mubr.bf16.mxu0 %v276_v23  ;;  %232 = vmatprep.mubr.bf16.mxu1 %v278_v26 }
   0xf   :  { %303 = vmatpush3.bf16.msra.mxu0 %v347_v7  ;;  %335 = vmatpush3.bf16.msra.mxu1 %v347_v7 }
  0x10   :  { %304 = vmatprep.subr.bf16.mxu0 %v348_v8  ;;  %328 = vmatprep.subr.bf16.mxu1 %v348_v8 }
  0x13   :  { %305 = vmatpush3.bf16.msra.mxu0 %v349_v9  ;;  %336 = vmatpush3.bf16.msra.mxu1 %v349_v9 }
  0x14   :  { %306 = vmatprep.subr.bf16.mxu0 %v350_v10  ;;  %329 = vmatprep.subr.bf16.mxu1 %v350_v10 }
  0x17   :  { %307 = vmatpush3.bf16.msra.mxu0 %v351_v18  ;;  %337 = vmatpush3.bf16.msra.mxu1 %v351_v18 }
  0x18   :  { %308 = vmatprep.subr.bf16.mxu0 %v352_v22  ;;  %330 = vmatprep.subr.bf16.mxu1 %v352_v22 }
  0x1b   :  { %309 = vmatpush3.bf16.msra.mxu0 %v353_v27  ;;  %338 = vmatpush3.bf16.msra.mxu1 %v353_v27 }
  0x1c   :  { %310 = vmatprep.subr.bf16.mxu0 %v354_v28  ;;  %331 = vmatprep.subr.bf16.mxu1 %v354_v28 }
  0x1f   :  { %311 = vmatpush3.bf16.msra.mxu0 %v355_v29  ;;  %339 = vmatpush3.bf16.msra.mxu1 %v355_v29 }
  0x22   :  { %225 = vmatmul.mubr.bf16.vlgmr.msra.gmra.mrb[0].mxu0 %v275_v30  ;;  %233 = vmatmul.mubr.bf16.vlgmr.msra.gmra.mrb[0].mxu1 %v277_v31 }
  0xf5   :  { %v312_v32 = vpop.f32.mrb[0].mxu0  ;;  %v318_v33 = vpop.f32.mrb[0].mxu1 }
  0xf6   :  { %v313_v34 = vpop.f32.mrb[1].mxu0  ;;  %v319_v36 = vpop.f32.mrb[1].mxu1 }
  0xf7   :  { %v314_v37 = vadd.f32 %v313_v34, %v312_v32  ;;  %v320_v38 = vadd.f32 %v319_v36, %v318_v33  ;;  %v315_v39 = vpop.f32.mrb[2].mxu0  ;;  %v321_v40 = vpop.f32.mrb[2].mxu1 }
  0xf8   :  { %v316_v41 = vpop.f32.mrb[3].mxu0  ;;  %v322_v42 = vpop.f32.mrb[3].mxu1 }
  0xf9   :  { %v263_v43 = vadd.f32 %v314_v37, %v295_v35  ;;  %v265_v44 = vadd.f32 %v320_v38, %v295_v35  ;;  %v317_v45 = vadd.f32 %v316_v41, %v315_v39  ;;  %v323_v46 = vadd.f32 %v322_v42, %v321_v40 }
  0xfb   :  { %267 = vst [vmem:[%s454_s3] sm:$0xff] %v263_v43  ;;  %269 = vst [vmem:[%s454_s3 + $0x10] sm:$0xff] %v265_v44  ;;  %v264_v47 = vadd.f32 %v317_v45, %v295_v35  ;;  %v266_v48 = vadd.f32 %v323_v46, %v295_v35 }
  0xfd   :  { %268 = vst [vmem:[%s454_s3 + $0x8] sm:$0xff] %v264_v47  ;;  %270 = vst [vmem:[%s454_s3 + $0x18] sm:$0xff] %v266_v48 }

// kernel: _lambda_.28
= control target key start
LH: loop header
LB: loop body
LE: loop exit
PB: predicated region body
PF: predicated region fallthrough
CT: control target
= control target key end

     0   :  { %s672_s1 = inlined_call_operand.vmem [shape: bf16[512,128], index: 1, kind: input, shape index: {}]   ;;  %s673_s0 = inlined_call_operand.vmem [shape: bf16[16,512], index: 0, kind: input, shape index: {}]   ;;  %s674_s2 = inlined_call_operand.vmem [shape: f32[1,128], index: 2, kind: input, shape index: {}]   ;;  %s675_s3 = inlined_call_operand.vmem [shape: f32[16,128], index: 3, kind: output, shape index: {}]  }
   0x1   :  { %v503_v0 = vld [vmem:[%s672_s1 + $0x40] sm:$0xff]   ;;  %v507_v4 = vld [vmem:[%s672_s1 + $0x48] sm:$0xff]   ;;  %v511_v8 = vld [vmem:[%s672_s1 + $0x50] sm:$0xff]  }
   0x2   :  { %v504_v1 = vld [vmem:[%s672_s1 + $0xc0] sm:$0xff]   ;;  %459 = vmatprep.subr.bf16.mxu0 %v503_v0  ;;  %v508_v5 = vld [vmem:[%s672_s1 + $0xc8] sm:$0xff]   ;;  %v512_v9 = vld [vmem:[%s672_s1 + $0xd0] sm:$0xff]  }
   0x3   :  { %v505_v2 = vld [vmem:[%s672_s1] sm:$0xff]   ;;  %481 = vmatprep.subr.bf16.mxu1 %v504_v1  ;;  %v509_v6 = vld [vmem:[%s672_s1 + $0x8] sm:$0xff]   ;;  %v513_v10 = vld [vmem:[%s672_s1 + $0x10] sm:$0xff]  }
   0x4   :  { %v506_v3 = vld [vmem:[%s672_s1 + $0x80] sm:$0xff]   ;;  %460 = vmatpush3.bf16.msra.mxu0 %v505_v2  ;;  %v510_v7 = vld [vmem:[%s672_s1 + $0x88] sm:$0xff]   ;;  %v514_v11 = vld [vmem:[%s672_s1 + $0x90] sm:$0xff]  }
   0x5   :  { %482 = vmatpush3.bf16.msra.mxu1 %v506_v3  ;;  %461 = vmatprep.subr.bf16.mxu0 %v507_v4  ;;  %v515_v12 = vld [vmem:[%s672_s1 + $0x58] sm:$0xff]   ;;  %v519_v16 = vld [vmem:[%s672_s1 + $0x60] sm:$0xff]   ;;  %v523_v20 = vld [vmem:[%s672_s1 + $0x68] sm:$0xff]  }
   0x6   :  { %483 = vmatprep.subr.bf16.mxu1 %v508_v5  ;;  %v516_v13 = vld [vmem:[%s672_s1 + $0xd8] sm:$0xff]   ;;  %v520_v17 = vld [vmem:[%s672_s1 + $0xe0] sm:$0xff]   ;;  %v524_v21 = vld [vmem:[%s672_s1 + $0xe8] sm:$0xff]  }
   0x7   :  { %v517_v14 = vld [vmem:[%s672_s1 + $0x18] sm:$0xff]   ;;  %v521_v18 = vld [vmem:[%s672_s1 + $0x20] sm:$0xff]   ;;  %v525_v22 = vld [vmem:[%s672_s1 + $0x28] sm:$0xff]  }
   0x8   :  { %462 = vmatpush3.bf16.msra.mxu0 %v509_v6  ;;  %v518_v15 = vld [vmem:[%s672_s1 + $0x98] sm:$0xff]   ;;  %v522_v19 = vld [vmem:[%s672_s1 + $0xa0] sm:$0xff]   ;;  %v526_v23 = vld [vmem:[%s672_s1 + $0xa8] sm:$0xff]  }
   0x9   :  { %484 = vmatpush3.bf16.msra.mxu1 %v510_v7  ;;  %463 = vmatprep.subr.bf16.mxu0 %v511_v8  ;;  %v527_v24 = vld [vmem:[%s672_s1 + $0x70] sm:$0xff]   ;;  %v531_v28 = vld [vmem:[%s672_s1 + $0x78] sm:$0xff]   ;;  %v22_v32 = vld [vmem:[%s673_s0] sm:$0xff] }
   0xa   :  { %485 = vmatprep.subr.bf16.mxu1 %v512_v9  ;;  %v528_v25 = vld [vmem:[%s672_s1 + $0xf0] sm:$0xff]   ;;  %v532_v29 = vld [vmem:[%s672_s1 + $0xf8] sm:$0xff]   ;;  %v23_v34 = vld [vmem:[%s673_s0 + $0x8] sm:$0xff]  ;;  %vm26_vm0 = vcmp.gt.bf16.partialorder %v22_v32, 0  ;;  %v30_v35 = vmul.bf16 1045249613, %v22_v32 }
   0xb   :  { %v529_v26 = vld [vmem:[%s672_s1 + $0x30] sm:$0xff]   ;;  %v533_v30 = vld [vmem:[%s672_s1 + $0x38] sm:$0xff]   ;;  %vm27_vm2 = vcmp.gt.bf16.partialorder %v23_v34, 0  ;;  %v31_v38 = vmul.bf16 1045249613, %v23_v34 }
   0xc   :  { %464 = vmatpush3.bf16.msra.mxu0 %v513_v10  ;;  %v530_v27 = vld [vmem:[%s672_s1 + $0xb0] sm:$0xff]   ;;  %v534_v31 = vld [vmem:[%s672_s1 + $0xb8] sm:$0xff]   ;;  %v34_v39 = vsel %vm26_vm0, %v22_v32, %v30_v35  ;;  %v458_v58 = vld [vmem:[%s674_s2] ss:$0 sm:$0xff] }
   0xd   :  { %486 = vmatpush3.bf16.msra.mxu1 %v514_v11  ;;  %465 = vmatprep.subr.bf16.mxu0 %v515_v12  ;;  %v24_v33 = vld [vmem:[%s673_s0 + $0x10] sm:$0xff]  ;;  %v25_v37 = vld [vmem:[%s673_s0 + $0x18] sm:$0xff]  ;;  %v35_v44 = vsel %vm27_vm2, %v23_v34, %v31_v38 }
   0xe   :  { %487 = vmatprep.subr.bf16.mxu1 %v516_v13  ;;  %vm28_vm1 = vcmp.gt.bf16.partialorder %v24_v33, 0  ;;  %v32_v36 = vmul.bf16 1045249613, %v24_v33  ;;  %vm29_vm3 = vcmp.gt.bf16.partialorder %v25_v37, 0  ;;  %v33_v41 = vmul.bf16 1045249613, %v25_v37 }
  0x10   :  { %466 = vmatpush3.bf16.msra.mxu0 %v517_v14  ;;  %v36_v40 = vsel %vm28_vm1, %v24_v33, %v32_v36  ;;  %v37_v45 = vsel %vm29_vm3, %v25_v37, %v33_v41 }
  0x11   :  { %488 = vmatpush3.bf16.msra.mxu1 %v518_v15  ;;  %467 = vmatprep.subr.bf16.mxu0 %v519_v16  ;;  %v422_v42 = vcombine.low %v34_v39, %v36_v40  ;;  %v423_v43 = vcombine.high %v34_v39, %v36_v40  ;;  %v424_v46 = vcombine.low %v35_v44, %v37_v45 }
  0x12   :  { %489 = vmatprep.subr.bf16.mxu1 %v520_v17  ;;  %v425_v47 = vcombine.high %v35_v44, %v37_v45 }
  0x13   :  { %348 = vmatprep.mubr.bf16.mxu0 %v423_v43 }
  0x14   :  { %468 = vmatpush3.bf16.msra.mxu0 %v521_v18  ;;  %389 = vmatprep.mubr.bf16.mxu1 %v425_v47 }
  0x15   :  { %490 = vmatpush3.bf16.msra.mxu1 %v522_v19  ;;  %469 = vmatprep.subr.bf16.mxu0 %v523_v20 }
  0x16   :  { %491 = vmatprep.subr.bf16.mxu1 %v524_v21 }
  0x18   :  { %470 = vmatpush3.bf16.msra.mxu0 %v525_v22 }
  0x19   :  { %492 = vmatpush3.bf16.msra.mxu1 %v526_v23  ;;  %471 = vmatprep.subr.bf16.mxu0 %v527_v24 }
  0x1a   :  { %493 = vmatprep.subr.bf16.mxu1 %v528_v25 }
  0x1c   :  { %472 = vmatpush3.bf16.msra.mxu0 %v529_v26 }
  0x1d   :  { %494 = vmatpush3.bf16.msra.mxu1 %v530_v27  ;;  %473 = vmatprep.subr.bf16.mxu0 %v531_v28 }
  0x1e   :  { %495 = vmatprep.subr.bf16.mxu1 %v532_v29 }
  0x20   :  { %474 = vmatpush3.bf16.msra.mxu0 %v533_v30 }
  0x21   :  { %496 = vmatpush3.bf16.msra.mxu1 %v534_v31 }
  0x23   :  { %349 = vmatmul.mubr.bf16.vlgmr.msra.gmra.mrb[0].mxu0 %v422_v42 }
  0x24   :  { %390 = vmatmul.mubr.bf16.vlgmr.msra.gmra.mrb[0].mxu1 %v424_v46 }
  0xf6   :  { %v475_v48 = vpop.f32.mrb[0].mxu0 }
  0xf7   :  { %v476_v49 = vpop.f32.mrb[1].mxu0  ;;  %v497_v50 = vpop.f32.mrb[0].mxu1 }
  0xf8   :  { %v477_v51 = vadd.f32 %v476_v49, %v475_v48  ;;  %v478_v52 = vpop.f32.mrb[2].mxu0  ;;  %v498_v53 = vpop.f32.mrb[1].mxu1 }
  0xf9   :  { %v479_v54 = vpop.f32.mrb[3].mxu0  ;;  %v499_v55 = vadd.f32 %v498_v53, %v497_v50  ;;  %v500_v56 = vpop.f32.mrb[2].mxu1 }
  0xfa   :  { %v480_v57 = vadd.f32 %v479_v54, %v478_v52  ;;  %v501_v59 = vpop.f32.mrb[3].mxu1 }
  0xfb   :  { %v392_v60 = vadd.f32 %v499_v55, %v477_v51  ;;  %v502_v61 = vadd.f32 %v501_v59, %v500_v56 }
  0xfd   :  { %v414_v62 = vadd.f32 %v458_v58, %v392_v60  ;;  %v395_v63 = vadd.f32 %v502_v61, %v480_v57 }
  0xff   :  { %416 = vst [vmem:[%s675_s3] sm:$0xff] %v414_v62  ;;  %v415_v0 = vadd.f32 %v458_v58, %v395_v63 }
 0x101   :  { %417 = vst [vmem:[%s675_s3 + $0x8] sm:$0xff] %v415_v0 }

// kernel: _lambda_.29
= control target key start
LH: loop header
LB: loop body
LE: loop exit
PB: predicated region body
PF: predicated region fallthrough
CT: control target
= control target key end

     0   :  { %s1028_s12 = smov 0   ;;  %s1030_s13 = smov 0   ;;  %s1144_s0 = inlined_call_operand.vmem [shape: bf16[16,1024], index: 0, kind: input, shape index: {}]   ;;  %s1145_s1 = inlined_call_operand.vmem [shape: bf16[1024,128], index: 1, kind: input, shape index: {}]   ;;  %s1146_s2 = inlined_call_operand.vmem [shape: f32[1,128], index: 2, kind: input, shape index: {}]   ;;  %s1147_s3 = inlined_call_operand.vmem [shape: f32[16,128], index: 3, kind: output, shape index: {}]  }
   0x1   :  { %s1032_s14 = smov 0   ;;  %s1034_s15 = smov 0  }
   0x2   :  { %s1036_s16 = smov 0  }
   0x3 LB: > { %s25_s17 = sadd.s32 1, %s1001_s15  ;;  %p48_p1 = scmp.ne.s32.totalorder %s993_s13, %s989_s12  ;;  %s1005_s16 = sphi %s1036_s16, %s13_s16   ;;  %s1001_s15 = sphi %s1034_s15, %s1151_s15   ;;  %s997_s14 = sphi %s1032_s14, %s1150_s14   ;;  %s993_s13 = sphi %s1030_s13, %s1149_s13   ;;  %s989_s12 = sphi %s1028_s12, %s1148_s12  }
   0x4   : > { %p26_p0 = scmp.ge.s32.totalorder %s25_s17, 2  ;;  %p49_p2 = scmp.eq.s32.totalorder %s1005_s16, 0 }
   0x5   : > { %s41_s19 = sadd.s32 1, %s993_s13  ;;  %p798_p5 = scmp.ge.s32.totalorder %s1005_s16, 2 }
   0x6   : > { %s1153_s17 = smov (%p26_p0, %s25_s17), 0  ;;  %p50_p3 = por %p49_p2, %p48_p1 }
   0x7   : > { %s37_s18 = ssub.s32 %s1001_s15, %s1153_s17  ;;  %162 = sbr.rel (%p798_p5) target bundleno = 21 (0x15), region = 20 }
   0x8   : > { %p39_p4 = scmp.eq.s32.totalorder %s37_s18, 0 }
   0xa   : > { %s1063_s20 = scalar_select %p39_p4, %s993_s13, %s41_s19  }
   0xe   : > { %165 = sbr.rel (!%p50_p3) target bundleno = 21 (0x15), region = 24  ;;  %s167_s21 = sand.u32 (%p50_p3), 1, %s993_s13  }
   0xf   : > { %s849_s22 = sshll.u32 (%p50_p3), %s1001_s15, 4  ;;  %s799_s23 = sshll.u32 (%p50_p3), %s167_s21, 5 }
  0x10   : > { %s175_s26 = scalar_lea.vmem (%p50_p3), %s1144_s0, %s849_s22  ;;  %s169_s27 = scalar_lea.vmem (%p50_p3), [#allocation3], %s799_s23 }
  0x11   : > { %v188_v0 = vld [vmem:[%s175_s26] sm:$0xff] (%p50_p3)  ;;  %v190_v1 = vld [vmem:[%s175_s26 + $0x8] sm:$0xff] (%p50_p3) }
  0x12   : > { %v192_v2 = vld [vmem:[%s175_s26 + $0x20] sm:$0xff] (%p50_p3)  ;;  %189 = vst [vmem:[%s169_s27] sm:$0xff] (%p50_p3), %v188_v0  ;;  %191 = vst [vmem:[%s169_s27 + $0x8] sm:$0xff] (%p50_p3), %v190_v1  ;;  %v194_v3 = vld [vmem:[%s175_s26 + $0x28] sm:$0xff] (%p50_p3) }
  0x13   : > { %193 = vst [vmem:[%s169_s27 + $0x10] sm:$0xff] (%p50_p3), %v192_v2  ;;  %195 = vst [vmem:[%s169_s27 + $0x18] sm:$0xff] (%p50_p3), %v194_v3 }
  0x15 PF: > { %p802_p6 = scmp.ge.s32.totalorder %s1005_s16, 1  ;;  %p212_p7 = scmp.lt.s32.totalorder %s1005_s16, 3 }
  0x17   : > { %p213_p8 = pnand %p802_p6, %p212_p7 }
  0x18   : > { %s219_s28 = sand.u32 (!%p213_p8), 1, %s989_s12   ;;  %s804_s29 = sshll.u32 (!%p213_p8), %s997_s14, 6 }
  0x19   : > { %216 = sbr.rel (%p213_p8) target bundleno = 306 (0x132), region = 51  ;;  %s803_s30 = sshll.u32 (!%p213_p8), %s219_s28, 5 }
  0x1a   : > { %p259_p9 = scmp.lt.s32.totalorder (!%p213_p8), %s804_s29, 127  ;;  %s1080_s8 = scalar_lea.vmem (!%p213_p8), [#allocation3], %s803_s30 }
  0x1b   : > { %p806_p10 = scmp.ne.s32.totalorder (!%p213_p8), %s997_s14, 0 }
  0x20   : > { %s1155_s29 = smov (!%p259_p9, %s804_s29), 127  ;;  %284 = sbr.rel (%p806_p10) target bundleno = 39 (0x27), region = 59 }
  0x21   : > { %s805_s4 = sshll.u32 %s1155_s29, 2  ;;  %v1007_v4 = vmov (!%p806_p10), 0.0  }
  0x22   : > { %s1078_s7 = scalar_lea.vmem %s1145_s1, %s805_s4  ;;  %285 = vst [vmem:[#allocation2] sm:$0xff] (!%p806_p10), %v1007_v4  ;;  %286 = vst [vmem:[#allocation2 + $0x8] sm:$0xff] (!%p806_p10), %v1007_v4 }
  0x27 PF: > { %v935_v5 = vld [vmem:[%s1078_s7 + $0x40] sm:$0xff]   ;;  %v939_v9 = vld [vmem:[%s1078_s7 + $0x48] sm:$0xff]   ;;  %v943_v13 = vld [vmem:[%s1078_s7 + $0x50] sm:$0xff]   ;;  %p843_p11 = scmp.ne.s32.totalorder %s997_s14, 1 }
  0x28   : > { %v936_v6 = vld [vmem:[%s1078_s7 + $0xc0] sm:$0xff]   ;;  %850 = vmatprep.subr.bf16.mxu0 %v935_v5  ;;  %v940_v10 = vld [vmem:[%s1078_s7 + $0xc8] sm:$0xff]   ;;  %v944_v14 = vld [vmem:[%s1078_s7 + $0xd0] sm:$0xff]  }
  0x29   : > { %v937_v7 = vld [vmem:[%s1078_s7] sm:$0xff]   ;;  %872 = vmatprep.subr.bf16.mxu1 %v936_v6  ;;  %v941_v11 = vld [vmem:[%s1078_s7 + $0x8] sm:$0xff]   ;;  %v945_v15 = vld [vmem:[%s1078_s7 + $0x10] sm:$0xff]  }
  0x2a   : > { %v938_v8 = vld [vmem:[%s1078_s7 + $0x80] sm:$0xff]   ;;  %851 = vmatpush3.bf16.msra.mxu0 %v937_v7  ;;  %v942_v12 = vld [vmem:[%s1078_s7 + $0x88] sm:$0xff]   ;;  %v946_v16 = vld [vmem:[%s1078_s7 + $0x90] sm:$0xff]  }
  0x2b   : > { %873 = vmatpush3.bf16.msra.mxu1 %v938_v8  ;;  %852 = vmatprep.subr.bf16.mxu0 %v939_v9  ;;  %v947_v17 = vld [vmem:[%s1078_s7 + $0x58] sm:$0xff]   ;;  %v951_v21 = vld [vmem:[%s1078_s7 + $0x60] sm:$0xff]   ;;  %v955_v25 = vld [vmem:[%s1078_s7 + $0x68] sm:$0xff]  }
  0x2c   : > { %874 = vmatprep.subr.bf16.mxu1 %v940_v10  ;;  %v948_v18 = vld [vmem:[%s1078_s7 + $0xd8] sm:$0xff]   ;;  %v952_v22 = vld [vmem:[%s1078_s7 + $0xe0] sm:$0xff]   ;;  %v956_v26 = vld [vmem:[%s1078_s7 + $0xe8] sm:$0xff]  }
  0x2d   : > { %v949_v19 = vld [vmem:[%s1078_s7 + $0x18] sm:$0xff]   ;;  %v953_v23 = vld [vmem:[%s1078_s7 + $0x20] sm:$0xff]   ;;  %v957_v27 = vld [vmem:[%s1078_s7 + $0x28] sm:$0xff]  }
  0x2e   : > { %853 = vmatpush3.bf16.msra.mxu0 %v941_v11  ;;  %v950_v20 = vld [vmem:[%s1078_s7 + $0x98] sm:$0xff]   ;;  %v954_v24 = vld [vmem:[%s1078_s7 + $0xa0] sm:$0xff]   ;;  %v958_v28 = vld [vmem:[%s1078_s7 + $0xa8] sm:$0xff]  }
  0x2f   : > { %875 = vmatpush3.bf16.msra.mxu1 %v942_v12  ;;  %854 = vmatprep.subr.bf16.mxu0 %v943_v13  ;;  %v959_v29 = vld [vmem:[%s1078_s7 + $0x70] sm:$0xff]   ;;  %v963_v33 = vld [vmem:[%s1078_s7 + $0x78] sm:$0xff]   ;;  %v289_v38 = vld [vmem:[%s1080_s8 + $0x10] sm:$0xff] }
  0x30   : > { %876 = vmatprep.subr.bf16.mxu1 %v944_v14  ;;  %v960_v30 = vld [vmem:[%s1078_s7 + $0xf0] sm:$0xff]   ;;  %v964_v34 = vld [vmem:[%s1078_s7 + $0xf8] sm:$0xff]   ;;  %vm293_vm1 = vcmp.gt.bf16.partialorder %v289_v38, 0  ;;  %v297_v41 = vmul.bf16 1045249613, %v289_v38  ;;  %v290_v42 = vld [vmem:[%s1080_s8 + $0x18] sm:$0xff] }
  0x31   : > { %v961_v31 = vld [vmem:[%s1078_s7 + $0x30] sm:$0xff]   ;;  %v965_v35 = vld [vmem:[%s1078_s7 + $0x38] sm:$0xff]   ;;  %vm294_vm3 = vcmp.gt.bf16.partialorder %v290_v42, 0  ;;  %v298_v46 = vmul.bf16 1045249613, %v290_v42  ;;  %v303_v63 = vld [vmem:[#allocation2] sm:$0xff] }
  0x32   : > { %855 = vmatpush3.bf16.msra.mxu0 %v945_v15  ;;  %v962_v32 = vld [vmem:[%s1078_s7 + $0xb0] sm:$0xff]   ;;  %v966_v36 = vld [vmem:[%s1078_s7 + $0xb8] sm:$0xff]   ;;  %v301_v45 = vsel %vm293_vm1, %v289_v38, %v297_v41  ;;  %v304_v3 = vld [vmem:[#allocation2 + $0x8] sm:$0xff] }
  0x33   : > { %877 = vmatpush3.bf16.msra.mxu1 %v946_v16  ;;  %856 = vmatprep.subr.bf16.mxu0 %v947_v17  ;;  %v287_v37 = vld [vmem:[%s1080_s8] sm:$0xff]  ;;  %v288_v39 = vld [vmem:[%s1080_s8 + $0x8] sm:$0xff]  ;;  %v302_v50 = vsel %vm294_vm3, %v290_v42, %v298_v46  ;;  %v844_v8 = vld [vmem:[%s1146_s2] ss:$0 sm:$0xff] (!%p843_p11) }
  0x34   : > { %878 = vmatprep.subr.bf16.mxu1 %v948_v18  ;;  %vm291_vm0 = vcmp.gt.bf16.partialorder %v287_v37, 0  ;;  %v295_v40 = vmul.bf16 1045249613, %v287_v37  ;;  %vm292_vm2 = vcmp.gt.bf16.partialorder %v288_v39, 0  ;;  %v296_v43 = vmul.bf16 1045249613, %v288_v39 }
  0x36   : > { %857 = vmatpush3.bf16.msra.mxu0 %v949_v19  ;;  %v299_v44 = vsel %vm291_vm0, %v287_v37, %v295_v40  ;;  %v300_v49 = vsel %vm292_vm2, %v288_v39, %v296_v43 }
  0x37   : > { %879 = vmatpush3.bf16.msra.mxu1 %v950_v20  ;;  %858 = vmatprep.subr.bf16.mxu0 %v951_v21  ;;  %v807_v47 = vcombine.low %v299_v44, %v301_v45  ;;  %v808_v48 = vcombine.high %v299_v44, %v301_v45  ;;  %v809_v51 = vcombine.low %v300_v49, %v302_v50 }
  0x38   : > { %880 = vmatprep.subr.bf16.mxu1 %v952_v22  ;;  %v810_v52 = vcombine.high %v300_v49, %v302_v50 }
  0x39   : > { %613 = vmatprep.mubr.bf16.mxu0 %v808_v48 }
  0x3a   : > { %859 = vmatpush3.bf16.msra.mxu0 %v953_v23  ;;  %654 = vmatprep.mubr.bf16.mxu1 %v810_v52 }
  0x3b   : > { %881 = vmatpush3.bf16.msra.mxu1 %v954_v24  ;;  %860 = vmatprep.subr.bf16.mxu0 %v955_v25 }
  0x3c   : > { %882 = vmatprep.subr.bf16.mxu1 %v956_v26 }
  0x3e   : > { %861 = vmatpush3.bf16.msra.mxu0 %v957_v27 }
  0x3f   : > { %883 = vmatpush3.bf16.msra.mxu1 %v958_v28  ;;  %862 = vmatprep.subr.bf16.mxu0 %v959_v29 }
  0x40   : > { %884 = vmatprep.subr.bf16.mxu1 %v960_v30 }
  0x42   : > { %863 = vmatpush3.bf16.msra.mxu0 %v961_v31 }
  0x43   : > { %885 = vmatpush3.bf16.msra.mxu1 %v962_v32  ;;  %864 = vmatprep.subr.bf16.mxu0 %v963_v33 }
  0x44   : > { %886 = vmatprep.subr.bf16.mxu1 %v964_v34 }
  0x46   : > { %865 = vmatpush3.bf16.msra.mxu0 %v965_v35 }
  0x47   : > { %887 = vmatpush3.bf16.msra.mxu1 %v966_v36 }
  0x49   : > { %614 = vmatmul.mubr.bf16.vlgmr.msra.gmra.mrb[0].mxu0 %v807_v47 }
  0x4a   : > { %655 = vmatmul.mubr.bf16.vlgmr.msra.gmra.mrb[0].mxu1 %v809_v51 }
 0x11c   : > { %v866_v53 = vpop.f32.mrb[0].mxu0 }
 0x11d   : > { %v867_v54 = vpop.f32.mrb[1].mxu0  ;;  %v888_v55 = vpop.f32.mrb[0].mxu1 }
 0x11e   : > { %v868_v56 = vadd.f32 %v867_v54, %v866_v53  ;;  %v869_v57 = vpop.f32.mrb[2].mxu0  ;;  %v889_v58 = vpop.f32.mrb[1].mxu1 }
 0x11f   : > { %v870_v59 = vpop.f32.mrb[3].mxu0  ;;  %v890_v60 = vadd.f32 %v889_v58, %v888_v55  ;;  %v891_v61 = vpop.f32.mrb[2].mxu1 }
 0x120   : > { %v871_v62 = vadd.f32 %v870_v59, %v869_v57  ;;  %v892_v0 = vpop.f32.mrb[3].mxu1 }
 0x121   : > { %v657_v1 = vadd.f32 %v890_v60, %v868_v56  ;;  %v893_v2 = vadd.f32 %v892_v0, %v891_v61  ;;  %670 = sbr.rel (%p843_p11) target bundleno = 306 (0x132), region = 63 }
 0x123   : > { %v663_v4 = vadd.f32 %v657_v1, %v303_v63  ;;  %v660_v5 = vadd.f32 %v893_v2, %v871_v62 }
 0x125   : > { %665 = vst [vmem:[#allocation2] sm:$0xff] %v663_v4  ;;  %v664_v6 = vadd.f32 %v660_v5, %v304_v3 }
 0x127   : > { %666 = vst [vmem:[#allocation2 + $0x8] sm:$0xff] %v664_v6 }
 0x12c   : > { %v671_v7 = vld [vmem:[#allocation2] sm:$0xff] }
 0x12d   : > { %v680_v10 = vadd.f32 %v844_v8, %v671_v7 }
 0x12e   : > { %v672_v9 = vld [vmem:[#allocation2 + $0x8] sm:$0xff] }
 0x12f   : > { %v681_v11 = vadd.f32 %v844_v8, %v672_v9  ;;  %682 = vst [vmem:[%s1147_s3] sm:$0xff] %v680_v10 }
 0x131   : > { %683 = vst [vmem:[%s1147_s3 + $0x8] sm:$0xff] %v681_v11 }
 0x132 PF: > { %s13_s16 = sadd.s32 1, %s1005_s16   ;;  %s1148_s12 = smov %s993_s13 }
 0x133   : > { %p10_p12 = scmp.ge.s32.totalorder %s13_s16, 4   ;;  %s1149_s13 = smov %s1063_s20 }
 0x134   : > { %s1150_s14 = smov %s1001_s15  ;;  %s1151_s15 = smov %s1153_s17 }
 0x135   :  { %12 = sbr.rel (!%p10_p12) target bundleno = 3 (0x3), region = 104 }

// kernel: _lambda_.33
= control target key start
LH: loop header
LB: loop body
LE: loop exit
PB: predicated region body
PF: predicated region fallthrough
CT: control target
= control target key end

     0   :  { %v288_v13 = vmov 0   ;;  %s372_s1 = inlined_call_operand.vmem [shape: bf16[256,128], index: 1, kind: input, shape index: {}]   ;;  %s373_s0 = inlined_call_operand.vmem [shape: bf16[16,256], index: 0, kind: input, shape index: {}]   ;;  %s374_s2 = inlined_call_operand.vmem [shape: f32[1,128], index: 2, kind: input, shape index: {}]   ;;  %s375_s3 = inlined_call_operand.vmem [shape: f32[16,128], index: 3, kind: output, shape index: {}]  }
   0x1   :  { %v272_v0 = vld [vmem:[%s372_s1 + $0x40] sm:$0xff]   ;;  %v274_v2 = vld [vmem:[%s372_s1 + $0x48] sm:$0xff]   ;;  %v276_v4 = vld [vmem:[%s372_s1 + $0x50] sm:$0xff]  }
   0x2   :  { %v273_v1 = vld [vmem:[%s372_s1] sm:$0xff]   ;;  %249 = vmatprep.subr.bf16.mxu0 %v272_v0  ;;  %v275_v3 = vld [vmem:[%s372_s1 + $0x8] sm:$0xff]   ;;  %v277_v5 = vld [vmem:[%s372_s1 + $0x10] sm:$0xff]  }
   0x3   :  { %250 = vmatpush3.bf16.msra.mxu0 %v273_v1  ;;  %v278_v6 = vld [vmem:[%s372_s1 + $0x58] sm:$0xff]   ;;  %v280_v8 = vld [vmem:[%s372_s1 + $0x60] sm:$0xff]   ;;  %v282_v10 = vld [vmem:[%s372_s1 + $0x68] sm:$0xff]  }
   0x4   :  { %251 = vmatprep.subr.bf16.mxu0 %v274_v2  ;;  %v279_v7 = vld [vmem:[%s372_s1 + $0x18] sm:$0xff]   ;;  %v281_v9 = vld [vmem:[%s372_s1 + $0x20] sm:$0xff]   ;;  %v22_v12 = vld [vmem:[%s373_s0 + $0x8] sm:$0xff] }
   0x5   :  { %v21_v11 = vld [vmem:[%s373_s0] sm:$0xff]  ;;  %v24_v15 = vmax.bf16 %v288_v13, %v22_v12  ;;  %v283_v16 = vld [vmem:[%s372_s1 + $0x28] sm:$0xff]   ;;  %v284_v18 = vld [vmem:[%s372_s1 + $0x70] sm:$0xff]  }
   0x6   :  { %v23_v14 = vmax.bf16 %v288_v13, %v21_v11  ;;  %v285_v19 = vld [vmem:[%s372_s1 + $0x30] sm:$0xff]   ;;  %v286_v20 = vld [vmem:[%s372_s1 + $0x78] sm:$0xff]   ;;  %v248_v25 = vld [vmem:[%s374_s2] ss:$0 sm:$0xff] }
   0x7   :  { %252 = vmatpush3.bf16.msra.mxu0 %v275_v3  ;;  %v287_v21 = vld [vmem:[%s372_s1 + $0x38] sm:$0xff]  }
   0x8   :  { %253 = vmatprep.subr.bf16.mxu0 %v276_v4  ;;  %v231_v17 = vcombine.high %v23_v14, %v24_v15  ;;  %v230_v22 = vcombine.low %v23_v14, %v24_v15 }
   0xa   :  { %197 = vmatprep.mubr.bf16.mxu0 %v231_v17 }
   0xb   :  { %254 = vmatpush3.bf16.msra.mxu0 %v277_v5 }
   0xc   :  { %255 = vmatprep.subr.bf16.mxu0 %v278_v6 }
   0xf   :  { %256 = vmatpush3.bf16.msra.mxu0 %v279_v7 }
  0x10   :  { %257 = vmatprep.subr.bf16.mxu0 %v280_v8 }
  0x13   :  { %258 = vmatpush3.bf16.msra.mxu0 %v281_v9 }
  0x14   :  { %259 = vmatprep.subr.bf16.mxu0 %v282_v10 }
  0x17   :  { %260 = vmatpush3.bf16.msra.mxu0 %v283_v16 }
  0x18   :  { %261 = vmatprep.subr.bf16.mxu0 %v284_v18 }
  0x1b   :  { %262 = vmatpush3.bf16.msra.mxu0 %v285_v19 }
  0x1c   :  { %263 = vmatprep.subr.bf16.mxu0 %v286_v20 }
  0x1f   :  { %264 = vmatpush3.bf16.msra.mxu0 %v287_v21 }
  0x22   :  { %198 = vmatmul.mubr.bf16.vlgmr.msra.gmra.mrb[0].mxu0 %v230_v22 }
  0xf5   :  { %v265_v23 = vpop.f32.mrb[0].mxu0 }
  0xf6   :  { %v266_v24 = vpop.f32.mrb[1].mxu0 }
  0xf7   :  { %v267_v26 = vadd.f32 %v266_v24, %v265_v23  ;;  %v268_v27 = vpop.f32.mrb[2].mxu0 }
  0xf8   :  { %v269_v28 = vpop.f32.mrb[3].mxu0 }
  0xf9   :  { %v222_v29 = vadd.f32 %v267_v26, %v248_v25  ;;  %v270_v30 = vadd.f32 %v269_v28, %v268_v27 }
  0xfb   :  { %224 = vst [vmem:[%s375_s3] sm:$0xff] %v222_v29  ;;  %v223_v31 = vadd.f32 %v270_v30, %v248_v25 }
  0xfd   :  { %225 = vst [vmem:[%s375_s3 + $0x8] sm:$0xff] %v223_v31 }

// kernel: _lambda_.34
= control target key start
LH: loop header
LB: loop body
LE: loop exit
PB: predicated region body
PF: predicated region fallthrough
CT: control target
= control target key end

     0   :  { %v527_v35 = vmov 0   ;;  %s665_s1 = inlined_call_operand.vmem [shape: bf16[512,128], index: 1, kind: input, shape index: {}]   ;;  %s666_s0 = inlined_call_operand.vmem [shape: bf16[16,512], index: 0, kind: input, shape index: {}]   ;;  %s667_s2 = inlined_call_operand.vmem [shape: f32[1,128], index: 2, kind: input, shape index: {}]   ;;  %s668_s3 = inlined_call_operand.vmem [shape: f32[16,128], index: 3, kind: output, shape index: {}]  }
   0x1   :  { %v495_v0 = vld [vmem:[%s665_s1 + $0x40] sm:$0xff]   ;;  %v499_v4 = vld [vmem:[%s665_s1 + $0x48] sm:$0xff]   ;;  %v503_v8 = vld [vmem:[%s665_s1 + $0x50] sm:$0xff]  }
   0x2   :  { %v496_v1 = vld [vmem:[%s665_s1 + $0xc0] sm:$0xff]   ;;  %450 = vmatprep.subr.bf16.mxu0 %v495_v0  ;;  %v500_v5 = vld [vmem:[%s665_s1 + $0xc8] sm:$0xff]   ;;  %v504_v9 = vld [vmem:[%s665_s1 + $0xd0] sm:$0xff]  }
   0x3   :  { %v497_v2 = vld [vmem:[%s665_s1] sm:$0xff]   ;;  %472 = vmatprep.subr.bf16.mxu1 %v496_v1  ;;  %v501_v6 = vld [vmem:[%s665_s1 + $0x8] sm:$0xff]   ;;  %v505_v10 = vld [vmem:[%s665_s1 + $0x10] sm:$0xff]  }
   0x4   :  { %v498_v3 = vld [vmem:[%s665_s1 + $0x80] sm:$0xff]   ;;  %451 = vmatpush3.bf16.msra.mxu0 %v497_v2  ;;  %v502_v7 = vld [vmem:[%s665_s1 + $0x88] sm:$0xff]   ;;  %v506_v11 = vld [vmem:[%s665_s1 + $0x90] sm:$0xff]  }
   0x5   :  { %473 = vmatpush3.bf16.msra.mxu1 %v498_v3  ;;  %452 = vmatprep.subr.bf16.mxu0 %v499_v4  ;;  %v507_v12 = vld [vmem:[%s665_s1 + $0x58] sm:$0xff]   ;;  %v511_v16 = vld [vmem:[%s665_s1 + $0x60] sm:$0xff]   ;;  %v515_v20 = vld [vmem:[%s665_s1 + $0x68] sm:$0xff]  }
   0x6   :  { %474 = vmatprep.subr.bf16.mxu1 %v500_v5  ;;  %v508_v13 = vld [vmem:[%s665_s1 + $0xd8] sm:$0xff]   ;;  %v512_v17 = vld [vmem:[%s665_s1 + $0xe0] sm:$0xff]   ;;  %v516_v21 = vld [vmem:[%s665_s1 + $0xe8] sm:$0xff]  }
   0x7   :  { %v509_v14 = vld [vmem:[%s665_s1 + $0x18] sm:$0xff]   ;;  %v513_v18 = vld [vmem:[%s665_s1 + $0x20] sm:$0xff]   ;;  %v517_v22 = vld [vmem:[%s665_s1 + $0x28] sm:$0xff]  }
   0x8   :  { %453 = vmatpush3.bf16.msra.mxu0 %v501_v6  ;;  %v510_v15 = vld [vmem:[%s665_s1 + $0x98] sm:$0xff]   ;;  %v514_v19 = vld [vmem:[%s665_s1 + $0xa0] sm:$0xff]   ;;  %v518_v23 = vld [vmem:[%s665_s1 + $0xa8] sm:$0xff]  }
   0x9   :  { %475 = vmatpush3.bf16.msra.mxu1 %v502_v7  ;;  %454 = vmatprep.subr.bf16.mxu0 %v503_v8  ;;  %v519_v24 = vld [vmem:[%s665_s1 + $0x70] sm:$0xff]   ;;  %v523_v28 = vld [vmem:[%s665_s1 + $0x78] sm:$0xff]   ;;  %v21_v32 = vld [vmem:[%s666_s0] sm:$0xff] }
   0xa   :  { %476 = vmatprep.subr.bf16.mxu1 %v504_v9  ;;  %v520_v25 = vld [vmem:[%s665_s1 + $0xf0] sm:$0xff]   ;;  %v524_v29 = vld [vmem:[%s665_s1 + $0xf8] sm:$0xff]   ;;  %v22_v34 = vld [vmem:[%s666_s0 + $0x8] sm:$0xff]  ;;  %v25_v36 = vmax.bf16 %v527_v35, %v21_v32 }
   0xb   :  { %v521_v26 = vld [vmem:[%s665_s1 + $0x30] sm:$0xff]   ;;  %v525_v30 = vld [vmem:[%s665_s1 + $0x38] sm:$0xff]   ;;  %v26_v39 = vmax.bf16 %v527_v35, %v22_v34  ;;  %v449_v54 = vld [vmem:[%s667_s2] ss:$0 sm:$0xff] }
   0xc   :  { %455 = vmatpush3.bf16.msra.mxu0 %v505_v10  ;;  %v522_v27 = vld [vmem:[%s665_s1 + $0xb0] sm:$0xff]   ;;  %v526_v31 = vld [vmem:[%s665_s1 + $0xb8] sm:$0xff]  }
   0xd   :  { %477 = vmatpush3.bf16.msra.mxu1 %v506_v11  ;;  %456 = vmatprep.subr.bf16.mxu0 %v507_v12  ;;  %v23_v33 = vld [vmem:[%s666_s0 + $0x10] sm:$0xff]  ;;  %v24_v38 = vld [vmem:[%s666_s0 + $0x18] sm:$0xff] }
   0xe   :  { %478 = vmatprep.subr.bf16.mxu1 %v508_v13  ;;  %v27_v37 = vmax.bf16 %v527_v35, %v23_v33  ;;  %v28_v40 = vmax.bf16 %v527_v35, %v24_v38 }
  0x10   :  { %457 = vmatpush3.bf16.msra.mxu0 %v509_v14  ;;  %v414_v41 = vcombine.high %v25_v36, %v27_v37  ;;  %v413_v42 = vcombine.low %v25_v36, %v27_v37  ;;  %v416_v43 = vcombine.high %v26_v39, %v28_v40  ;;  %v415_v44 = vcombine.low %v26_v39, %v28_v40 }
  0x11   :  { %479 = vmatpush3.bf16.msra.mxu1 %v510_v15  ;;  %458 = vmatprep.subr.bf16.mxu0 %v511_v16 }
  0x12   :  { %480 = vmatprep.subr.bf16.mxu1 %v512_v17  ;;  %339 = vmatprep.mubr.bf16.mxu0 %v414_v41 }
  0x13   :  { %380 = vmatprep.mubr.bf16.mxu1 %v416_v43 }
  0x14   :  { %459 = vmatpush3.bf16.msra.mxu0 %v513_v18 }
  0x15   :  { %481 = vmatpush3.bf16.msra.mxu1 %v514_v19  ;;  %460 = vmatprep.subr.bf16.mxu0 %v515_v20 }
  0x16   :  { %482 = vmatprep.subr.bf16.mxu1 %v516_v21 }
  0x18   :  { %461 = vmatpush3.bf16.msra.mxu0 %v517_v22 }
  0x19   :  { %483 = vmatpush3.bf16.msra.mxu1 %v518_v23  ;;  %462 = vmatprep.subr.bf16.mxu0 %v519_v24 }
  0x1a   :  { %484 = vmatprep.subr.bf16.mxu1 %v520_v25 }
  0x1c   :  { %463 = vmatpush3.bf16.msra.mxu0 %v521_v26 }
  0x1d   :  { %485 = vmatpush3.bf16.msra.mxu1 %v522_v27  ;;  %464 = vmatprep.subr.bf16.mxu0 %v523_v28 }
  0x1e   :  { %486 = vmatprep.subr.bf16.mxu1 %v524_v29 }
  0x20   :  { %465 = vmatpush3.bf16.msra.mxu0 %v525_v30 }
  0x21   :  { %487 = vmatpush3.bf16.msra.mxu1 %v526_v31 }
  0x23   :  { %340 = vmatmul.mubr.bf16.vlgmr.msra.gmra.mrb[0].mxu0 %v413_v42 }
  0x24   :  { %381 = vmatmul.mubr.bf16.vlgmr.msra.gmra.mrb[0].mxu1 %v415_v44 }
  0xf6   :  { %v466_v45 = vpop.f32.mrb[0].mxu0 }
  0xf7   :  { %v488_v46 = vpop.f32.mrb[0].mxu1  ;;  %v467_v47 = vpop.f32.mrb[1].mxu0 }
  0xf8   :  { %v468_v48 = vadd.f32 %v467_v47, %v466_v45  ;;  %v489_v49 = vpop.f32.mrb[1].mxu1  ;;  %v469_v50 = vpop.f32.mrb[2].mxu0 }
  0xf9   :  { %v490_v51 = vadd.f32 %v489_v49, %v488_v46  ;;  %v491_v52 = vpop.f32.mrb[2].mxu1  ;;  %v470_v53 = vpop.f32.mrb[3].mxu0 }
  0xfa   :  { %v471_v55 = vadd.f32 %v470_v53, %v469_v50  ;;  %v492_v56 = vpop.f32.mrb[3].mxu1 }
  0xfb   :  { %v383_v57 = vadd.f32 %v490_v51, %v468_v48  ;;  %v493_v58 = vadd.f32 %v492_v56, %v491_v52 }
  0xfd   :  { %v405_v59 = vadd.f32 %v449_v54, %v383_v57  ;;  %v386_v60 = vadd.f32 %v493_v58, %v471_v55 }
  0xff   :  { %407 = vst [vmem:[%s668_s3] sm:$0xff] %v405_v59  ;;  %v406_v61 = vadd.f32 %v449_v54, %v386_v60 }
 0x101   :  { %408 = vst [vmem:[%s668_s3 + $0x8] sm:$0xff] %v406_v61 }

// kernel: _lambda_.38
= control target key start
LH: loop header
LB: loop body
LE: loop exit
PB: predicated region body
PF: predicated region fallthrough
CT: control target
= control target key end

     0   :  { %v348_v14 = vmov 0   ;;  %s444_s1 = inlined_call_operand.vmem [shape: bf16[256,128], index: 1, kind: input, shape index: {}]   ;;  %s445_s0 = inlined_call_operand.vmem [shape: bf16[32,256], index: 0, kind: input, shape index: {}]   ;;  %s446_s2 = inlined_call_operand.vmem [shape: f32[1,128], index: 2, kind: input, shape index: {}]   ;;  %s447_s3 = inlined_call_operand.vmem [shape: f32[32,128], index: 3, kind: output, shape index: {}]  }
   0x1   :  { %v332_v0 = vld [vmem:[%s444_s1 + $0x40] sm:$0xff]   ;;  %v334_v2 = vld [vmem:[%s444_s1 + $0x48] sm:$0xff]   ;;  %v336_v4 = vld [vmem:[%s444_s1 + $0x50] sm:$0xff]  }
   0x2   :  { %v333_v1 = vld [vmem:[%s444_s1] sm:$0xff]   ;;  %287 = vmatprep.subr.bf16.mxu0 %v332_v0  ;;  %315 = vmatprep.subr.bf16.mxu1 %v332_v0  ;;  %v335_v3 = vld [vmem:[%s444_s1 + $0x8] sm:$0xff]   ;;  %v337_v5 = vld [vmem:[%s444_s1 + $0x10] sm:$0xff]  }
   0x3   :  { %288 = vmatpush3.bf16.msra.mxu0 %v333_v1  ;;  %323 = vmatpush3.bf16.msra.mxu1 %v333_v1  ;;  %v338_v6 = vld [vmem:[%s444_s1 + $0x58] sm:$0xff]   ;;  %v340_v8 = vld [vmem:[%s444_s1 + $0x60] sm:$0xff]   ;;  %v342_v10 = vld [vmem:[%s444_s1 + $0x68] sm:$0xff]  }
   0x4   :  { %289 = vmatprep.subr.bf16.mxu0 %v334_v2  ;;  %316 = vmatprep.subr.bf16.mxu1 %v334_v2  ;;  %v339_v7 = vld [vmem:[%s444_s1 + $0x18] sm:$0xff]   ;;  %v341_v9 = vld [vmem:[%s444_s1 + $0x20] sm:$0xff]   ;;  %v24_v12 = vld [vmem:[%s445_s0 + $0x8] sm:$0xff] }
   0x5   :  { %v23_v11 = vld [vmem:[%s445_s0] sm:$0xff]  ;;  %v25_v13 = vld [vmem:[%s445_s0 + $0x10] sm:$0xff]  ;;  %v28_v16 = vmax.bf16 %v348_v14, %v24_v12  ;;  %v26_v17 = vld [vmem:[%s445_s0 + $0x18] sm:$0xff] }
   0x6   :  { %v27_v15 = vmax.bf16 %v348_v14, %v23_v11  ;;  %v29_v18 = vmax.bf16 %v348_v14, %v25_v13  ;;  %v30_v19 = vmax.bf16 %v348_v14, %v26_v17  ;;  %v343_v20 = vld [vmem:[%s444_s1 + $0x28] sm:$0xff]   ;;  %v344_v22 = vld [vmem:[%s444_s1 + $0x70] sm:$0xff]   ;;  %v346_v25 = vld [vmem:[%s444_s1 + $0x78] sm:$0xff]  }
   0x7   :  { %290 = vmatpush3.bf16.msra.mxu0 %v335_v3  ;;  %324 = vmatpush3.bf16.msra.mxu1 %v335_v3  ;;  %v345_v24 = vld [vmem:[%s444_s1 + $0x30] sm:$0xff]   ;;  %v347_v26 = vld [vmem:[%s444_s1 + $0x38] sm:$0xff]   ;;  %v286_v32 = vld [vmem:[%s446_s2] ss:$0 sm:$0xff] }
   0x8   :  { %291 = vmatprep.subr.bf16.mxu0 %v336_v4  ;;  %317 = vmatprep.subr.bf16.mxu1 %v336_v4  ;;  %v267_v21 = vcombine.high %v27_v15, %v28_v16  ;;  %v269_v23 = vcombine.high %v29_v18, %v30_v19  ;;  %v266_v27 = vcombine.low %v27_v15, %v28_v16 }
   0x9   :  { %v268_v28 = vcombine.low %v29_v18, %v30_v19 }
   0xa   :  { %215 = vmatprep.mubr.bf16.mxu0 %v267_v21  ;;  %223 = vmatprep.mubr.bf16.mxu1 %v269_v23 }
   0xb   :  { %292 = vmatpush3.bf16.msra.mxu0 %v337_v5  ;;  %325 = vmatpush3.bf16.msra.mxu1 %v337_v5 }
   0xc   :  { %293 = vmatprep.subr.bf16.mxu0 %v338_v6  ;;  %318 = vmatprep.subr.bf16.mxu1 %v338_v6 }
   0xf   :  { %294 = vmatpush3.bf16.msra.mxu0 %v339_v7  ;;  %326 = vmatpush3.bf16.msra.mxu1 %v339_v7 }
  0x10   :  { %295 = vmatprep.subr.bf16.mxu0 %v340_v8  ;;  %319 = vmatprep.subr.bf16.mxu1 %v340_v8 }
  0x13   :  { %296 = vmatpush3.bf16.msra.mxu0 %v341_v9  ;;  %327 = vmatpush3.bf16.msra.mxu1 %v341_v9 }
  0x14   :  { %297 = vmatprep.subr.bf16.mxu0 %v342_v10  ;;  %320 = vmatprep.subr.bf16.mxu1 %v342_v10 }
  0x17   :  { %298 = vmatpush3.bf16.msra.mxu0 %v343_v20  ;;  %328 = vmatpush3.bf16.msra.mxu1 %v343_v20 }
  0x18   :  { %299 = vmatprep.subr.bf16.mxu0 %v344_v22  ;;  %321 = vmatprep.subr.bf16.mxu1 %v344_v22 }
  0x1b   :  { %300 = vmatpush3.bf16.msra.mxu0 %v345_v24  ;;  %329 = vmatpush3.bf16.msra.mxu1 %v345_v24 }
  0x1c   :  { %301 = vmatprep.subr.bf16.mxu0 %v346_v25  ;;  %322 = vmatprep.subr.bf16.mxu1 %v346_v25 }
  0x1f   :  { %302 = vmatpush3.bf16.msra.mxu0 %v347_v26  ;;  %330 = vmatpush3.bf16.msra.mxu1 %v347_v26 }
  0x22   :  { %216 = vmatmul.mubr.bf16.vlgmr.msra.gmra.mrb[0].mxu0 %v266_v27  ;;  %224 = vmatmul.mubr.bf16.vlgmr.msra.gmra.mrb[0].mxu1 %v268_v28 }
  0xf5   :  { %v303_v29 = vpop.f32.mrb[0].mxu0  ;;  %v309_v30 = vpop.f32.mrb[0].mxu1 }
  0xf6   :  { %v304_v31 = vpop.f32.mrb[1].mxu0  ;;  %v310_v33 = vpop.f32.mrb[1].mxu1 }
  0xf7   :  { %v305_v34 = vadd.f32 %v304_v31, %v303_v29  ;;  %v311_v35 = vadd.f32 %v310_v33, %v309_v30  ;;  %v306_v36 = vpop.f32.mrb[2].mxu0  ;;  %v312_v37 = vpop.f32.mrb[2].mxu1 }
  0xf8   :  { %v307_v38 = vpop.f32.mrb[3].mxu0  ;;  %v313_v39 = vpop.f32.mrb[3].mxu1 }
  0xf9   :  { %v254_v40 = vadd.f32 %v305_v34, %v286_v32  ;;  %v256_v41 = vadd.f32 %v311_v35, %v286_v32  ;;  %v308_v42 = vadd.f32 %v307_v38, %v306_v36  ;;  %v314_v43 = vadd.f32 %v313_v39, %v312_v37 }
  0xfb   :  { %258 = vst [vmem:[%s447_s3] sm:$0xff] %v254_v40  ;;  %260 = vst [vmem:[%s447_s3 + $0x10] sm:$0xff] %v256_v41  ;;  %v255_v44 = vadd.f32 %v308_v42, %v286_v32  ;;  %v257_v45 = vadd.f32 %v314_v43, %v286_v32 }
  0xfd   :  { %259 = vst [vmem:[%s447_s3 + $0x8] sm:$0xff] %v255_v44  ;;  %261 = vst [vmem:[%s447_s3 + $0x18] sm:$0xff] %v257_v45 }

// kernel: _lambda_.42
= control target key start
LH: loop header
LB: loop body
LE: loop exit
PB: predicated region body
PF: predicated region fallthrough
CT: control target
= control target key end

     0   :  { %v476_v7 = vmov 0   ;;  %s636_s1 = inlined_call_operand.vmem [shape: bf16[128,128], index: 1, kind: input, shape index: {}]   ;;  %s637_s0 = inlined_call_operand.vmem [shape: bf16[128,128], index: 0, kind: input, shape index: {}]   ;;  %s638_s2 = inlined_call_operand.vmem [shape: f32[1,128], index: 2, kind: input, shape index: {}]   ;;  %s639_s3 = inlined_call_operand.vmem [shape: f32[128,128], index: 3, kind: output, shape index: {}]  }
   0x1   :  { %v468_v0 = vld [vmem:[%s636_s1] sm:$0xff]   ;;  %v469_v1 = vld [vmem:[%s636_s1 + $0x8] sm:$0xff]   ;;  %v470_v2 = vld [vmem:[%s636_s1 + $0x10] sm:$0xff]  }
   0x2   :  { %419 = vmatprep.subr.bf16.mxu0 %v468_v0  ;;  %451 = vmatprep.subr.bf16.mxu1 %v468_v0  ;;  %v471_v3 = vld [vmem:[%s636_s1 + $0x18] sm:$0xff]   ;;  %v35_v4 = vld [vmem:[%s637_s0] sm:$0xf]  ;;  %v36_v5 = vld [vmem:[%s637_s0 + $0x4] sm:$0xf] }
   0x3   :  { %420 = vmatpush3.bf16.msra.mxu0 %v468_v0  ;;  %459 = vmatpush3.bf16.msra.mxu1 %v468_v0  ;;  %v43_v6 = vld [vmem:[%s637_s0 + $0x20] sm:$0xf]  ;;  %v51_v8 = vmax.bf16 %v476_v7, %v35_v4  ;;  %v52_v9 = vmax.bf16 %v476_v7, %v36_v5  ;;  %v44_v10 = vld [vmem:[%s637_s0 + $0x24] sm:$0xf]  ;;  %v473_v16 = vld [vmem:[%s636_s1 + $0x28] sm:$0xff]  }
   0x4   :  { %421 = vmatprep.subr.bf16.mxu0 %v469_v1  ;;  %452 = vmatprep.subr.bf16.mxu1 %v469_v1  ;;  %v59_v11 = vmax.bf16 %v476_v7, %v43_v6  ;;  %v60_v12 = vmax.bf16 %v476_v7, %v44_v10  ;;  %v472_v14 = vld [vmem:[%s636_s1 + $0x20] sm:$0xff]   ;;  %v474_v17 = vld [vmem:[%s636_s1 + $0x30] sm:$0xff]   ;;  %v475_v18 = vld [vmem:[%s636_s1 + $0x38] sm:$0xff]  }
   0x5   :  { %v386_v13 = vcombine.low %v51_v8, %v52_v9  ;;  %v37_v19 = vld [vmem:[%s637_s0 + $0x8] sm:$0xf]  ;;  %v38_v20 = vld [vmem:[%s637_s0 + $0xc] sm:$0xf]  ;;  %v39_v23 = vld [vmem:[%s637_s0 + $0x10] sm:$0xf] }
   0x6   :  { %v390_v15 = vcombine.low %v59_v11, %v60_v12  ;;  %v45_v21 = vld [vmem:[%s637_s0 + $0x28] sm:$0xf]  ;;  %v46_v22 = vld [vmem:[%s637_s0 + $0x2c] sm:$0xf]  ;;  %v40_v24 = vld [vmem:[%s637_s0 + $0x14] sm:$0xf]  ;;  %v53_v27 = vmax.bf16 %v476_v7, %v37_v19  ;;  %v54_v28 = vmax.bf16 %v476_v7, %v38_v20  ;;  %v55_v31 = vmax.bf16 %v476_v7, %v39_v23 }
   0x7   :  { %422 = vmatpush3.bf16.msra.mxu0 %v469_v1  ;;  %460 = vmatpush3.bf16.msra.mxu1 %v469_v1  ;;  %v47_v25 = vld [vmem:[%s637_s0 + $0x30] sm:$0xf]  ;;  %v48_v26 = vld [vmem:[%s637_s0 + $0x34] sm:$0xf]  ;;  %v61_v29 = vmax.bf16 %v476_v7, %v45_v21  ;;  %v62_v30 = vmax.bf16 %v476_v7, %v46_v22  ;;  %v56_v32 = vmax.bf16 %v476_v7, %v40_v24  ;;  %v41_v37 = vld [vmem:[%s637_s0 + $0x18] sm:$0xf] }
   0x8   :  { %423 = vmatprep.subr.bf16.mxu0 %v470_v2  ;;  %453 = vmatprep.subr.bf16.mxu1 %v470_v2  ;;  %v63_v33 = vmax.bf16 %v476_v7, %v47_v25  ;;  %v64_v34 = vmax.bf16 %v476_v7, %v48_v26  ;;  %v387_v35 = vcombine.low %v53_v27, %v54_v28  ;;  %v42_v40 = vld [vmem:[%s637_s0 + $0x1c] sm:$0xf]  ;;  %v49_v41 = vld [vmem:[%s637_s0 + $0x38] sm:$0xf]  ;;  %v402_v49 = vld [vmem:[%s638_s2] ss:$0 sm:$0xff] }
   0x9   :  { %435 = vmatprep.mubr.bf16.mxu0 %v386_v13  ;;  %443 = vmatprep.mubr.bf16.mxu1 %v390_v15  ;;  %v391_v36 = vcombine.low %v61_v29, %v62_v30  ;;  %v388_v38 = vcombine.low %v55_v31, %v56_v32  ;;  %v50_v42 = vld [vmem:[%s637_s0 + $0x3c] sm:$0xf]  ;;  %v57_v43 = vmax.bf16 %v476_v7, %v41_v37 }
   0xa   :  { %v392_v39 = vcombine.low %v63_v33, %v64_v34  ;;  %v58_v44 = vmax.bf16 %v476_v7, %v42_v40  ;;  %v65_v45 = vmax.bf16 %v476_v7, %v49_v41  ;;  %v66_v46 = vmax.bf16 %v476_v7, %v50_v42 }
   0xb   :  { %424 = vmatpush3.bf16.msra.mxu0 %v470_v2  ;;  %461 = vmatpush3.bf16.msra.mxu1 %v470_v2 }
   0xc   :  { %425 = vmatprep.subr.bf16.mxu0 %v471_v3  ;;  %454 = vmatprep.subr.bf16.mxu1 %v471_v3  ;;  %v389_v47 = vcombine.low %v57_v43, %v58_v44  ;;  %v393_v48 = vcombine.low %v65_v45, %v66_v46 }
   0xf   :  { %426 = vmatpush3.bf16.msra.mxu0 %v471_v3  ;;  %462 = vmatpush3.bf16.msra.mxu1 %v471_v3 }
  0x10   :  { %427 = vmatprep.subr.bf16.mxu0 %v472_v14  ;;  %455 = vmatprep.subr.bf16.mxu1 %v472_v14 }
  0x13   :  { %428 = vmatpush3.bf16.msra.mxu0 %v472_v14  ;;  %463 = vmatpush3.bf16.msra.mxu1 %v472_v14 }
  0x14   :  { %429 = vmatprep.subr.bf16.mxu0 %v473_v16  ;;  %456 = vmatprep.subr.bf16.mxu1 %v473_v16 }
  0x17   :  { %430 = vmatpush3.bf16.msra.mxu0 %v473_v16  ;;  %464 = vmatpush3.bf16.msra.mxu1 %v473_v16 }
  0x18   :  { %431 = vmatprep.subr.bf16.mxu0 %v474_v17  ;;  %457 = vmatprep.subr.bf16.mxu1 %v474_v17 }
  0x1b   :  { %432 = vmatpush3.bf16.msra.mxu0 %v474_v17  ;;  %465 = vmatpush3.bf16.msra.mxu1 %v474_v17 }
  0x1c   :  { %433 = vmatprep.subr.bf16.mxu0 %v475_v18  ;;  %458 = vmatprep.subr.bf16.mxu1 %v475_v18 }
  0x1f   :  { %434 = vmatpush3.bf16.msra.mxu0 %v475_v18  ;;  %466 = vmatpush3.bf16.msra.mxu1 %v475_v18 }
  0x22   :  { %436 = vmatmul.mubr.bf16.vlgmr.msra.gmra.mrb[0].mxu0 %v387_v35  ;;  %444 = vmatmul.mubr.bf16.vlgmr.msra.gmra.mrb[0].mxu1 %v391_v36 }
  0x23   :  { %439 = vmatprep.mubr.bf16.mxu0 %v388_v38  ;;  %447 = vmatprep.mubr.bf16.mxu1 %v392_v39 }
  0x2a   :  { %440 = vmatmul.mubr.bf16.gmra.mrb[4].mxu0 %v389_v47  ;;  %448 = vmatmul.mubr.bf16.gmra.mrb[4].mxu1 %v393_v48 }
  0xf5   :  { %v437_v50 = vpop.f32.mrb[0].mxu0  ;;  %v445_v51 = vpop.f32.mrb[0].mxu1 }
  0xf6   :  { %v352_v52 = vadd.f32 %v437_v50, %v402_v49  ;;  %v360_v53 = vadd.f32 %v445_v51, %v402_v49  ;;  %v229_v54 = vpop.f32.mrb[1].mxu0  ;;  %v261_v55 = vpop.f32.mrb[1].mxu1 }
  0xf7   :  { %v350_v56 = vadd.f32 %v402_v49, %v229_v54  ;;  %v358_v57 = vadd.f32 %v402_v49, %v261_v55  ;;  %v438_v58 = vpop.f32.mrb[2].mxu0  ;;  %v446_v59 = vpop.f32.mrb[2].mxu1 }
  0xf8   :  { %368 = vst [vmem:[%s639_s3 + $0x10] sm:$0xff] %v352_v52  ;;  %376 = vst [vmem:[%s639_s3 + $0x50] sm:$0xff] %v360_v53  ;;  %v353_v60 = vadd.f32 %v438_v58, %v402_v49  ;;  %v361_v61 = vadd.f32 %v446_v59, %v402_v49  ;;  %v232_v62 = vpop.f32.mrb[3].mxu0  ;;  %v264_v63 = vpop.f32.mrb[3].mxu1 }
  0xf9   :  { %366 = vst [vmem:[%s639_s3] sm:$0xff] %v350_v56  ;;  %374 = vst [vmem:[%s639_s3 + $0x40] sm:$0xff] %v358_v57  ;;  %v351_v0 = vadd.f32 %v402_v49, %v232_v62  ;;  %v359_v1 = vadd.f32 %v402_v49, %v264_v63 }
  0xfa   :  { %369 = vst [vmem:[%s639_s3 + $0x18] sm:$0xff] %v353_v60  ;;  %377 = vst [vmem:[%s639_s3 + $0x58] sm:$0xff] %v361_v61 }
  0xfb   :  { %367 = vst [vmem:[%s639_s3 + $0x8] sm:$0xff] %v351_v0  ;;  %375 = vst [vmem:[%s639_s3 + $0x48] sm:$0xff] %v359_v1 }
  0xfd   :  { %v441_v2 = vpop.f32.mrb[4].mxu0  ;;  %v449_v3 = vpop.f32.mrb[4].mxu1 }
  0xfe   :  { %v356_v4 = vadd.f32 %v441_v2, %v402_v49  ;;  %v364_v5 = vadd.f32 %v449_v3, %v402_v49  ;;  %v245_v6 = vpop.f32.mrb[5].mxu0  ;;  %v277_v7 = vpop.f32.mrb[5].mxu1 }
  0xff   :  { %v354_v8 = vadd.f32 %v402_v49, %v245_v6  ;;  %v362_v9 = vadd.f32 %v402_v49, %v277_v7  ;;  %v442_v10 = vpop.f32.mrb[6].mxu0  ;;  %v450_v11 = vpop.f32.mrb[6].mxu1 }
 0x100   :  { %372 = vst [vmem:[%s639_s3 + $0x30] sm:$0xff] %v356_v4  ;;  %380 = vst [vmem:[%s639_s3 + $0x70] sm:$0xff] %v364_v5  ;;  %v357_v12 = vadd.f32 %v442_v10, %v402_v49  ;;  %v365_v13 = vadd.f32 %v450_v11, %v402_v49  ;;  %v248_v14 = vpop.f32.mrb[7].mxu0  ;;  %v280_v15 = vpop.f32.mrb[7].mxu1 }
 0x101   :  { %370 = vst [vmem:[%s639_s3 + $0x20] sm:$0xff] %v354_v8  ;;  %378 = vst [vmem:[%s639_s3 + $0x60] sm:$0xff] %v362_v9  ;;  %v355_v16 = vadd.f32 %v402_v49, %v248_v14  ;;  %v363_v17 = vadd.f32 %v402_v49, %v280_v15 }
 0x102   :  { %373 = vst [vmem:[%s639_s3 + $0x38] sm:$0xff] %v357_v12  ;;  %381 = vst [vmem:[%s639_s3 + $0x78] sm:$0xff] %v365_v13 }
 0x103   :  { %371 = vst [vmem:[%s639_s3 + $0x28] sm:$0xff] %v355_v16  ;;  %379 = vst [vmem:[%s639_s3 + $0x68] sm:$0xff] %v363_v17 }

// kernel: _lambda_.46
= control target key start
LH: loop header
LB: loop body
LE: loop exit
PB: predicated region body
PF: predicated region fallthrough
CT: control target
= control target key end

     0   :  { %v1532_v7 = vmov 0   ;;  %s2148_s1 = inlined_call_operand.vmem [shape: bf16[128,128], index: 1, kind: input, shape index: {}]   ;;  %s2149_s0 = inlined_call_operand.vmem [shape: bf16[512,128], index: 0, kind: input, shape index: {}]   ;;  %s2150_s2 = inlined_call_operand.vmem [shape: f32[1,128], index: 2, kind: input, shape index: {}]   ;;  %s2151_s3 = inlined_call_operand.vmem [shape: f32[512,128], index: 3, kind: output, shape index: {}]  }
   0x1   :  { %v1396_v0 = vld [vmem:[%s2148_s1] sm:$0xff]   ;;  %v1397_v1 = vld [vmem:[%s2148_s1 + $0x8] sm:$0xff]   ;;  %v1398_v2 = vld [vmem:[%s2148_s1 + $0x10] sm:$0xff]  }
   0x2   :  { %1299 = vmatprep.subr.bf16.mxu0 %v1396_v0  ;;  %1379 = vmatprep.subr.bf16.mxu1 %v1396_v0  ;;  %v1399_v3 = vld [vmem:[%s2148_s1 + $0x18] sm:$0xff]   ;;  %v83_v4 = vld [vmem:[%s2149_s0] sm:$0xf]  ;;  %v84_v5 = vld [vmem:[%s2149_s0 + $0x4] sm:$0xf] }
   0x3   :  { %1300 = vmatpush3.bf16.msra.mxu0 %v1396_v0  ;;  %1387 = vmatpush3.bf16.msra.mxu1 %v1396_v0  ;;  %v115_v6 = vld [vmem:[%s2149_s0 + $0x80] sm:$0xf]  ;;  %v147_v8 = vmax.bf16 %v1532_v7, %v83_v4  ;;  %v148_v9 = vmax.bf16 %v1532_v7, %v84_v5  ;;  %v116_v10 = vld [vmem:[%s2149_s0 + $0x84] sm:$0xf]  ;;  %v1401_v16 = vld [vmem:[%s2148_s1 + $0x28] sm:$0xff]  }
   0x4   :  { %1301 = vmatprep.subr.bf16.mxu0 %v1397_v1  ;;  %1380 = vmatprep.subr.bf16.mxu1 %v1397_v1  ;;  %v179_v11 = vmax.bf16 %v1532_v7, %v115_v6  ;;  %v180_v12 = vmax.bf16 %v1532_v7, %v116_v10  ;;  %v1400_v14 = vld [vmem:[%s2148_s1 + $0x20] sm:$0xff]   ;;  %v1402_v17 = vld [vmem:[%s2148_s1 + $0x30] sm:$0xff]   ;;  %v85_v18 = vld [vmem:[%s2149_s0 + $0x8] sm:$0xf] }
   0x5   :  { %v1218_v13 = vcombine.low %v147_v8, %v148_v9  ;;  %v86_v19 = vld [vmem:[%s2149_s0 + $0xc] sm:$0xf]  ;;  %v117_v20 = vld [vmem:[%s2149_s0 + $0x88] sm:$0xf]  ;;  %v87_v22 = vld [vmem:[%s2149_s0 + $0x10] sm:$0xf]  ;;  %v149_v23 = vmax.bf16 %v1532_v7, %v85_v18 }
   0x6   :  { %v1234_v15 = vcombine.low %v179_v11, %v180_v12  ;;  %v118_v21 = vld [vmem:[%s2149_s0 + $0x8c] sm:$0xf]  ;;  %v88_v24 = vld [vmem:[%s2149_s0 + $0x14] sm:$0xf]  ;;  %v119_v25 = vld [vmem:[%s2149_s0 + $0x90] sm:$0xf]  ;;  %v150_v28 = vmax.bf16 %v1532_v7, %v86_v19  ;;  %v181_v29 = vmax.bf16 %v1532_v7, %v117_v20  ;;  %v151_v32 = vmax.bf16 %v1532_v7, %v87_v22 }
   0x7   :  { %1302 = vmatpush3.bf16.msra.mxu0 %v1397_v1  ;;  %1388 = vmatpush3.bf16.msra.mxu1 %v1397_v1  ;;  %v120_v26 = vld [vmem:[%s2149_s0 + $0x94] sm:$0xf]  ;;  %v1403_v27 = vld [vmem:[%s2148_s1 + $0x38] sm:$0xff]   ;;  %v182_v30 = vmax.bf16 %v1532_v7, %v118_v21  ;;  %v152_v33 = vmax.bf16 %v1532_v7, %v88_v24  ;;  %v183_v34 = vmax.bf16 %v1532_v7, %v119_v25  ;;  %v91_v39 = vld [vmem:[%s2149_s0 + $0x20] sm:$0xf] }
   0x8   :  { %1303 = vmatprep.subr.bf16.mxu0 %v1398_v2  ;;  %1381 = vmatprep.subr.bf16.mxu1 %v1398_v2  ;;  %v89_v31 = vld [vmem:[%s2149_s0 + $0x18] sm:$0xf]  ;;  %v184_v35 = vmax.bf16 %v1532_v7, %v120_v26  ;;  %v90_v36 = vld [vmem:[%s2149_s0 + $0x1c] sm:$0xf]  ;;  %v92_v40 = vld [vmem:[%s2149_s0 + $0x24] sm:$0xf]  ;;  %v1219_v42 = vcombine.low %v149_v23, %v150_v28  ;;  %v155_v56 = vmax.bf16 %v1532_v7, %v91_v39 }
   0x9   :  { %1315 = vmatprep.mubr.bf16.mxu0 %v1218_v13  ;;  %1347 = vmatprep.mubr.bf16.mxu1 %v1234_v15  ;;  %v121_v37 = vld [vmem:[%s2149_s0 + $0x98] sm:$0xf]  ;;  %v122_v38 = vld [vmem:[%s2149_s0 + $0x9c] sm:$0xf]  ;;  %v109_v41 = vld [vmem:[%s2149_s0 + $0x68] sm:$0xf]  ;;  %v1235_v43 = vcombine.low %v181_v29, %v182_v30  ;;  %v153_v47 = vmax.bf16 %v1532_v7, %v89_v31  ;;  %v154_v48 = vmax.bf16 %v1532_v7, %v90_v36 }
   0xa   :  { %v123_v44 = vld [vmem:[%s2149_s0 + $0xa0] sm:$0xf]  ;;  %v124_v45 = vld [vmem:[%s2149_s0 + $0xa4] sm:$0xf]  ;;  %v110_v46 = vld [vmem:[%s2149_s0 + $0x6c] sm:$0xf]  ;;  %v185_v49 = vmax.bf16 %v1532_v7, %v121_v37  ;;  %v186_v50 = vmax.bf16 %v1532_v7, %v122_v38  ;;  %v1220_v54 = vcombine.low %v151_v32, %v152_v33  ;;  %v1236_v55 = vcombine.low %v183_v34, %v184_v35 }
   0xb   :  { %1304 = vmatpush3.bf16.msra.mxu0 %v1398_v2  ;;  %1389 = vmatpush3.bf16.msra.mxu1 %v1398_v2  ;;  %v141_v51 = vld [vmem:[%s2149_s0 + $0xe8] sm:$0xf]  ;;  %v142_v52 = vld [vmem:[%s2149_s0 + $0xec] sm:$0xf]  ;;  %v111_v53 = vld [vmem:[%s2149_s0 + $0x70] sm:$0xf]  ;;  %v1670_v57 = vmax.bf16 %v1532_v7, %v109_v41  ;;  %v156_v61 = vmax.bf16 %v1532_v7, %v92_v40  ;;  %v187_v62 = vmax.bf16 %v1532_v7, %v123_v44 }
   0xc   :  { %1305 = vmatprep.subr.bf16.mxu0 %v1399_v3  ;;  %1382 = vmatprep.subr.bf16.mxu1 %v1399_v3  ;;  %v112_v58 = vld [vmem:[%s2149_s0 + $0x74] sm:$0xf]  ;;  %v143_v59 = vld [vmem:[%s2149_s0 + $0xf0] sm:$0xf]  ;;  %v1684_v63 = vmax.bf16 %v1532_v7, %v110_v46  ;;  %v113_v0 = vld [vmem:[%s2149_s0 + $0x78] sm:$0xf]  ;;  %v188_v2 = vmax.bf16 %v1532_v7, %v124_v45  ;;  %v1697_v4 = vmax.bf16 %v1532_v7, %v142_v52 }
   0xd   :  { %v144_v60 = vld [vmem:[%s2149_s0 + $0xf4] sm:$0xf]  ;;  %v114_v1 = vld [vmem:[%s2149_s0 + $0x7c] sm:$0xf]  ;;  %v1700_v5 = vmax.bf16 %v1532_v7, %v111_v53  ;;  %v145_v6 = vld [vmem:[%s2149_s0 + $0xf8] sm:$0xf]  ;;  %v1708_v9 = vmax.bf16 %v1532_v7, %v112_v58  ;;  %v1711_v10 = vmax.bf16 %v1532_v7, %v143_v59  ;;  %v1221_v21 = vcombine.low %v153_v47, %v154_v48 }
   0xe   :  { %v1231_v8 = vcombine.low %v1670_v57, %v1684_v63  ;;  %v1714_v11 = vmax.bf16 %v1532_v7, %v144_v60  ;;  %v146_v12 = vld [vmem:[%s2149_s0 + $0xfc] sm:$0xf]  ;;  %v1725_v15 = vmax.bf16 %v1532_v7, %v114_v1  ;;  %v1732_v18 = vmax.bf16 %v1532_v7, %v145_v6  ;;  %v93_v23 = vld [vmem:[%s2149_s0 + $0x28] sm:$0xf]  ;;  %v94_v24 = vld [vmem:[%s2149_s0 + $0x2c] sm:$0xf] }
   0xf   :  { %1306 = vmatpush3.bf16.msra.mxu0 %v1399_v3  ;;  %1390 = vmatpush3.bf16.msra.mxu1 %v1399_v3  ;;  %v1694_v3 = vmax.bf16 %v1532_v7, %v141_v51  ;;  %v1737_v20 = vmax.bf16 %v1532_v7, %v146_v12  ;;  %v1237_v22 = vcombine.low %v185_v49, %v186_v50  ;;  %v125_v28 = vld [vmem:[%s2149_s0 + $0xa8] sm:$0xf]  ;;  %v126_v29 = vld [vmem:[%s2149_s0 + $0xac] sm:$0xf]  ;;  %v95_v30 = vld [vmem:[%s2149_s0 + $0x30] sm:$0xf] }
  0x10   :  { %1307 = vmatprep.subr.bf16.mxu0 %v1400_v14  ;;  %1383 = vmatprep.subr.bf16.mxu1 %v1400_v14  ;;  %v1222_v26 = vcombine.low %v155_v56, %v156_v61  ;;  %v96_v31 = vld [vmem:[%s2149_s0 + $0x34] sm:$0xf]  ;;  %v127_v32 = vld [vmem:[%s2149_s0 + $0xb0] sm:$0xf]  ;;  %v157_v34 = vmax.bf16 %v1532_v7, %v93_v23  ;;  %v158_v35 = vmax.bf16 %v1532_v7, %v94_v24  ;;  %v97_v44 = vld [vmem:[%s2149_s0 + $0x38] sm:$0xf] }
  0x11   :  { %v1247_v13 = vcombine.low %v1694_v3, %v1697_v4  ;;  %v1249_v25 = vcombine.low %v1732_v18, %v1737_v20  ;;  %v128_v33 = vld [vmem:[%s2149_s0 + $0xb4] sm:$0xf]  ;;  %v189_v36 = vmax.bf16 %v1532_v7, %v125_v28  ;;  %v190_v37 = vmax.bf16 %v1532_v7, %v126_v29  ;;  %v98_v45 = vld [vmem:[%s2149_s0 + $0x3c] sm:$0xf]  ;;  %v129_v48 = vld [vmem:[%s2149_s0 + $0xb8] sm:$0xf] }
  0x12   :  { %v159_v38 = vmax.bf16 %v1532_v7, %v95_v30  ;;  %v160_v39 = vmax.bf16 %v1532_v7, %v96_v31  ;;  %v191_v40 = vmax.bf16 %v1532_v7, %v127_v32  ;;  %v192_v41 = vmax.bf16 %v1532_v7, %v128_v33  ;;  %v130_v49 = vld [vmem:[%s2149_s0 + $0xbc] sm:$0xf]  ;;  %v99_v50 = vld [vmem:[%s2149_s0 + $0x40] sm:$0xf]  ;;  %v100_v51 = vld [vmem:[%s2149_s0 + $0x44] sm:$0xf] }
  0x13   :  { %1308 = vmatpush3.bf16.msra.mxu0 %v1400_v14  ;;  %1391 = vmatpush3.bf16.msra.mxu1 %v1400_v14  ;;  %v1722_v14 = vmax.bf16 %v1532_v7, %v113_v0  ;;  %v131_v52 = vld [vmem:[%s2149_s0 + $0xc0] sm:$0xf]  ;;  %v132_v53 = vld [vmem:[%s2149_s0 + $0xc4] sm:$0xf]  ;;  %v193_v56 = vmax.bf16 %v1532_v7, %v129_v48  ;;  %v194_v58 = vmax.bf16 %v1532_v7, %v130_v49  ;;  %v102_v6 = vld [vmem:[%s2149_s0 + $0x4c] sm:$0xf] }
  0x14   :  { %1309 = vmatprep.subr.bf16.mxu0 %v1401_v16  ;;  %1384 = vmatprep.subr.bf16.mxu1 %v1401_v16  ;;  %v1224_v46 = vcombine.low %v159_v38, %v160_v39  ;;  %v1240_v47 = vcombine.low %v191_v40, %v192_v41  ;;  %v163_v59 = vmax.bf16 %v1532_v7, %v99_v50  ;;  %v134_v23 = vld [vmem:[%s2149_s0 + $0xcc] sm:$0xf]  ;;  %v103_v24 = vld [vmem:[%s2149_s0 + $0x50] sm:$0xf]  ;;  %v136_v28 = vld [vmem:[%s2149_s0 + $0xd4] sm:$0xf] }
  0x15   :  { %v1233_v19 = vcombine.low %v1722_v14, %v1725_v15  ;;  %v164_v60 = vmax.bf16 %v1532_v7, %v100_v51  ;;  %v195_v61 = vmax.bf16 %v1532_v7, %v131_v52  ;;  %v1241_v1 = vcombine.low %v193_v56, %v194_v58  ;;  %v105_v39 = vld [vmem:[%s2149_s0 + $0x58] sm:$0xf]  ;;  %v106_v40 = vld [vmem:[%s2149_s0 + $0x5c] sm:$0xf]  ;;  %v140_v48 = vld [vmem:[%s2149_s0 + $0xe4] sm:$0xf] }
  0x16   :  { %v166_v30 = vmax.bf16 %v1532_v7, %v102_v6  ;;  %v198_v32 = vmax.bf16 %v1532_v7, %v134_v23  ;;  %v167_v33 = vmax.bf16 %v1532_v7, %v103_v24  ;;  %v169_v49 = vmax.bf16 %v1532_v7, %v105_v39 }
  0x17   :  { %1310 = vmatpush3.bf16.msra.mxu0 %v1401_v16  ;;  %1392 = vmatpush3.bf16.msra.mxu1 %v1401_v16  ;;  %v1232_v16 = vcombine.low %v1700_v5, %v1708_v9  ;;  %v1226_v12 = vcombine.low %v163_v59, %v164_v60  ;;  %v170_v50 = vmax.bf16 %v1532_v7, %v106_v40 }
  0x18   :  { %1311 = vmatprep.subr.bf16.mxu0 %v1402_v17  ;;  %1385 = vmatprep.subr.bf16.mxu1 %v1402_v17  ;;  %v204_v56 = vmax.bf16 %v1532_v7, %v140_v48 }
  0x19   :  { %v1229_v58 = vcombine.low %v169_v49, %v170_v50 }
  0x1b   :  { %1312 = vmatpush3.bf16.msra.mxu0 %v1402_v17  ;;  %1393 = vmatpush3.bf16.msra.mxu1 %v1402_v17  ;;  %v1248_v17 = vcombine.low %v1711_v10, %v1714_v11 }
  0x1c   :  { %1313 = vmatprep.subr.bf16.mxu0 %v1403_v27  ;;  %1386 = vmatprep.subr.bf16.mxu1 %v1403_v27 }
  0x1f   :  { %1314 = vmatpush3.bf16.msra.mxu0 %v1403_v27  ;;  %1394 = vmatpush3.bf16.msra.mxu1 %v1403_v27  ;;  %v1238_v27 = vcombine.low %v187_v62, %v188_v2  ;;  %v196_v62 = vmax.bf16 %v1532_v7, %v132_v53  ;;  %v101_v2 = vld [vmem:[%s2149_s0 + $0x48] sm:$0xf] }
  0x20   :  { %v165_v29 = vmax.bf16 %v1532_v7, %v101_v2 }
  0x22   :  { %1316 = vmatmul.mubr.bf16.vlgmr.msra.gmra.mrb[0].mxu0 %v1219_v42  ;;  %1348 = vmatmul.mubr.bf16.vlgmr.msra.gmra.mrb[0].mxu1 %v1235_v43  ;;  %v1223_v42 = vcombine.low %v157_v34, %v158_v35  ;;  %v1239_v43 = vcombine.low %v189_v36, %v190_v37  ;;  %v200_v36 = vmax.bf16 %v1532_v7, %v136_v28 }
  0x23   :  { %1319 = vmatprep.mubr.bf16.mxu0 %v1220_v54  ;;  %1351 = vmatprep.mubr.bf16.mxu1 %v1236_v55  ;;  %v161_v54 = vmax.bf16 %v1532_v7, %v97_v44  ;;  %v162_v55 = vmax.bf16 %v1532_v7, %v98_v45  ;;  %v1227_v37 = vcombine.low %v165_v29, %v166_v30  ;;  %v138_v44 = vld [vmem:[%s2149_s0 + $0xdc] sm:$0xf]  ;;  %v107_v45 = vld [vmem:[%s2149_s0 + $0x60] sm:$0xf] }
  0x24   :  { %v202_v52 = vmax.bf16 %v1532_v7, %v138_v44  ;;  %v171_v53 = vmax.bf16 %v1532_v7, %v107_v45 }
  0x25   :  { %v1225_v0 = vcombine.low %v161_v54, %v162_v55 }
  0x2a   :  { %1320 = vmatmul.mubr.bf16.gmra.mrb[4].mxu0 %v1221_v21  ;;  %1352 = vmatmul.mubr.bf16.gmra.mrb[4].mxu1 %v1237_v22  ;;  %v1242_v21 = vcombine.low %v195_v61, %v196_v62  ;;  %v133_v22 = vld [vmem:[%s2149_s0 + $0xc8] sm:$0xf] }
  0x2b   :  { %1323 = vmatprep.mubr.bf16.mxu0 %v1222_v26  ;;  %1355 = vmatprep.mubr.bf16.mxu1 %v1238_v27  ;;  %v104_v26 = vld [vmem:[%s2149_s0 + $0x54] sm:$0xf]  ;;  %v135_v27 = vld [vmem:[%s2149_s0 + $0xd0] sm:$0xf]  ;;  %v197_v31 = vmax.bf16 %v1532_v7, %v133_v22 }
  0x2c   :  { %v168_v34 = vmax.bf16 %v1532_v7, %v104_v26  ;;  %v199_v35 = vmax.bf16 %v1532_v7, %v135_v27 }
  0x2d   :  { %v1243_v38 = vcombine.low %v197_v31, %v198_v32 }
  0x2e   :  { %v1228_v41 = vcombine.low %v167_v33, %v168_v34 }
  0x32   :  { %1324 = vmatmul.mubr.bf16.gmra.mrb[8].mxu0 %v1223_v42  ;;  %1356 = vmatmul.mubr.bf16.gmra.mrb[8].mxu1 %v1239_v43  ;;  %v1244_v42 = vcombine.low %v199_v35, %v200_v36  ;;  %v137_v43 = vld [vmem:[%s2149_s0 + $0xd8] sm:$0xf] }
  0x33   :  { %1327 = vmatprep.mubr.bf16.mxu0 %v1224_v46  ;;  %1359 = vmatprep.mubr.bf16.mxu1 %v1240_v47  ;;  %v108_v46 = vld [vmem:[%s2149_s0 + $0x64] sm:$0xf]  ;;  %v139_v47 = vld [vmem:[%s2149_s0 + $0xe0] sm:$0xf]  ;;  %v201_v51 = vmax.bf16 %v1532_v7, %v137_v43 }
  0x34   :  { %v172_v54 = vmax.bf16 %v1532_v7, %v108_v46  ;;  %v203_v55 = vmax.bf16 %v1532_v7, %v139_v47  ;;  %v1890_v7 = vld [vmem:[%s2150_s2] ss:$0 sm:$0xff] }
  0x35   :  { %v1245_v59 = vcombine.low %v201_v51, %v202_v52 }
  0x36   :  { %v1230_v60 = vcombine.low %v171_v53, %v172_v54  ;;  %v1246_v61 = vcombine.low %v203_v55, %v204_v56 }
  0x3a   :  { %1328 = vmatmul.mubr.bf16.gmra.mrb[12].mxu0 %v1225_v0  ;;  %1360 = vmatmul.mubr.bf16.gmra.mrb[12].mxu1 %v1241_v1 }
  0x3b   :  { %1331 = vmatprep.mubr.bf16.mxu0 %v1226_v12  ;;  %1363 = vmatprep.mubr.bf16.mxu1 %v1242_v21 }
  0x42   :  { %1332 = vmatmul.mubr.bf16.gmra.mrb[16].mxu0 %v1227_v37  ;;  %1364 = vmatmul.mubr.bf16.gmra.mrb[16].mxu1 %v1243_v38 }
  0x43   :  { %1335 = vmatprep.mubr.bf16.mxu0 %v1228_v41  ;;  %1367 = vmatprep.mubr.bf16.mxu1 %v1244_v42 }
  0x4a   :  { %1336 = vmatmul.mubr.bf16.gmra.mrb[20].mxu0 %v1229_v58  ;;  %1368 = vmatmul.mubr.bf16.gmra.mrb[20].mxu1 %v1245_v59 }
  0x4b   :  { %1339 = vmatprep.mubr.bf16.mxu0 %v1230_v60  ;;  %1371 = vmatprep.mubr.bf16.mxu1 %v1246_v61 }
  0x52   :  { %1340 = vmatmul.mubr.bf16.gmra.mrb[24].mxu0 %v1231_v8  ;;  %1372 = vmatmul.mubr.bf16.gmra.mrb[24].mxu1 %v1247_v13 }
  0x53   :  { %1343 = vmatprep.mubr.bf16.mxu0 %v1232_v16  ;;  %1375 = vmatprep.mubr.bf16.mxu1 %v1248_v17 }
  0x5a   :  { %1344 = vmatmul.mubr.bf16.gmra.mrb[28].mxu0 %v1233_v19  ;;  %1376 = vmatmul.mubr.bf16.gmra.mrb[28].mxu1 %v1249_v25 }
  0xf5   :  { %v1317_v57 = vpop.f32.mrb[0].mxu0  ;;  %v1349_v63 = vpop.f32.mrb[0].mxu1 }
  0xf6   :  { %v1024_v3 = vadd.f32 %v1317_v57, %v1890_v7  ;;  %v1056_v4 = vadd.f32 %v1349_v63, %v1890_v7  ;;  %v565_v5 = vpop.f32.mrb[1].mxu0  ;;  %v693_v8 = vpop.f32.mrb[1].mxu1 }
  0xf7   :  { %v1022_v9 = vadd.f32 %v1890_v7, %v565_v5  ;;  %v1054_v10 = vadd.f32 %v1890_v7, %v693_v8  ;;  %v1318_v11 = vpop.f32.mrb[2].mxu0  ;;  %v1350_v13 = vpop.f32.mrb[2].mxu1 }
  0xf8   :  { %1404 = vtanh.f32 %v1024_v3  ;;  %v1025_v14 = vadd.f32 %v1318_v11, %v1890_v7  ;;  %v568_v15 = vpop.f32.mrb[3].mxu0  ;;  %v696_v16 = vpop.f32.mrb[3].mxu1  ;;  %v1057_v17 = vadd.f32 %v1350_v13, %v1890_v7 }
  0xf9   :  { %1406 = vtanh.f32 %v1056_v4  ;;  %v1023_v18 = vadd.f32 %v1890_v7, %v568_v15  ;;  %v1055_v19 = vadd.f32 %v1890_v7, %v696_v16 }
  0xfa   :  { %1408 = vtanh.f32 %v1022_v9 }
  0xfb   :  { %1410 = vtanh.f32 %v1054_v10 }
  0xfc   :  { %1412 = vtanh.f32 %v1025_v14 }
  0xfd   :  { %1414 = vtanh.f32 %v1057_v17  ;;  %v1321_v20 = vpop.f32.mrb[4].mxu0  ;;  %v1353_v25 = vpop.f32.mrb[4].mxu1 }
  0xfe   :  { %1416 = vtanh.f32 %v1023_v18  ;;  %v1028_v62 = vadd.f32 %v1321_v20, %v1890_v7  ;;  %v1060_v0 = vadd.f32 %v1353_v25, %v1890_v7  ;;  %v581_v1 = vpop.f32.mrb[5].mxu0  ;;  %v709_v2 = vpop.f32.mrb[5].mxu1 }
  0xff   :  { %1418 = vtanh.f32 %v1055_v19  ;;  %v1026_v6 = vadd.f32 %v1890_v7, %v581_v1  ;;  %v1058_v12 = vadd.f32 %v1890_v7, %v709_v2  ;;  %v1322_v21 = vpop.f32.mrb[6].mxu0  ;;  %v1354_v22 = vpop.f32.mrb[6].mxu1 }
 0x100   :  { %1420 = vtanh.f32 %v1028_v62  ;;  %v1029_v23 = vadd.f32 %v1322_v21, %v1890_v7  ;;  %v584_v24 = vpop.f32.mrb[7].mxu0  ;;  %v712_v26 = vpop.f32.mrb[7].mxu1  ;;  %v1061_v27 = vadd.f32 %v1354_v22, %v1890_v7 }
 0x101   :  { %1422 = vtanh.f32 %v1060_v0  ;;  %v1027_v29 = vadd.f32 %v1890_v7, %v584_v24  ;;  %v1059_v31 = vadd.f32 %v1890_v7, %v712_v26 }
 0x102   :  { %v1405_v28 = vpop.eup %1404  ;;  %1424 = vtanh.f32 %v1026_v6 }
 0x103   :  { %v1407_v30 = vpop.eup %1406  ;;  %1152 = vst [vmem:[%s2151_s3 + $0x10] sm:$0xff] %v1405_v28  ;;  %1426 = vtanh.f32 %v1058_v12 }
 0x104   :  { %v1409_v32 = vpop.eup %1408  ;;  %1184 = vst [vmem:[%s2151_s3 + $0x110] sm:$0xff] %v1407_v30  ;;  %1428 = vtanh.f32 %v1029_v23 }
 0x105   :  { %v1411_v33 = vpop.eup %1410  ;;  %1150 = vst [vmem:[%s2151_s3] sm:$0xff] %v1409_v32  ;;  %1430 = vtanh.f32 %v1061_v27  ;;  %v1325_v34 = vpop.f32.mrb[8].mxu0 }
 0x106   :  { %v1357_v35 = vpop.f32.mrb[8].mxu1  ;;  %v1413_v36 = vpop.eup %1412  ;;  %1182 = vst [vmem:[%s2151_s3 + $0x100] sm:$0xff] %v1411_v33  ;;  %1432 = vtanh.f32 %v1027_v29  ;;  %v1032_v37 = vadd.f32 %v1325_v34, %v1890_v7 }
 0x107   :  { %v1064_v38 = vadd.f32 %v1357_v35, %v1890_v7  ;;  %v597_v39 = vpop.f32.mrb[9].mxu0  ;;  %v725_v40 = vpop.f32.mrb[9].mxu1  ;;  %1153 = vst [vmem:[%s2151_s3 + $0x18] sm:$0xff] %v1413_v36  ;;  %1434 = vtanh.f32 %v1059_v31 }
 0x108   :  { %v1415_v41 = vpop.eup %1414  ;;  %v1030_v42 = vadd.f32 %v1890_v7, %v597_v39  ;;  %v1062_v43 = vadd.f32 %v1890_v7, %v725_v40  ;;  %v1326_v44 = vpop.f32.mrb[10].mxu0  ;;  %1436 = vtanh.f32 %v1032_v37 }
 0x109   :  { %v1358_v45 = vpop.f32.mrb[10].mxu1  ;;  %v1417_v46 = vpop.eup %1416  ;;  %1185 = vst [vmem:[%s2151_s3 + $0x118] sm:$0xff] %v1415_v41  ;;  %v1033_v47 = vadd.f32 %v1326_v44, %v1890_v7  ;;  %1438 = vtanh.f32 %v1064_v38 }
 0x10a   :  { %v600_v48 = vpop.f32.mrb[11].mxu0  ;;  %v728_v49 = vpop.f32.mrb[11].mxu1  ;;  %1151 = vst [vmem:[%s2151_s3 + $0x8] sm:$0xff] %v1417_v46  ;;  %v1065_v51 = vadd.f32 %v1358_v45, %v1890_v7  ;;  %1440 = vtanh.f32 %v1030_v42 }
 0x10b   :  { %v1419_v50 = vpop.eup %1418  ;;  %v1031_v53 = vadd.f32 %v1890_v7, %v600_v48  ;;  %1442 = vtanh.f32 %v1062_v43  ;;  %v1063_v55 = vadd.f32 %v1890_v7, %v728_v49 }
 0x10c   :  { %v1421_v52 = vpop.eup %1420  ;;  %1183 = vst [vmem:[%s2151_s3 + $0x108] sm:$0xff] %v1419_v50  ;;  %1444 = vtanh.f32 %v1033_v47 }
 0x10d   :  { %v1423_v54 = vpop.eup %1422  ;;  %1156 = vst [vmem:[%s2151_s3 + $0x30] sm:$0xff] %v1421_v52  ;;  %1446 = vtanh.f32 %v1065_v51  ;;  %v1329_v59 = vpop.f32.mrb[12].mxu0 }
 0x10e   :  { %v1425_v56 = vpop.eup %1424  ;;  %1188 = vst [vmem:[%s2151_s3 + $0x130] sm:$0xff] %v1423_v54  ;;  %v1361_v60 = vpop.f32.mrb[12].mxu1  ;;  %1448 = vtanh.f32 %v1031_v53  ;;  %v1036_v57 = vadd.f32 %v1329_v59, %v1890_v7 }
 0x10f   :  { %v1427_v58 = vpop.eup %1426  ;;  %1154 = vst [vmem:[%s2151_s3 + $0x20] sm:$0xff] %v1425_v56  ;;  %v1068_v63 = vadd.f32 %v1361_v60, %v1890_v7  ;;  %v613_v3 = vpop.f32.mrb[13].mxu0  ;;  %1450 = vtanh.f32 %v1063_v55 }
 0x110   :  { %v1429_v61 = vpop.eup %1428  ;;  %1186 = vst [vmem:[%s2151_s3 + $0x120] sm:$0xff] %v1427_v58  ;;  %v741_v4 = vpop.f32.mrb[13].mxu1  ;;  %v1034_v8 = vadd.f32 %v1890_v7, %v613_v3  ;;  %1452 = vtanh.f32 %v1036_v57 }
 0x111   :  { %v1431_v5 = vpop.eup %1430  ;;  %1157 = vst [vmem:[%s2151_s3 + $0x38] sm:$0xff] %v1429_v61  ;;  %v1066_v9 = vadd.f32 %v1890_v7, %v741_v4  ;;  %v1330_v10 = vpop.f32.mrb[14].mxu0  ;;  %1454 = vtanh.f32 %v1068_v63 }
 0x112   :  { %v1362_v11 = vpop.f32.mrb[14].mxu1  ;;  %v1433_v13 = vpop.eup %1432  ;;  %1189 = vst [vmem:[%s2151_s3 + $0x138] sm:$0xff] %v1431_v5  ;;  %v1037_v14 = vadd.f32 %v1330_v10, %v1890_v7  ;;  %1456 = vtanh.f32 %v1034_v8 }
 0x113   :  { %v616_v15 = vpop.f32.mrb[15].mxu0  ;;  %v744_v16 = vpop.f32.mrb[15].mxu1  ;;  %1155 = vst [vmem:[%s2151_s3 + $0x28] sm:$0xff] %v1433_v13  ;;  %v1069_v18 = vadd.f32 %v1362_v11, %v1890_v7  ;;  %1458 = vtanh.f32 %v1066_v9 }
 0x114   :  { %v1435_v17 = vpop.eup %1434  ;;  %v1035_v20 = vadd.f32 %v1890_v7, %v616_v15  ;;  %v1067_v62 = vadd.f32 %v1890_v7, %v744_v16  ;;  %1460 = vtanh.f32 %v1037_v14 }
 0x115   :  { %v1437_v19 = vpop.eup %1436  ;;  %1187 = vst [vmem:[%s2151_s3 + $0x128] sm:$0xff] %v1435_v17  ;;  %1462 = vtanh.f32 %v1069_v18  ;;  %v1333_v2 = vpop.f32.mrb[16].mxu0 }
 0x116   :  { %v1439_v25 = vpop.eup %1438  ;;  %1160 = vst [vmem:[%s2151_s3 + $0x50] sm:$0xff] %v1437_v19  ;;  %v1365_v6 = vpop.f32.mrb[16].mxu1  ;;  %1464 = vtanh.f32 %v1035_v20  ;;  %v1040_v21 = vadd.f32 %v1333_v2, %v1890_v7 }
 0x117   :  { %v1441_v0 = vpop.eup %1440  ;;  %1192 = vst [vmem:[%s2151_s3 + $0x150] sm:$0xff] %v1439_v25  ;;  %v1072_v22 = vadd.f32 %v1365_v6, %v1890_v7  ;;  %v629_v23 = vpop.f32.mrb[17].mxu0  ;;  %1466 = vtanh.f32 %v1067_v62 }
 0x118   :  { %v1443_v1 = vpop.eup %1442  ;;  %1158 = vst [vmem:[%s2151_s3 + $0x40] sm:$0xff] %v1441_v0  ;;  %v757_v24 = vpop.f32.mrb[17].mxu1  ;;  %v1038_v27 = vadd.f32 %v1890_v7, %v629_v23  ;;  %1468 = vtanh.f32 %v1040_v21 }
 0x119   :  { %v1445_v12 = vpop.eup %1444  ;;  %1190 = vst [vmem:[%s2151_s3 + $0x140] sm:$0xff] %v1443_v1  ;;  %v1070_v28 = vadd.f32 %v1890_v7, %v757_v24  ;;  %v1334_v29 = vpop.f32.mrb[18].mxu0  ;;  %1470 = vtanh.f32 %v1072_v22 }
 0x11a   :  { %v1447_v26 = vpop.eup %1446  ;;  %1161 = vst [vmem:[%s2151_s3 + $0x58] sm:$0xff] %v1445_v12  ;;  %v1366_v30 = vpop.f32.mrb[18].mxu1  ;;  %v1041_v32 = vadd.f32 %v1334_v29, %v1890_v7  ;;  %1472 = vtanh.f32 %v1038_v27 }
 0x11b   :  { %v1449_v31 = vpop.eup %1448  ;;  %1193 = vst [vmem:[%s2151_s3 + $0x158] sm:$0xff] %v1447_v26  ;;  %v632_v33 = vpop.f32.mrb[19].mxu0  ;;  %v1073_v36 = vadd.f32 %v1366_v30, %v1890_v7  ;;  %1474 = vtanh.f32 %v1070_v28 }
 0x11c   :  { %v760_v34 = vpop.f32.mrb[19].mxu1  ;;  %v1451_v35 = vpop.eup %1450  ;;  %1159 = vst [vmem:[%s2151_s3 + $0x48] sm:$0xff] %v1449_v31  ;;  %v1039_v38 = vadd.f32 %v1890_v7, %v632_v33  ;;  %1476 = vtanh.f32 %v1041_v32 }
 0x11d   :  { %v1453_v37 = vpop.eup %1452  ;;  %1191 = vst [vmem:[%s2151_s3 + $0x148] sm:$0xff] %v1451_v35  ;;  %v1071_v40 = vadd.f32 %v1890_v7, %v760_v34  ;;  %1478 = vtanh.f32 %v1073_v36  ;;  %v1337_v43 = vpop.f32.mrb[20].mxu0 }
 0x11e   :  { %v1455_v39 = vpop.eup %1454  ;;  %1164 = vst [vmem:[%s2151_s3 + $0x70] sm:$0xff] %v1453_v37  ;;  %v1369_v44 = vpop.f32.mrb[20].mxu1  ;;  %1480 = vtanh.f32 %v1039_v38  ;;  %v1044_v46 = vadd.f32 %v1337_v43, %v1890_v7 }
 0x11f   :  { %v1457_v41 = vpop.eup %1456  ;;  %1196 = vst [vmem:[%s2151_s3 + $0x170] sm:$0xff] %v1455_v39  ;;  %v1076_v47 = vadd.f32 %v1369_v44, %v1890_v7  ;;  %v645_v48 = vpop.f32.mrb[21].mxu0  ;;  %1482 = vtanh.f32 %v1071_v40 }
 0x120   :  { %v1459_v42 = vpop.eup %1458  ;;  %1162 = vst [vmem:[%s2151_s3 + $0x60] sm:$0xff] %v1457_v41  ;;  %v773_v49 = vpop.f32.mrb[21].mxu1  ;;  %v1042_v51 = vadd.f32 %v1890_v7, %v645_v48  ;;  %1484 = vtanh.f32 %v1044_v46 }
 0x121   :  { %v1461_v45 = vpop.eup %1460  ;;  %1194 = vst [vmem:[%s2151_s3 + $0x160] sm:$0xff] %v1459_v42  ;;  %v1074_v52 = vadd.f32 %v1890_v7, %v773_v49  ;;  %v1338_v53 = vpop.f32.mrb[22].mxu0  ;;  %1486 = vtanh.f32 %v1076_v47 }
 0x122   :  { %v1463_v50 = vpop.eup %1462  ;;  %1165 = vst [vmem:[%s2151_s3 + $0x78] sm:$0xff] %v1461_v45  ;;  %v1370_v54 = vpop.f32.mrb[22].mxu1  ;;  %v1045_v56 = vadd.f32 %v1338_v53, %v1890_v7  ;;  %1488 = vtanh.f32 %v1042_v51 }
 0x123   :  { %v1465_v55 = vpop.eup %1464  ;;  %1197 = vst [vmem:[%s2151_s3 + $0x178] sm:$0xff] %v1463_v50  ;;  %v648_v58 = vpop.f32.mrb[23].mxu0  ;;  %v1077_v61 = vadd.f32 %v1370_v54, %v1890_v7  ;;  %1490 = vtanh.f32 %v1074_v52 }
 0x124   :  { %v776_v59 = vpop.f32.mrb[23].mxu1  ;;  %v1467_v60 = vpop.eup %1466  ;;  %1163 = vst [vmem:[%s2151_s3 + $0x68] sm:$0xff] %v1465_v55  ;;  %v1043_v63 = vadd.f32 %v1890_v7, %v648_v58  ;;  %1492 = vtanh.f32 %v1045_v56 }
 0x125   :  { %v1469_v57 = vpop.eup %1468  ;;  %1195 = vst [vmem:[%s2151_s3 + $0x168] sm:$0xff] %v1467_v60  ;;  %v1075_v4 = vadd.f32 %v1890_v7, %v776_v59  ;;  %1494 = vtanh.f32 %v1077_v61  ;;  %v1341_v9 = vpop.f32.mrb[24].mxu0 }
 0x126   :  { %v1471_v3 = vpop.eup %1470  ;;  %1168 = vst [vmem:[%s2151_s3 + $0x90] sm:$0xff] %v1469_v57  ;;  %v1373_v10 = vpop.f32.mrb[24].mxu1  ;;  %1496 = vtanh.f32 %v1043_v63  ;;  %v1048_v13 = vadd.f32 %v1341_v9, %v1890_v7 }
 0x127   :  { %v1473_v5 = vpop.eup %1472  ;;  %1200 = vst [vmem:[%s2151_s3 + $0x190] sm:$0xff] %v1471_v3  ;;  %v1080_v14 = vadd.f32 %v1373_v10, %v1890_v7  ;;  %v661_v15 = vpop.f32.mrb[25].mxu0  ;;  %1498 = vtanh.f32 %v1075_v4 }
 0x128   :  { %v1475_v8 = vpop.eup %1474  ;;  %1166 = vst [vmem:[%s2151_s3 + $0x80] sm:$0xff] %v1473_v5  ;;  %v789_v16 = vpop.f32.mrb[25].mxu1  ;;  %v1046_v18 = vadd.f32 %v1890_v7, %v661_v15  ;;  %1500 = vtanh.f32 %v1048_v13 }
 0x129   :  { %v1477_v11 = vpop.eup %1476  ;;  %1198 = vst [vmem:[%s2151_s3 + $0x180] sm:$0xff] %v1475_v8  ;;  %v1078_v19 = vadd.f32 %v1890_v7, %v789_v16  ;;  %v1342_v20 = vpop.f32.mrb[26].mxu0  ;;  %1502 = vtanh.f32 %v1080_v14 }
 0x12a   :  { %v1479_v17 = vpop.eup %1478  ;;  %1169 = vst [vmem:[%s2151_s3 + $0x98] sm:$0xff] %v1477_v11  ;;  %v1374_v25 = vpop.f32.mrb[26].mxu1  ;;  %v1049_v0 = vadd.f32 %v1342_v20, %v1890_v7  ;;  %1504 = vtanh.f32 %v1046_v18 }
 0x12b   :  { %v1481_v62 = vpop.eup %1480  ;;  %1201 = vst [vmem:[%s2151_s3 + $0x198] sm:$0xff] %v1479_v17  ;;  %v664_v1 = vpop.f32.mrb[27].mxu0  ;;  %v1081_v12 = vadd.f32 %v1374_v25, %v1890_v7  ;;  %1506 = vtanh.f32 %v1078_v19 }
 0x12c   :  { %v792_v2 = vpop.f32.mrb[27].mxu1  ;;  %v1483_v6 = vpop.eup %1482  ;;  %1167 = vst [vmem:[%s2151_s3 + $0x88] sm:$0xff] %v1481_v62  ;;  %v1047_v22 = vadd.f32 %v1890_v7, %v664_v1  ;;  %1508 = vtanh.f32 %v1049_v0 }
 0x12d   :  { %v1485_v21 = vpop.eup %1484  ;;  %1199 = vst [vmem:[%s2151_s3 + $0x188] sm:$0xff] %v1483_v6  ;;  %v1079_v24 = vadd.f32 %v1890_v7, %v792_v2  ;;  %1510 = vtanh.f32 %v1081_v12  ;;  %v1345_v28 = vpop.f32.mrb[28].mxu0 }
 0x12e   :  { %v1487_v23 = vpop.eup %1486  ;;  %1172 = vst [vmem:[%s2151_s3 + $0xb0] sm:$0xff] %v1485_v21  ;;  %v1377_v29 = vpop.f32.mrb[28].mxu1  ;;  %1512 = vtanh.f32 %v1047_v22  ;;  %v1052_v31 = vadd.f32 %v1345_v28, %v1890_v7 }
 0x12f   :  { %v1489_v26 = vpop.eup %1488  ;;  %1204 = vst [vmem:[%s2151_s3 + $0x1b0] sm:$0xff] %v1487_v23  ;;  %v1084_v32 = vadd.f32 %v1377_v29, %v1890_v7  ;;  %v677_v33 = vpop.f32.mrb[29].mxu0  ;;  %1514 = vtanh.f32 %v1079_v24 }
 0x130   :  { %v1491_v27 = vpop.eup %1490  ;;  %1170 = vst [vmem:[%s2151_s3 + $0xa0] sm:$0xff] %v1489_v26  ;;  %v805_v34 = vpop.f32.mrb[29].mxu1  ;;  %v1050_v36 = vadd.f32 %v1890_v7, %v677_v33  ;;  %1516 = vtanh.f32 %v1052_v31 }
 0x131   :  { %v1493_v30 = vpop.eup %1492  ;;  %1202 = vst [vmem:[%s2151_s3 + $0x1a0] sm:$0xff] %v1491_v27  ;;  %v1082_v37 = vadd.f32 %v1890_v7, %v805_v34  ;;  %v1346_v38 = vpop.f32.mrb[30].mxu0  ;;  %1518 = vtanh.f32 %v1084_v32 }
 0x132   :  { %v1495_v35 = vpop.eup %1494  ;;  %1173 = vst [vmem:[%s2151_s3 + $0xb8] sm:$0xff] %v1493_v30  ;;  %v1378_v39 = vpop.f32.mrb[30].mxu1  ;;  %v1053_v41 = vadd.f32 %v1346_v38, %v1890_v7  ;;  %1520 = vtanh.f32 %v1050_v36 }
 0x133   :  { %v1497_v40 = vpop.eup %1496  ;;  %1205 = vst [vmem:[%s2151_s3 + $0x1b8] sm:$0xff] %v1495_v35  ;;  %v680_v42 = vpop.f32.mrb[31].mxu0  ;;  %v1085_v45 = vadd.f32 %v1378_v39, %v1890_v7  ;;  %1522 = vtanh.f32 %v1082_v37 }
 0x134   :  { %v808_v43 = vpop.f32.mrb[31].mxu1  ;;  %v1499_v44 = vpop.eup %1498  ;;  %1171 = vst [vmem:[%s2151_s3 + $0xa8] sm:$0xff] %v1497_v40  ;;  %v1051_v47 = vadd.f32 %v1890_v7, %v680_v42  ;;  %1524 = vtanh.f32 %v1053_v41 }
 0x135   :  { %v1501_v46 = vpop.eup %1500  ;;  %1203 = vst [vmem:[%s2151_s3 + $0x1a8] sm:$0xff] %v1499_v44  ;;  %v1083_v49 = vadd.f32 %v1890_v7, %v808_v43  ;;  %1526 = vtanh.f32 %v1085_v45 }
 0x136   :  { %v1503_v48 = vpop.eup %1502  ;;  %1176 = vst [vmem:[%s2151_s3 + $0xd0] sm:$0xff] %v1501_v46  ;;  %1528 = vtanh.f32 %v1051_v47 }
 0x137   :  { %v1505_v50 = vpop.eup %1504  ;;  %1208 = vst [vmem:[%s2151_s3 + $0x1d0] sm:$0xff] %v1503_v48  ;;  %1530 = vtanh.f32 %v1083_v49 }
 0x138   :  { %v1507_v51 = vpop.eup %1506  ;;  %1174 = vst [vmem:[%s2151_s3 + $0xc0] sm:$0xff] %v1505_v50 }
 0x139   :  { %v1509_v52 = vpop.eup %1508  ;;  %1206 = vst [vmem:[%s2151_s3 + $0x1c0] sm:$0xff] %v1507_v51 }
 0x13a   :  { %v1511_v53 = vpop.eup %1510  ;;  %1177 = vst [vmem:[%s2151_s3 + $0xd8] sm:$0xff] %v1509_v52 }
 0x13b   :  { %v1513_v7 = vpop.eup %1512  ;;  %1209 = vst [vmem:[%s2151_s3 + $0x1d8] sm:$0xff] %v1511_v53 }
 0x13c   :  { %v1515_v54 = vpop.eup %1514  ;;  %1175 = vst [vmem:[%s2151_s3 + $0xc8] sm:$0xff] %v1513_v7 }
 0x13d   :  { %v1517_v55 = vpop.eup %1516  ;;  %1207 = vst [vmem:[%s2151_s3 + $0x1c8] sm:$0xff] %v1515_v54 }
 0x13e   :  { %v1519_v56 = vpop.eup %1518  ;;  %1180 = vst [vmem:[%s2151_s3 + $0xf0] sm:$0xff] %v1517_v55 }
 0x13f   :  { %v1521_v58 = vpop.eup %1520  ;;  %1212 = vst [vmem:[%s2151_s3 + $0x1f0] sm:$0xff] %v1519_v56 }
 0x140   :  { %v1523_v59 = vpop.eup %1522  ;;  %1178 = vst [vmem:[%s2151_s3 + $0xe0] sm:$0xff] %v1521_v58 }
 0x141   :  { %v1525_v60 = vpop.eup %1524  ;;  %1210 = vst [vmem:[%s2151_s3 + $0x1e0] sm:$0xff] %v1523_v59 }
 0x142   :  { %v1527_v61 = vpop.eup %1526  ;;  %1181 = vst [vmem:[%s2151_s3 + $0xf8] sm:$0xff] %v1525_v60 }
 0x143   :  { %v1529_v57 = vpop.eup %1528  ;;  %1213 = vst [vmem:[%s2151_s3 + $0x1f8] sm:$0xff] %v1527_v61 }
 0x144   :  { %v1531_v63 = vpop.eup %1530  ;;  %1179 = vst [vmem:[%s2151_s3 + $0xe8] sm:$0xff] %v1529_v57 }
 0x145   :  { %1211 = vst [vmem:[%s2151_s3 + $0x1e8] sm:$0xff] %v1531_v63 }

</bundles_post_ra>
